<compile_context>
chip_gen: v7x
topology: tpu7x:2x2x1
jax: 0.10.0
libtpu: 0.0.40
codegen_flags: <defaults>
</compile_context>

<pallas_src>
import functools

import jax
import jax.numpy as jnp
from jax import lax
from jax.experimental import pallas as pl
from jax.experimental.pallas import tpu as pltpu


# --------------------------------------------------------------------------- #
# Fused kernel: whole forward for one graph per grid step
# --------------------------------------------------------------------------- #
def _fused_forward_kernel(nf_ref, nm_ref, adj_ref,
                          w_ref, al_ref, ar_ref, gatb_ref,
                          gw_ref, gpb_ref,
                          wih_ref, whh_ref, lb_ref,
                          cw_ref, cb_ref,
                          out_ref, x_scr,
                          *, num_heads, hidden_dim, num_layers, nfeat_dim):
    """One graph's full forward.

    nf_ref:   (N, Fn)   node features
    nm_ref:   (N, Fm)   name features (Fn + Fm == hidden_dim)
    adj_ref:  (N, N)    adj[u, v] = 1.0 iff edge u -> v
    w_ref:    (3, H, D, D)    GATConv.fc weight per layer/head (bias=False)
    al_ref:   (3, H, 1, D)    attn_l per layer/head
    ar_ref:   (3, H, 1, D)    attn_r per layer/head
    gatb_ref: (3, H, 1, D)    GATConv bias per layer/head
    gw_ref:   (4, 1, D)       gate_nn weights (transposed) for the 4 poolings
    gpb_ref:  (4, 1, 1)       gate_nn biases
    wih_ref:  (L, D, 4D)      W_ih^T per LSTM layer (gate order i,f,g,o)
    whh_ref:  (L, D, 4D)      W_hh^T per LSTM layer
    lb_ref:   (L, 1, 4D)      b_ih + b_hh per LSTM layer
    cw_ref:   (D, 1), cb_ref: (1, 1)   classifier
    out_ref:  (1, 1)          sigmoid(logit) for this graph
    x_scr:    (N, D) VMEM scratch used to build cat(nfeats, names) in-kernel
    """
    N = adj_ref.shape[0]
    D = hidden_dim
    H = num_heads

    # ---- x0 = cat(nfeats, names) built directly in VMEM (no host concat) ----
    x_scr[:, :nfeat_dim] = nf_ref[...]
    x_scr[:, nfeat_dim:] = nm_ref[...]
    x0 = x_scr[...]                                                # (N, D)

    adj = adj_ref[...]
    edge_mask = adj > 0.0
    edge_f = edge_mask.astype(jnp.float32)
    inv_heads = 1.0 / float(H)

    # ---- GlobalAttentionPooling (gate_nn = Linear(D, 1)) --------------------
    def pool(feat, k):
        gw = gw_ref[k]                                             # (1, D)
        gb = gpb_ref[k]                                            # (1, 1)
        # gate on VPU (broadcast-multiply + lane reduce) instead of 1-lane matmul
        gate = jnp.sum(feat * gw, axis=-1, keepdims=True) + gb     # (N, 1)
        gate = gate - jnp.max(gate, axis=0, keepdims=True)
        p = jnp.exp(gate)
        inv = pl.reciprocal(jnp.sum(p, axis=0, keepdims=True), approx=True)
        return jnp.sum((p * inv) * feat, axis=0, keepdims=True)    # (1, D)

    # ---- One GATConv layer + ReLU(per-head) + mean over heads ---------------
    def gat_layer(feat_in, layer):
        acc = jnp.zeros((N, D), jnp.float32)
        for h in range(H):
            w = w_ref[layer, h]                                    # (D, D)
            feat_h = jnp.dot(feat_in, w,
                             preferred_element_type=jnp.float32)   # (N, D)
            al = al_ref[layer, h]                                  # (1, D)
            ar = ar_ref[layer, h]                                  # (1, D)
            # el[u] = <feat_h[u], attn_l>, er[v] = <feat_h[v], attn_r>
            el = lax.dot_general(feat_h, al, (((1,), (1,)), ((), ())),
                                 preferred_element_type=jnp.float32)  # (N, 1)
            er = lax.dot_general(ar, feat_h, (((1,), (1,)), ((), ())),
                                 preferred_element_type=jnp.float32)  # (1, N)
            e = el + er                                            # (N, N): e[u, v]
            e = jnp.where(e > 0, e, 0.2 * e)                       # LeakyReLU(0.2)
            e = jnp.where(edge_mask, e, -1e9)
            # edge-softmax over incoming edges (over u, for each dst v)
            e = e - jnp.max(e, axis=0, keepdims=True)
            p = jnp.exp(e) * edge_f
            s = jnp.maximum(jnp.sum(p, axis=0, keepdims=True), 1e-30)  # 0-indegree guard
            alpha = p * pl.reciprocal(s, approx=True)              # (N, N)
            # rst[v, d] = sum_u alpha[u, v] * feat_h[u, d]
            rst = lax.dot_general(alpha, feat_h, (((0,), (0,)), ((), ())),
                                  preferred_element_type=jnp.float32)  # (N, D)
            rst = rst + gatb_ref[layer, h]                         # + bias (1, D)
            acc = acc + jnp.maximum(rst, 0.0)                      # ReLU per head
        return acc * inv_heads                                     # mean over heads

    # ---- Forward: pool(x0), 3x (GAT -> pool), all VMEM-resident --------------
    hg = [pool(x0, 0)]
    feat = x0
    for layer in range(3):
        feat = gat_layer(feat, layer)
        hg.append(pool(feat, layer + 1))                           # list of (1, D)

    # ---- Multi-layer LSTM over the 4-step sequence (batch of 1 graph) -------
    xs = hg
    h = jnp.zeros((1, D), jnp.float32)
    for l in range(num_layers):
        wih = wih_ref[l]                                           # (D, 4D)
        whh = whh_ref[l]                                           # (D, 4D)
        bias = lb_ref[l]                                           # (1, 4D), loaded once
        h = jnp.zeros((1, D), jnp.float32)
        c = jnp.zeros((1, D), jnp.float32)
        outs = []
        for t in range(len(xs)):
            gates = (jnp.dot(xs[t], wih, preferred_element_type=jnp.float32)
                     + jnp.dot(h, whh, preferred_element_type=jnp.float32)
                     + bias)                                       # (1, 4D)
            i = jax.nn.sigmoid(gates[:, 0 * D:1 * D])
            f = jax.nn.sigmoid(gates[:, 1 * D:2 * D])
            g = jnp.tanh(gates[:, 2 * D:3 * D])
            o = jax.nn.sigmoid(gates[:, 3 * D:4 * D])
            c = f * c + i * g
            h = o * jnp.tanh(c)
            outs.append(h)
        xs = outs
    # h == last_hidden_lstm[-1]; F.dropout is an eval-mode no-op
    logits = jnp.dot(h, cw_ref[...], preferred_element_type=jnp.float32) + cb_ref[...]
    out_ref[...] = jax.nn.sigmoid(logits)                          # (1, 1)


# --------------------------------------------------------------------------- #
# Wrapper: single pallas_call for the whole model
# --------------------------------------------------------------------------- #
def gat3_names_lstm_forward(params, nfeats, names, adj, *, num_heads, num_layers):
    # TODO(synk): dropout / feat_drop / attn_drop are training-only; eval-mode no-ops here.
    B, N, Fn = nfeats.shape
    Fm = names.shape[-1]
    D = params["cls_w"].shape[0]
    H = num_heads
    L = num_layers
    assert Fn + Fm == D, "module requires num_features == hidden_dim"

    kernel = functools.partial(_fused_forward_kernel, num_heads=H, hidden_dim=D,
                               num_layers=L, nfeat_dim=Fn)

    out = pl.pallas_call(
        kernel,
        out_shape=jax.ShapeDtypeStruct((B, 1, 1), jnp.float32),
        grid=(B,),
        in_specs=[
            pl.BlockSpec((None, N, Fn), lambda b: (b, 0, 0)),       # nfeats (per graph)
            pl.BlockSpec((None, N, Fm), lambda b: (b, 0, 0)),       # names  (per graph)
            pl.BlockSpec((None, N, N), lambda b: (b, 0, 0)),        # adj    (per graph)
            pl.BlockSpec((3, H, D, D), lambda b: (0, 0, 0, 0)),     # gat_w
            pl.BlockSpec((3, H, 1, D), lambda b: (0, 0, 0, 0)),     # gat_al
            pl.BlockSpec((3, H, 1, D), lambda b: (0, 0, 0, 0)),     # gat_ar
            pl.BlockSpec((3, H, 1, D), lambda b: (0, 0, 0, 0)),     # gat_b
            pl.BlockSpec((4, 1, D), lambda b: (0, 0, 0)),           # gate_w
            pl.BlockSpec((4, 1, 1), lambda b: (0, 0, 0)),           # gate_b
            pl.BlockSpec((L, D, 4 * D), lambda b: (0, 0, 0)),       # lstm W_ih^T
            pl.BlockSpec((L, D, 4 * D), lambda b: (0, 0, 0)),       # lstm W_hh^T
            pl.BlockSpec((L, 1, 4 * D), lambda b: (0, 0, 0)),       # lstm bias
            pl.BlockSpec((D, 1), lambda b: (0, 0)),                 # cls_w
            pl.BlockSpec((1, 1), lambda b: (0, 0)),                 # cls_b
        ],
        out_specs=pl.BlockSpec((None, 1, 1), lambda b: (b, 0, 0)),
        scratch_shapes=[pltpu.VMEM((N, D), jnp.float32)],
        compiler_params=pltpu.CompilerParams(
            dimension_semantics=("parallel",)),                     # 2 TCs on v7x
    )(nfeats, names, adj,
      params["gat_w"], params["gat_al"], params["gat_ar"], params["gat_b"],
      params["gate_w"], params["gate_b"],
      params["lstm_wih"], params["lstm_whh"], params["lstm_b"],
      params["cls_w"], params["cls_b"])
    return out.reshape(B, 1)


# --------------------------------------------------------------------------- #
# Parameters (pre-stacked in the layouts the kernel consumes)
# --------------------------------------------------------------------------- #
def init_params(key, hidden_dim, num_heads, num_layers):
    D, H, L = hidden_dim, num_heads, num_layers
    keys = iter(jax.random.split(key, 16))

    def nrm(shape, scale=0.1):
        return scale * jax.random.normal(next(keys), shape, jnp.float32)

    return {
        "gat_w": nrm((3, H, D, D)),         # GATConv.fc per layer/head (bias=False)
        "gat_al": nrm((3, H, 1, D)),        # attn_l
        "gat_ar": nrm((3, H, 1, D)),        # attn_r
        "gat_b": nrm((3, H, 1, D), 0.01),   # GATConv bias
        "gate_w": nrm((4, 1, D)),           # gate_nn weights (transposed)
        "gate_b": nrm((4, 1, 1), 0.01),
        "lstm_wih": nrm((L, D, 4 * D)),     # W_ih^T per layer, gate order i,f,g,o
        "lstm_whh": nrm((L, D, 4 * D)),     # W_hh^T per layer
        "lstm_b": nrm((L, 1, 4 * D), 0.01), # b_ih + b_hh
        "cls_w": nrm((D, 1)),
        "cls_b": nrm((1, 1), 0.01),
    }


# --------------------------------------------------------------------------- #
if __name__ == "__main__":
    B, N = 2, 16                        # graphs in batch, nodes per graph
    nfeat_dim, names_dim = 24, 8
    hidden_dim = nfeat_dim + names_dim  # must equal num_features (see note above)
    num_heads, num_layers = 4, 2

    key = jax.random.PRNGKey(0)
    kp, kn, km, ka = jax.random.split(key, 4)
    params = init_params(kp, hidden_dim, num_heads, num_layers)
    nfeats = jax.random.normal(kn, (B, N, nfeat_dim), jnp.float32)
    names = jax.random.normal(km, (B, N, names_dim), jnp.float32)
    # dense adjacency; self-loops guarantee every node has an incoming edge
    # TODO(synk): for large N, feed adj as int8/bf16 to cut HBM bytes.
    adj = (jax.random.uniform(ka, (B, N, N)) < 0.3).astype(jnp.float32)
    adj = jnp.maximum(adj, jnp.eye(N, dtype=jnp.float32)[None])

    fwd = jax.jit(functools.partial(gat3_names_lstm_forward,
                                    num_heads=num_heads, num_layers=num_layers))
    out = fwd(params, nfeats, names, adj)
    jax.block_until_ready(out)
    assert out.shape == (B, 1), out.shape
    assert bool(jnp.all(jnp.isfinite(out)))
    print("KERNEL_OK")
</pallas_src>

<mosaic_0001>
module attributes {stable_mosaic.version = 11 : i64} {
  func.func @_fused_forward_kernel(%arg0: i32, %arg1: memref<1x16x24xf32, #tpu.memory_space<vmem>>, %arg2: memref<1x16x8xf32, #tpu.memory_space<vmem>>, %arg3: memref<1x16x16xf32, #tpu.memory_space<vmem>>, %arg4: memref<3x4x32x32xf32, #tpu.memory_space<vmem>>, %arg5: memref<3x4x1x32xf32, #tpu.memory_space<vmem>>, %arg6: memref<3x4x1x32xf32, #tpu.memory_space<vmem>>, %arg7: memref<3x4x1x32xf32, #tpu.memory_space<vmem>>, %arg8: memref<4x1x32xf32, #tpu.memory_space<vmem>>, %arg9: memref<4x1x1xf32, #tpu.memory_space<vmem>>, %arg10: memref<2x32x128xf32, #tpu.memory_space<vmem>>, %arg11: memref<2x32x128xf32, #tpu.memory_space<vmem>>, %arg12: memref<2x1x128xf32, #tpu.memory_space<vmem>>, %arg13: memref<32x1xf32, #tpu.memory_space<vmem>>, %arg14: memref<1x1xf32, #tpu.memory_space<vmem>>, %arg15: memref<1x1x1xf32, #tpu.memory_space<vmem>>, %arg16: memref<16x32xf32, #tpu.memory_space<vmem>>) attributes {dimension_semantics = [#tpu.dimension_semantics<parallel>], iteration_bounds = array<i64: 2>, scalar_prefetch = 0 : i64, scratch_operands = 1 : i64, tpu.core_type = #tpu.core_type<tc>, window_params = [{transform_indices = @transform_0, window_bounds = array<i64: 1, 16, 24>}, {transform_indices = @transform_1, window_bounds = array<i64: 1, 16, 8>}, {transform_indices = @transform_2, window_bounds = array<i64: 1, 16, 16>}, {pipeline_mode = #tpu.pipeline_mode<synchronous>, transform_indices = @transform_3, window_bounds = array<i64: 3, 4, 32, 32>}, {pipeline_mode = #tpu.pipeline_mode<synchronous>, transform_indices = @transform_4, window_bounds = array<i64: 3, 4, 1, 32>}, {pipeline_mode = #tpu.pipeline_mode<synchronous>, transform_indices = @transform_5, window_bounds = array<i64: 3, 4, 1, 32>}, {pipeline_mode = #tpu.pipeline_mode<synchronous>, transform_indices = @transform_6, window_bounds = array<i64: 3, 4, 1, 32>}, {pipeline_mode = #tpu.pipeline_mode<synchronous>, transform_indices = @transform_7, window_bounds = array<i64: 4, 1, 32>}, {pipeline_mode = #tpu.pipeline_mode<synchronous>, transform_indices = @transform_8, window_bounds = array<i64: 4, 1, 1>}, {pipeline_mode = #tpu.pipeline_mode<synchronous>, transform_indices = @transform_9, window_bounds = array<i64: 2, 32, 128>}, {pipeline_mode = #tpu.pipeline_mode<synchronous>, transform_indices = @transform_10, window_bounds = array<i64: 2, 32, 128>}, {pipeline_mode = #tpu.pipeline_mode<synchronous>, transform_indices = @transform_11, window_bounds = array<i64: 2, 1, 128>}, {pipeline_mode = #tpu.pipeline_mode<synchronous>, transform_indices = @transform_12, window_bounds = array<i64: 32, 1>}, {pipeline_mode = #tpu.pipeline_mode<synchronous>, transform_indices = @transform_13, window_bounds = array<i64: 1, 1>}, {transform_indices = @transform_14, window_bounds = array<i64: 1, 1, 1>}]} {
    %c0 = arith.constant 0 : index
    %c0_0 = arith.constant 0 : index
    %c0_1 = arith.constant 0 : index
    %0 = vector.load %arg1[%c0, %c0_0, %c0_1] : memref<1x16x24xf32, #tpu.memory_space<vmem>>, vector<1x16x24xf32>
    %1 = vector.shape_cast %0 : vector<1x16x24xf32> to vector<16x24xf32>
    %c0_2 = arith.constant 0 : index
    %c0_3 = arith.constant 0 : index
    %2 = vector.load %arg16[%c0_2, %c0_3] : memref<16x32xf32, #tpu.memory_space<vmem>>, vector<16x24xf32>
    tpu.vector_store %arg16[%c0_2, %c0_3], %1 {strides = array<i32>} : memref<16x32xf32, #tpu.memory_space<vmem>>, vector<16x24xf32>,
    %c0_4 = arith.constant 0 : index
    %c0_5 = arith.constant 0 : index
    %c0_6 = arith.constant 0 : index
    %3 = vector.load %arg2[%c0_4, %c0_5, %c0_6] : memref<1x16x8xf32, #tpu.memory_space<vmem>>, vector<1x16x8xf32>
    %4 = vector.shape_cast %3 : vector<1x16x8xf32> to vector<16x8xf32>
    %c0_7 = arith.constant 0 : index
    %c24 = arith.constant 24 : index
    %5 = vector.load %arg16[%c0_7, %c24] : memref<16x32xf32, #tpu.memory_space<vmem>>, vector<16x8xf32>
    tpu.vector_store %arg16[%c0_7, %c24], %4 {strides = array<i32>} : memref<16x32xf32, #tpu.memory_space<vmem>>, vector<16x8xf32>,
    %c0_8 = arith.constant 0 : index
    %c0_9 = arith.constant 0 : index
    %6 = vector.load %arg16[%c0_8, %c0_9] : memref<16x32xf32, #tpu.memory_space<vmem>>, vector<16x32xf32>
    %c0_10 = arith.constant 0 : index
    %c0_11 = arith.constant 0 : index
    %c0_12 = arith.constant 0 : index
    %7 = vector.load %arg3[%c0_10, %c0_11, %c0_12] : memref<1x16x16xf32, #tpu.memory_space<vmem>>, vector<1x16x16xf32>
    %8 = vector.shape_cast %7 : vector<1x16x16xf32> to vector<16x16xf32>
    %cst = arith.constant 0.000000e+00 : f32
    %9 = vector.broadcast %cst : f32 to vector<16x16xf32>
    %10 = arith.cmpf ogt, %8, %9 : vector<16x16xf32>
    %11 = arith.extui %10 : vector<16x16xi1> to vector<16x16xi32>
    %12 = arith.sitofp %11 : vector<16x16xi32> to vector<16x16xf32>
    %c0_13 = arith.constant 0 : index
    %c0_14 = arith.constant 0 : index
    %c0_15 = arith.constant 0 : index
    %13 = vector.load %arg8[%c0_13, %c0_14, %c0_15] : memref<4x1x32xf32, #tpu.memory_space<vmem>>, vector<1x1x32xf32>
    %14 = vector.shape_cast %13 : vector<1x1x32xf32> to vector<1x32xf32>
    %c0_16 = arith.constant 0 : index
    %c0_17 = arith.constant 0 : index
    %c0_18 = arith.constant 0 : index
    %15 = vector.load %arg9[%c0_16, %c0_17, %c0_18] : memref<4x1x1xf32, #tpu.memory_space<vmem>>, vector<1x1x1xf32>
    %16 = vector.shape_cast %15 : vector<1x1x1xf32> to vector<1x1xf32>
    %17 = vector.broadcast %14 : vector<1x32xf32> to vector<16x32xf32>
    %18 = arith.mulf %6, %17 : vector<16x32xf32>
    %cst_19 = arith.constant dense<0.000000e+00> : vector<16xf32>
    %19 = vector.multi_reduction <add>, %18, %cst_19 [1] : vector<16x32xf32> to vector<16xf32>
    %20 = vector.shape_cast %19 : vector<16xf32> to vector<16x1xf32>
    %21 = vector.broadcast %16 : vector<1x1xf32> to vector<16x1xf32>
    %22 = arith.addf %20, %21 : vector<16x1xf32>
    %cst_20 = arith.constant dense<0xFF800000> : vector<1xf32>
    %23 = vector.multi_reduction <maximumf>, %22, %cst_20 [0] : vector<16x1xf32> to vector<1xf32>
    %24 = vector.shape_cast %23 : vector<1xf32> to vector<1x1xf32>
    %25 = vector.broadcast %24 : vector<1x1xf32> to vector<16x1xf32>
    %26 = arith.subf %22, %25 : vector<16x1xf32>
    %27 = math.exp %26 : vector<16x1xf32>
    %cst_21 = arith.constant dense<0.000000e+00> : vector<1xf32>
    %28 = vector.multi_reduction <add>, %27, %cst_21 [0] : vector<16x1xf32> to vector<1xf32>
    %29 = vector.shape_cast %28 : vector<1xf32> to vector<1x1xf32>
    %30 = tpu.reciprocal %29 {approx = true} : vector<1x1xf32> -> vector<1x1xf32>
    %31 = vector.broadcast %30 : vector<1x1xf32> to vector<16x1xf32>
    %32 = arith.mulf %27, %31 : vector<16x1xf32>
    %33 = vector.broadcast %32 : vector<16x1xf32> to vector<16x32xf32>
    %34 = arith.mulf %33, %6 : vector<16x32xf32>
    %cst_22 = arith.constant dense<0.000000e+00> : vector<32xf32>
    %35 = vector.multi_reduction <add>, %34, %cst_22 [0] : vector<16x32xf32> to vector<32xf32>
    %36 = vector.shape_cast %35 : vector<32xf32> to vector<1x32xf32>
    %cst_23 = arith.constant 0.000000e+00 : f32
    %37 = vector.broadcast %cst_23 : f32 to vector<16x32xf32>
    %c0_24 = arith.constant 0 : index
    %c0_25 = arith.constant 0 : index
    %c0_26 = arith.constant 0 : index
    %c0_27 = arith.constant 0 : index
    %38 = vector.load %arg4[%c0_24, %c0_25, %c0_26, %c0_27] : memref<3x4x32x32xf32, #tpu.memory_space<vmem>>, vector<1x1x32x32xf32>
    %39 = vector.shape_cast %38 : vector<1x1x32x32xf32> to vector<32x32xf32>
    %cst_28 = arith.constant dense<0.000000e+00> : vector<16x32xf32>
    %40 = tpu.matmul %6, %39, %cst_28 {dimension_numbers = #tpu.dot_dimension_numbers<[1], [0], [0], [1], [0, 0, 1, 1], [], []>} : vector<16x32xf32>, vector<32x32xf32>, vector<16x32xf32> -> vector<16x32xf32>
    %c0_29 = arith.constant 0 : index
    %c0_30 = arith.constant 0 : index
    %c0_31 = arith.constant 0 : index
    %c0_32 = arith.constant 0 : index
    %41 = vector.load %arg5[%c0_29, %c0_30, %c0_31, %c0_32] : memref<3x4x1x32xf32, #tpu.memory_space<vmem>>, vector<1x1x1x32xf32>
    %42 = vector.shape_cast %41 : vector<1x1x1x32xf32> to vector<1x32xf32>
    %c0_33 = arith.constant 0 : index
    %c0_34 = arith.constant 0 : index
    %c0_35 = arith.constant 0 : index
    %c0_36 = arith.constant 0 : index
    %43 = vector.load %arg6[%c0_33, %c0_34, %c0_35, %c0_36] : memref<3x4x1x32xf32, #tpu.memory_space<vmem>>, vector<1x1x1x32xf32>
    %44 = vector.shape_cast %43 : vector<1x1x1x32xf32> to vector<1x32xf32>
    %cst_37 = arith.constant dense<0.000000e+00> : vector<16x1xf32>
    %45 = tpu.matmul %40, %42, %cst_37 {dimension_numbers = #tpu.dot_dimension_numbers<[1], [1], [0], [0], [0, 0, 1, 0], [], []>} : vector<16x32xf32>, vector<1x32xf32>, vector<16x1xf32> -> vector<16x1xf32>
    %cst_38 = arith.constant dense<0.000000e+00> : vector<1x16xf32>
    %46 = tpu.matmul %44, %40, %cst_38 {dimension_numbers = #tpu.dot_dimension_numbers<[1], [1], [0], [0], [0, 0, 1, 0], [], []>} : vector<1x32xf32>, vector<16x32xf32>, vector<1x16xf32> -> vector<1x16xf32>
    %47 = vector.broadcast %45 : vector<16x1xf32> to vector<16x16xf32>
    %48 = vector.broadcast %46 : vector<1x16xf32> to vector<16x16xf32>
    %49 = arith.addf %47, %48 : vector<16x16xf32>
    %cst_39 = arith.constant 0.000000e+00 : f32
    %50 = vector.broadcast %cst_39 : f32 to vector<16x16xf32>
    %51 = arith.cmpf ogt, %49, %50 : vector<16x16xf32>
    %cst_40 = arith.constant 2.000000e-01 : f32
    %52 = vector.broadcast %cst_40 : f32 to vector<16x16xf32>
    %53 = arith.mulf %52, %49 : vector<16x16xf32>
    %54 = arith.select %51, %49, %53 : vector<16x16xi1>, vector<16x16xf32>
    %cst_41 = arith.constant -1.000000e+09 : f32
    %55 = vector.broadcast %cst_41 : f32 to vector<16x16xf32>
    %56 = arith.select %10, %54, %55 : vector<16x16xi1>, vector<16x16xf32>
    %cst_42 = arith.constant dense<0xFF800000> : vector<16xf32>
    %57 = vector.multi_reduction <maximumf>, %56, %cst_42 [0] : vector<16x16xf32> to vector<16xf32>
    %58 = vector.shape_cast %57 : vector<16xf32> to vector<1x16xf32>
    %59 = vector.broadcast %58 : vector<1x16xf32> to vector<16x16xf32>
    %60 = arith.subf %56, %59 : vector<16x16xf32>
    %61 = math.exp %60 : vector<16x16xf32>
    %62 = arith.mulf %61, %12 : vector<16x16xf32>
    %cst_43 = arith.constant dense<0.000000e+00> : vector<16xf32>
    %63 = vector.multi_reduction <add>, %62, %cst_43 [0] : vector<16x16xf32> to vector<16xf32>
    %64 = vector.shape_cast %63 : vector<16xf32> to vector<1x16xf32>
    %cst_44 = arith.constant 1.000000e-30 : f32
    %65 = vector.broadcast %cst_44 : f32 to vector<1x16xf32>
    %66 = arith.maximumf %64, %65 : vector<1x16xf32>
    %67 = tpu.reciprocal %66 {approx = true} : vector<1x16xf32> -> vector<1x16xf32>
    %68 = vector.broadcast %67 : vector<1x16xf32> to vector<16x16xf32>
    %69 = arith.mulf %62, %68 : vector<16x16xf32>
    %cst_45 = arith.constant dense<0.000000e+00> : vector<16x32xf32>
    %70 = tpu.matmul %69, %40, %cst_45 {dimension_numbers = #tpu.dot_dimension_numbers<[0], [0], [1], [1], [0, 1, 1, 1], [], []>} : vector<16x16xf32>, vector<16x32xf32>, vector<16x32xf32> -> vector<16x32xf32>
    %c0_46 = arith.constant 0 : index
    %c0_47 = arith.constant 0 : index
    %c0_48 = arith.constant 0 : index
    %c0_49 = arith.constant 0 : index
    %71 = vector.load %arg7[%c0_46, %c0_47, %c0_48, %c0_49] : memref<3x4x1x32xf32, #tpu.memory_space<vmem>>, vector<1x1x1x32xf32>
    %72 = vector.shape_cast %71 : vector<1x1x1x32xf32> to vector<1x32xf32>
    %73 = vector.broadcast %72 : vector<1x32xf32> to vector<16x32xf32>
    %74 = arith.addf %70, %73 : vector<16x32xf32>
    %cst_50 = arith.constant 0.000000e+00 : f32
    %75 = vector.broadcast %cst_50 : f32 to vector<16x32xf32>
    %76 = arith.maximumf %74, %75 : vector<16x32xf32>
    %77 = arith.addf %37, %76 : vector<16x32xf32>
    %c0_51 = arith.constant 0 : index
    %c1 = arith.constant 1 : index
    %c0_52 = arith.constant 0 : index
    %c0_53 = arith.constant 0 : index
    %78 = vector.load %arg4[%c0_51, %c1, %c0_52, %c0_53] : memref<3x4x32x32xf32, #tpu.memory_space<vmem>>, vector<1x1x32x32xf32>
    %79 = vector.shape_cast %78 : vector<1x1x32x32xf32> to vector<32x32xf32>
    %cst_54 = arith.constant dense<0.000000e+00> : vector<16x32xf32>
    %80 = tpu.matmul %6, %79, %cst_54 {dimension_numbers = #tpu.dot_dimension_numbers<[1], [0], [0], [1], [0, 0, 1, 1], [], []>} : vector<16x32xf32>, vector<32x32xf32>, vector<16x32xf32> -> vector<16x32xf32>
    %c0_55 = arith.constant 0 : index
    %c1_56 = arith.constant 1 : index
    %c0_57 = arith.constant 0 : index
    %c0_58 = arith.constant 0 : index
    %81 = vector.load %arg5[%c0_55, %c1_56, %c0_57, %c0_58] : memref<3x4x1x32xf32, #tpu.memory_space<vmem>>, vector<1x1x1x32xf32>
    %82 = vector.shape_cast %81 : vector<1x1x1x32xf32> to vector<1x32xf32>
    %c0_59 = arith.constant 0 : index
    %c1_60 = arith.constant 1 : index
    %c0_61 = arith.constant 0 : index
    %c0_62 = arith.constant 0 : index
    %83 = vector.load %arg6[%c0_59, %c1_60, %c0_61, %c0_62] : memref<3x4x1x32xf32, #tpu.memory_space<vmem>>, vector<1x1x1x32xf32>
    %84 = vector.shape_cast %83 : vector<1x1x1x32xf32> to vector<1x32xf32>
    %cst_63 = arith.constant dense<0.000000e+00> : vector<16x1xf32>
    %85 = tpu.matmul %80, %82, %cst_63 {dimension_numbers = #tpu.dot_dimension_numbers<[1], [1], [0], [0], [0, 0, 1, 0], [], []>} : vector<16x32xf32>, vector<1x32xf32>, vector<16x1xf32> -> vector<16x1xf32>
    %cst_64 = arith.constant dense<0.000000e+00> : vector<1x16xf32>
    %86 = tpu.matmul %84, %80, %cst_64 {dimension_numbers = #tpu.dot_dimension_numbers<[1], [1], [0], [0], [0, 0, 1, 0], [], []>} : vector<1x32xf32>, vector<16x32xf32>, vector<1x16xf32> -> vector<1x16xf32>
    %87 = vector.broadcast %85 : vector<16x1xf32> to vector<16x16xf32>
    %88 = vector.broadcast %86 : vector<1x16xf32> to vector<16x16xf32>
    %89 = arith.addf %87, %88 : vector<16x16xf32>
    %cst_65 = arith.constant 0.000000e+00 : f32
    %90 = vector.broadcast %cst_65 : f32 to vector<16x16xf32>
    %91 = arith.cmpf ogt, %89, %90 : vector<16x16xf32>
    %cst_66 = arith.constant 2.000000e-01 : f32
    %92 = vector.broadcast %cst_66 : f32 to vector<16x16xf32>
    %93 = arith.mulf %92, %89 : vector<16x16xf32>
    %94 = arith.select %91, %89, %93 : vector<16x16xi1>, vector<16x16xf32>
    %cst_67 = arith.constant -1.000000e+09 : f32
    %95 = vector.broadcast %cst_67 : f32 to vector<16x16xf32>
    %96 = arith.select %10, %94, %95 : vector<16x16xi1>, vector<16x16xf32>
    %cst_68 = arith.constant dense<0xFF800000> : vector<16xf32>
    %97 = vector.multi_reduction <maximumf>, %96, %cst_68 [0] : vector<16x16xf32> to vector<16xf32>
    %98 = vector.shape_cast %97 : vector<16xf32> to vector<1x16xf32>
    %99 = vector.broadcast %98 : vector<1x16xf32> to vector<16x16xf32>
    %100 = arith.subf %96, %99 : vector<16x16xf32>
    %101 = math.exp %100 : vector<16x16xf32>
    %102 = arith.mulf %101, %12 : vector<16x16xf32>
    %cst_69 = arith.constant dense<0.000000e+00> : vector<16xf32>
    %103 = vector.multi_reduction <add>, %102, %cst_69 [0] : vector<16x16xf32> to vector<16xf32>
    %104 = vector.shape_cast %103 : vector<16xf32> to vector<1x16xf32>
    %cst_70 = arith.constant 1.000000e-30 : f32
    %105 = vector.broadcast %cst_70 : f32 to vector<1x16xf32>
    %106 = arith.maximumf %104, %105 : vector<1x16xf32>
    %107 = tpu.reciprocal %106 {approx = true} : vector<1x16xf32> -> vector<1x16xf32>
    %108 = vector.broadcast %107 : vector<1x16xf32> to vector<16x16xf32>
    %109 = arith.mulf %102, %108 : vector<16x16xf32>
    %cst_71 = arith.constant dense<0.000000e+00> : vector<16x32xf32>
    %110 = tpu.matmul %109, %80, %cst_71 {dimension_numbers = #tpu.dot_dimension_numbers<[0], [0], [1], [1], [0, 1, 1, 1], [], []>} : vector<16x16xf32>, vector<16x32xf32>, vector<16x32xf32> -> vector<16x32xf32>
    %c0_72 = arith.constant 0 : index
    %c1_73 = arith.constant 1 : index
    %c0_74 = arith.constant 0 : index
    %c0_75 = arith.constant 0 : index
    %111 = vector.load %arg7[%c0_72, %c1_73, %c0_74, %c0_75] : memref<3x4x1x32xf32, #tpu.memory_space<vmem>>, vector<1x1x1x32xf32>
    %112 = vector.shape_cast %111 : vector<1x1x1x32xf32> to vector<1x32xf32>
    %113 = vector.broadcast %112 : vector<1x32xf32> to vector<16x32xf32>
    %114 = arith.addf %110, %113 : vector<16x32xf32>
    %cst_76 = arith.constant 0.000000e+00 : f32
    %115 = vector.broadcast %cst_76 : f32 to vector<16x32xf32>
    %116 = arith.maximumf %114, %115 : vector<16x32xf32>
    %117 = arith.addf %77, %116 : vector<16x32xf32>
    %c0_77 = arith.constant 0 : index
    %c2 = arith.constant 2 : index
    %c0_78 = arith.constant 0 : index
    %c0_79 = arith.constant 0 : index
    %118 = vector.load %arg4[%c0_77, %c2, %c0_78, %c0_79] : memref<3x4x32x32xf32, #tpu.memory_space<vmem>>, vector<1x1x32x32xf32>
    %119 = vector.shape_cast %118 : vector<1x1x32x32xf32> to vector<32x32xf32>
    %cst_80 = arith.constant dense<0.000000e+00> : vector<16x32xf32>
    %120 = tpu.matmul %6, %119, %cst_80 {dimension_numbers = #tpu.dot_dimension_numbers<[1], [0], [0], [1], [0, 0, 1, 1], [], []>} : vector<16x32xf32>, vector<32x32xf32>, vector<16x32xf32> -> vector<16x32xf32>
    %c0_81 = arith.constant 0 : index
    %c2_82 = arith.constant 2 : index
    %c0_83 = arith.constant 0 : index
    %c0_84 = arith.constant 0 : index
    %121 = vector.load %arg5[%c0_81, %c2_82, %c0_83, %c0_84] : memref<3x4x1x32xf32, #tpu.memory_space<vmem>>, vector<1x1x1x32xf32>
    %122 = vector.shape_cast %121 : vector<1x1x1x32xf32> to vector<1x32xf32>
    %c0_85 = arith.constant 0 : index
    %c2_86 = arith.constant 2 : index
    %c0_87 = arith.constant 0 : index
    %c0_88 = arith.constant 0 : index
    %123 = vector.load %arg6[%c0_85, %c2_86, %c0_87, %c0_88] : memref<3x4x1x32xf32, #tpu.memory_space<vmem>>, vector<1x1x1x32xf32>
    %124 = vector.shape_cast %123 : vector<1x1x1x32xf32> to vector<1x32xf32>
    %cst_89 = arith.constant dense<0.000000e+00> : vector<16x1xf32>
    %125 = tpu.matmul %120, %122, %cst_89 {dimension_numbers = #tpu.dot_dimension_numbers<[1], [1], [0], [0], [0, 0, 1, 0], [], []>} : vector<16x32xf32>, vector<1x32xf32>, vector<16x1xf32> -> vector<16x1xf32>
    %cst_90 = arith.constant dense<0.000000e+00> : vector<1x16xf32>
    %126 = tpu.matmul %124, %120, %cst_90 {dimension_numbers = #tpu.dot_dimension_numbers<[1], [1], [0], [0], [0, 0, 1, 0], [], []>} : vector<1x32xf32>, vector<16x32xf32>, vector<1x16xf32> -> vector<1x16xf32>
    %127 = vector.broadcast %125 : vector<16x1xf32> to vector<16x16xf32>
    %128 = vector.broadcast %126 : vector<1x16xf32> to vector<16x16xf32>
    %129 = arith.addf %127, %128 : vector<16x16xf32>
    %cst_91 = arith.constant 0.000000e+00 : f32
    %130 = vector.broadcast %cst_91 : f32 to vector<16x16xf32>
    %131 = arith.cmpf ogt, %129, %130 : vector<16x16xf32>
    %cst_92 = arith.constant 2.000000e-01 : f32
    %132 = vector.broadcast %cst_92 : f32 to vector<16x16xf32>
    %133 = arith.mulf %132, %129 : vector<16x16xf32>
    %134 = arith.select %131, %129, %133 : vector<16x16xi1>, vector<16x16xf32>
    %cst_93 = arith.constant -1.000000e+09 : f32
    %135 = vector.broadcast %cst_93 : f32 to vector<16x16xf32>
    %136 = arith.select %10, %134, %135 : vector<16x16xi1>, vector<16x16xf32>
    %cst_94 = arith.constant dense<0xFF800000> : vector<16xf32>
    %137 = vector.multi_reduction <maximumf>, %136, %cst_94 [0] : vector<16x16xf32> to vector<16xf32>
    %138 = vector.shape_cast %137 : vector<16xf32> to vector<1x16xf32>
    %139 = vector.broadcast %138 : vector<1x16xf32> to vector<16x16xf32>
    %140 = arith.subf %136, %139 : vector<16x16xf32>
    %141 = math.exp %140 : vector<16x16xf32>
    %142 = arith.mulf %141, %12 : vector<16x16xf32>
    %cst_95 = arith.constant dense<0.000000e+00> : vector<16xf32>
    %143 = vector.multi_reduction <add>, %142, %cst_95 [0] : vector<16x16xf32> to vector<16xf32>
    %144 = vector.shape_cast %143 : vector<16xf32> to vector<1x16xf32>
    %cst_96 = arith.constant 1.000000e-30 : f32
    %145 = vector.broadcast %cst_96 : f32 to vector<1x16xf32>
    %146 = arith.maximumf %144, %145 : vector<1x16xf32>
    %147 = tpu.reciprocal %146 {approx = true} : vector<1x16xf32> -> vector<1x16xf32>
    %148 = vector.broadcast %147 : vector<1x16xf32> to vector<16x16xf32>
    %149 = arith.mulf %142, %148 : vector<16x16xf32>
    %cst_97 = arith.constant dense<0.000000e+00> : vector<16x32xf32>
    %150 = tpu.matmul %149, %120, %cst_97 {dimension_numbers = #tpu.dot_dimension_numbers<[0], [0], [1], [1], [0, 1, 1, 1], [], []>} : vector<16x16xf32>, vector<16x32xf32>, vector<16x32xf32> -> vector<16x32xf32>
    %c0_98 = arith.constant 0 : index
    %c2_99 = arith.constant 2 : index
    %c0_100 = arith.constant 0 : index
    %c0_101 = arith.constant 0 : index
    %151 = vector.load %arg7[%c0_98, %c2_99, %c0_100, %c0_101] : memref<3x4x1x32xf32, #tpu.memory_space<vmem>>, vector<1x1x1x32xf32>
    %152 = vector.shape_cast %151 : vector<1x1x1x32xf32> to vector<1x32xf32>
    %153 = vector.broadcast %152 : vector<1x32xf32> to vector<16x32xf32>
    %154 = arith.addf %150, %153 : vector<16x32xf32>
    %cst_102 = arith.constant 0.000000e+00 : f32
    %155 = vector.broadcast %cst_102 : f32 to vector<16x32xf32>
    %156 = arith.maximumf %154, %155 : vector<16x32xf32>
    %157 = arith.addf %117, %156 : vector<16x32xf32>
    %c0_103 = arith.constant 0 : index
    %c3 = arith.constant 3 : index
    %c0_104 = arith.constant 0 : index
    %c0_105 = arith.constant 0 : index
    %158 = vector.load %arg4[%c0_103, %c3, %c0_104, %c0_105] : memref<3x4x32x32xf32, #tpu.memory_space<vmem>>, vector<1x1x32x32xf32>
    %159 = vector.shape_cast %158 : vector<1x1x32x32xf32> to vector<32x32xf32>
    %cst_106 = arith.constant dense<0.000000e+00> : vector<16x32xf32>
    %160 = tpu.matmul %6, %159, %cst_106 {dimension_numbers = #tpu.dot_dimension_numbers<[1], [0], [0], [1], [0, 0, 1, 1], [], []>} : vector<16x32xf32>, vector<32x32xf32>, vector<16x32xf32> -> vector<16x32xf32>
    %c0_107 = arith.constant 0 : index
    %c3_108 = arith.constant 3 : index
    %c0_109 = arith.constant 0 : index
    %c0_110 = arith.constant 0 : index
    %161 = vector.load %arg5[%c0_107, %c3_108, %c0_109, %c0_110] : memref<3x4x1x32xf32, #tpu.memory_space<vmem>>, vector<1x1x1x32xf32>
    %162 = vector.shape_cast %161 : vector<1x1x1x32xf32> to vector<1x32xf32>
    %c0_111 = arith.constant 0 : index
    %c3_112 = arith.constant 3 : index
    %c0_113 = arith.constant 0 : index
    %c0_114 = arith.constant 0 : index
    %163 = vector.load %arg6[%c0_111, %c3_112, %c0_113, %c0_114] : memref<3x4x1x32xf32, #tpu.memory_space<vmem>>, vector<1x1x1x32xf32>
    %164 = vector.shape_cast %163 : vector<1x1x1x32xf32> to vector<1x32xf32>
    %cst_115 = arith.constant dense<0.000000e+00> : vector<16x1xf32>
    %165 = tpu.matmul %160, %162, %cst_115 {dimension_numbers = #tpu.dot_dimension_numbers<[1], [1], [0], [0], [0, 0, 1, 0], [], []>} : vector<16x32xf32>, vector<1x32xf32>, vector<16x1xf32> -> vector<16x1xf32>
    %cst_116 = arith.constant dense<0.000000e+00> : vector<1x16xf32>
    %166 = tpu.matmul %164, %160, %cst_116 {dimension_numbers = #tpu.dot_dimension_numbers<[1], [1], [0], [0], [0, 0, 1, 0], [], []>} : vector<1x32xf32>, vector<16x32xf32>, vector<1x16xf32> -> vector<1x16xf32>
    %167 = vector.broadcast %165 : vector<16x1xf32> to vector<16x16xf32>
    %168 = vector.broadcast %166 : vector<1x16xf32> to vector<16x16xf32>
    %169 = arith.addf %167, %168 : vector<16x16xf32>
    %cst_117 = arith.constant 0.000000e+00 : f32
    %170 = vector.broadcast %cst_117 : f32 to vector<16x16xf32>
    %171 = arith.cmpf ogt, %169, %170 : vector<16x16xf32>
    %cst_118 = arith.constant 2.000000e-01 : f32
    %172 = vector.broadcast %cst_118 : f32 to vector<16x16xf32>
    %173 = arith.mulf %172, %169 : vector<16x16xf32>
    %174 = arith.select %171, %169, %173 : vector<16x16xi1>, vector<16x16xf32>
    %cst_119 = arith.constant -1.000000e+09 : f32
    %175 = vector.broadcast %cst_119 : f32 to vector<16x16xf32>
    %176 = arith.select %10, %174, %175 : vector<16x16xi1>, vector<16x16xf32>
    %cst_120 = arith.constant dense<0xFF800000> : vector<16xf32>
    %177 = vector.multi_reduction <maximumf>, %176, %cst_120 [0] : vector<16x16xf32> to vector<16xf32>
    %178 = vector.shape_cast %177 : vector<16xf32> to vector<1x16xf32>
    %179 = vector.broadcast %178 : vector<1x16xf32> to vector<16x16xf32>
    %180 = arith.subf %176, %179 : vector<16x16xf32>
    %181 = math.exp %180 : vector<16x16xf32>
    %182 = arith.mulf %181, %12 : vector<16x16xf32>
    %cst_121 = arith.constant dense<0.000000e+00> : vector<16xf32>
    %183 = vector.multi_reduction <add>, %182, %cst_121 [0] : vector<16x16xf32> to vector<16xf32>
    %184 = vector.shape_cast %183 : vector<16xf32> to vector<1x16xf32>
    %cst_122 = arith.constant 1.000000e-30 : f32
    %185 = vector.broadcast %cst_122 : f32 to vector<1x16xf32>
    %186 = arith.maximumf %184, %185 : vector<1x16xf32>
    %187 = tpu.reciprocal %186 {approx = true} : vector<1x16xf32> -> vector<1x16xf32>
    %188 = vector.broadcast %187 : vector<1x16xf32> to vector<16x16xf32>
    %189 = arith.mulf %182, %188 : vector<16x16xf32>
    %cst_123 = arith.constant dense<0.000000e+00> : vector<16x32xf32>
    %190 = tpu.matmul %189, %160, %cst_123 {dimension_numbers = #tpu.dot_dimension_numbers<[0], [0], [1], [1], [0, 1, 1, 1], [], []>} : vector<16x16xf32>, vector<16x32xf32>, vector<16x32xf32> -> vector<16x32xf32>
    %c0_124 = arith.constant 0 : index
    %c3_125 = arith.constant 3 : index
    %c0_126 = arith.constant 0 : index
    %c0_127 = arith.constant 0 : index
    %191 = vector.load %arg7[%c0_124, %c3_125, %c0_126, %c0_127] : memref<3x4x1x32xf32, #tpu.memory_space<vmem>>, vector<1x1x1x32xf32>
    %192 = vector.shape_cast %191 : vector<1x1x1x32xf32> to vector<1x32xf32>
    %193 = vector.broadcast %192 : vector<1x32xf32> to vector<16x32xf32>
    %194 = arith.addf %190, %193 : vector<16x32xf32>
    %cst_128 = arith.constant 0.000000e+00 : f32
    %195 = vector.broadcast %cst_128 : f32 to vector<16x32xf32>
    %196 = arith.maximumf %194, %195 : vector<16x32xf32>
    %197 = arith.addf %157, %196 : vector<16x32xf32>
    %cst_129 = arith.constant 2.500000e-01 : f32
    %198 = vector.broadcast %cst_129 : f32 to vector<16x32xf32>
    %199 = arith.mulf %197, %198 : vector<16x32xf32>
    %c1_130 = arith.constant 1 : index
    %c0_131 = arith.constant 0 : index
    %c0_132 = arith.constant 0 : index
    %200 = vector.load %arg8[%c1_130, %c0_131, %c0_132] : memref<4x1x32xf32, #tpu.memory_space<vmem>>, vector<1x1x32xf32>
    %201 = vector.shape_cast %200 : vector<1x1x32xf32> to vector<1x32xf32>
    %c1_133 = arith.constant 1 : index
    %c0_134 = arith.constant 0 : index
    %c0_135 = arith.constant 0 : index
    %202 = vector.load %arg9[%c1_133, %c0_134, %c0_135] : memref<4x1x1xf32, #tpu.memory_space<vmem>>, vector<1x1x1xf32>
    %203 = vector.shape_cast %202 : vector<1x1x1xf32> to vector<1x1xf32>
    %204 = vector.broadcast %201 : vector<1x32xf32> to vector<16x32xf32>
    %205 = arith.mulf %199, %204 : vector<16x32xf32>
    %cst_136 = arith.constant dense<0.000000e+00> : vector<16xf32>
    %206 = vector.multi_reduction <add>, %205, %cst_136 [1] : vector<16x32xf32> to vector<16xf32>
    %207 = vector.shape_cast %206 : vector<16xf32> to vector<16x1xf32>
    %208 = vector.broadcast %203 : vector<1x1xf32> to vector<16x1xf32>
    %209 = arith.addf %207, %208 : vector<16x1xf32>
    %cst_137 = arith.constant dense<0xFF800000> : vector<1xf32>
    %210 = vector.multi_reduction <maximumf>, %209, %cst_137 [0] : vector<16x1xf32> to vector<1xf32>
    %211 = vector.shape_cast %210 : vector<1xf32> to vector<1x1xf32>
    %212 = vector.broadcast %211 : vector<1x1xf32> to vector<16x1xf32>
    %213 = arith.subf %209, %212 : vector<16x1xf32>
    %214 = math.exp %213 : vector<16x1xf32>
    %cst_138 = arith.constant dense<0.000000e+00> : vector<1xf32>
    %215 = vector.multi_reduction <add>, %214, %cst_138 [0] : vector<16x1xf32> to vector<1xf32>
    %216 = vector.shape_cast %215 : vector<1xf32> to vector<1x1xf32>
    %217 = tpu.reciprocal %216 {approx = true} : vector<1x1xf32> -> vector<1x1xf32>
    %218 = vector.broadcast %217 : vector<1x1xf32> to vector<16x1xf32>
    %219 = arith.mulf %214, %218 : vector<16x1xf32>
    %220 = vector.broadcast %219 : vector<16x1xf32> to vector<16x32xf32>
    %221 = arith.mulf %220, %199 : vector<16x32xf32>
    %cst_139 = arith.constant dense<0.000000e+00> : vector<32xf32>
    %222 = vector.multi_reduction <add>, %221, %cst_139 [0] : vector<16x32xf32> to vector<32xf32>
    %223 = vector.shape_cast %222 : vector<32xf32> to vector<1x32xf32>
    %cst_140 = arith.constant 0.000000e+00 : f32
    %224 = vector.broadcast %cst_140 : f32 to vector<16x32xf32>
    %c1_141 = arith.constant 1 : index
    %c0_142 = arith.constant 0 : index
    %c0_143 = arith.constant 0 : index
    %c0_144 = arith.constant 0 : index
    %225 = vector.load %arg4[%c1_141, %c0_142, %c0_143, %c0_144] : memref<3x4x32x32xf32, #tpu.memory_space<vmem>>, vector<1x1x32x32xf32>
    %226 = vector.shape_cast %225 : vector<1x1x32x32xf32> to vector<32x32xf32>
    %cst_145 = arith.constant dense<0.000000e+00> : vector<16x32xf32>
    %227 = tpu.matmul %199, %226, %cst_145 {dimension_numbers = #tpu.dot_dimension_numbers<[1], [0], [0], [1], [0, 0, 1, 1], [], []>} : vector<16x32xf32>, vector<32x32xf32>, vector<16x32xf32> -> vector<16x32xf32>
    %c1_146 = arith.constant 1 : index
    %c0_147 = arith.constant 0 : index
    %c0_148 = arith.constant 0 : index
    %c0_149 = arith.constant 0 : index
    %228 = vector.load %arg5[%c1_146, %c0_147, %c0_148, %c0_149] : memref<3x4x1x32xf32, #tpu.memory_space<vmem>>, vector<1x1x1x32xf32>
    %229 = vector.shape_cast %228 : vector<1x1x1x32xf32> to vector<1x32xf32>
    %c1_150 = arith.constant 1 : index
    %c0_151 = arith.constant 0 : index
    %c0_152 = arith.constant 0 : index
    %c0_153 = arith.constant 0 : index
    %230 = vector.load %arg6[%c1_150, %c0_151, %c0_152, %c0_153] : memref<3x4x1x32xf32, #tpu.memory_space<vmem>>, vector<1x1x1x32xf32>
    %231 = vector.shape_cast %230 : vector<1x1x1x32xf32> to vector<1x32xf32>
    %cst_154 = arith.constant dense<0.000000e+00> : vector<16x1xf32>
    %232 = tpu.matmul %227, %229, %cst_154 {dimension_numbers = #tpu.dot_dimension_numbers<[1], [1], [0], [0], [0, 0, 1, 0], [], []>} : vector<16x32xf32>, vector<1x32xf32>, vector<16x1xf32> -> vector<16x1xf32>
    %cst_155 = arith.constant dense<0.000000e+00> : vector<1x16xf32>
    %233 = tpu.matmul %231, %227, %cst_155 {dimension_numbers = #tpu.dot_dimension_numbers<[1], [1], [0], [0], [0, 0, 1, 0], [], []>} : vector<1x32xf32>, vector<16x32xf32>, vector<1x16xf32> -> vector<1x16xf32>
    %234 = vector.broadcast %232 : vector<16x1xf32> to vector<16x16xf32>
    %235 = vector.broadcast %233 : vector<1x16xf32> to vector<16x16xf32>
    %236 = arith.addf %234, %235 : vector<16x16xf32>
    %cst_156 = arith.constant 0.000000e+00 : f32
    %237 = vector.broadcast %cst_156 : f32 to vector<16x16xf32>
    %238 = arith.cmpf ogt, %236, %237 : vector<16x16xf32>
    %cst_157 = arith.constant 2.000000e-01 : f32
    %239 = vector.broadcast %cst_157 : f32 to vector<16x16xf32>
    %240 = arith.mulf %239, %236 : vector<16x16xf32>
    %241 = arith.select %238, %236, %240 : vector<16x16xi1>, vector<16x16xf32>
    %cst_158 = arith.constant -1.000000e+09 : f32
    %242 = vector.broadcast %cst_158 : f32 to vector<16x16xf32>
    %243 = arith.select %10, %241, %242 : vector<16x16xi1>, vector<16x16xf32>
    %cst_159 = arith.constant dense<0xFF800000> : vector<16xf32>
    %244 = vector.multi_reduction <maximumf>, %243, %cst_159 [0] : vector<16x16xf32> to vector<16xf32>
    %245 = vector.shape_cast %244 : vector<16xf32> to vector<1x16xf32>
    %246 = vector.broadcast %245 : vector<1x16xf32> to vector<16x16xf32>
    %247 = arith.subf %243, %246 : vector<16x16xf32>
    %248 = math.exp %247 : vector<16x16xf32>
    %249 = arith.mulf %248, %12 : vector<16x16xf32>
    %cst_160 = arith.constant dense<0.000000e+00> : vector<16xf32>
    %250 = vector.multi_reduction <add>, %249, %cst_160 [0] : vector<16x16xf32> to vector<16xf32>
    %251 = vector.shape_cast %250 : vector<16xf32> to vector<1x16xf32>
    %cst_161 = arith.constant 1.000000e-30 : f32
    %252 = vector.broadcast %cst_161 : f32 to vector<1x16xf32>
    %253 = arith.maximumf %251, %252 : vector<1x16xf32>
    %254 = tpu.reciprocal %253 {approx = true} : vector<1x16xf32> -> vector<1x16xf32>
    %255 = vector.broadcast %254 : vector<1x16xf32> to vector<16x16xf32>
    %256 = arith.mulf %249, %255 : vector<16x16xf32>
    %cst_162 = arith.constant dense<0.000000e+00> : vector<16x32xf32>
    %257 = tpu.matmul %256, %227, %cst_162 {dimension_numbers = #tpu.dot_dimension_numbers<[0], [0], [1], [1], [0, 1, 1, 1], [], []>} : vector<16x16xf32>, vector<16x32xf32>, vector<16x32xf32> -> vector<16x32xf32>
    %c1_163 = arith.constant 1 : index
    %c0_164 = arith.constant 0 : index
    %c0_165 = arith.constant 0 : index
    %c0_166 = arith.constant 0 : index
    %258 = vector.load %arg7[%c1_163, %c0_164, %c0_165, %c0_166] : memref<3x4x1x32xf32, #tpu.memory_space<vmem>>, vector<1x1x1x32xf32>
    %259 = vector.shape_cast %258 : vector<1x1x1x32xf32> to vector<1x32xf32>
    %260 = vector.broadcast %259 : vector<1x32xf32> to vector<16x32xf32>
    %261 = arith.addf %257, %260 : vector<16x32xf32>
    %cst_167 = arith.constant 0.000000e+00 : f32
    %262 = vector.broadcast %cst_167 : f32 to vector<16x32xf32>
    %263 = arith.maximumf %261, %262 : vector<16x32xf32>
    %264 = arith.addf %224, %263 : vector<16x32xf32>
    %c1_168 = arith.constant 1 : index
    %c1_169 = arith.constant 1 : index
    %c0_170 = arith.constant 0 : index
    %c0_171 = arith.constant 0 : index
    %265 = vector.load %arg4[%c1_168, %c1_169, %c0_170, %c0_171] : memref<3x4x32x32xf32, #tpu.memory_space<vmem>>, vector<1x1x32x32xf32>
    %266 = vector.shape_cast %265 : vector<1x1x32x32xf32> to vector<32x32xf32>
    %cst_172 = arith.constant dense<0.000000e+00> : vector<16x32xf32>
    %267 = tpu.matmul %199, %266, %cst_172 {dimension_numbers = #tpu.dot_dimension_numbers<[1], [0], [0], [1], [0, 0, 1, 1], [], []>} : vector<16x32xf32>, vector<32x32xf32>, vector<16x32xf32> -> vector<16x32xf32>
    %c1_173 = arith.constant 1 : index
    %c1_174 = arith.constant 1 : index
    %c0_175 = arith.constant 0 : index
    %c0_176 = arith.constant 0 : index
    %268 = vector.load %arg5[%c1_173, %c1_174, %c0_175, %c0_176] : memref<3x4x1x32xf32, #tpu.memory_space<vmem>>, vector<1x1x1x32xf32>
    %269 = vector.shape_cast %268 : vector<1x1x1x32xf32> to vector<1x32xf32>
    %c1_177 = arith.constant 1 : index
    %c1_178 = arith.constant 1 : index
    %c0_179 = arith.constant 0 : index
    %c0_180 = arith.constant 0 : index
    %270 = vector.load %arg6[%c1_177, %c1_178, %c0_179, %c0_180] : memref<3x4x1x32xf32, #tpu.memory_space<vmem>>, vector<1x1x1x32xf32>
    %271 = vector.shape_cast %270 : vector<1x1x1x32xf32> to vector<1x32xf32>
    %cst_181 = arith.constant dense<0.000000e+00> : vector<16x1xf32>
    %272 = tpu.matmul %267, %269, %cst_181 {dimension_numbers = #tpu.dot_dimension_numbers<[1], [1], [0], [0], [0, 0, 1, 0], [], []>} : vector<16x32xf32>, vector<1x32xf32>, vector<16x1xf32> -> vector<16x1xf32>
    %cst_182 = arith.constant dense<0.000000e+00> : vector<1x16xf32>
    %273 = tpu.matmul %271, %267, %cst_182 {dimension_numbers = #tpu.dot_dimension_numbers<[1], [1], [0], [0], [0, 0, 1, 0], [], []>} : vector<1x32xf32>, vector<16x32xf32>, vector<1x16xf32> -> vector<1x16xf32>
    %274 = vector.broadcast %272 : vector<16x1xf32> to vector<16x16xf32>
    %275 = vector.broadcast %273 : vector<1x16xf32> to vector<16x16xf32>
    %276 = arith.addf %274, %275 : vector<16x16xf32>
    %cst_183 = arith.constant 0.000000e+00 : f32
    %277 = vector.broadcast %cst_183 : f32 to vector<16x16xf32>
    %278 = arith.cmpf ogt, %276, %277 : vector<16x16xf32>
    %cst_184 = arith.constant 2.000000e-01 : f32
    %279 = vector.broadcast %cst_184 : f32 to vector<16x16xf32>
    %280 = arith.mulf %279, %276 : vector<16x16xf32>
    %281 = arith.select %278, %276, %280 : vector<16x16xi1>, vector<16x16xf32>
    %cst_185 = arith.constant -1.000000e+09 : f32
    %282 = vector.broadcast %cst_185 : f32 to vector<16x16xf32>
    %283 = arith.select %10, %281, %282 : vector<16x16xi1>, vector<16x16xf32>
    %cst_186 = arith.constant dense<0xFF800000> : vector<16xf32>
    %284 = vector.multi_reduction <maximumf>, %283, %cst_186 [0] : vector<16x16xf32> to vector<16xf32>
    %285 = vector.shape_cast %284 : vector<16xf32> to vector<1x16xf32>
    %286 = vector.broadcast %285 : vector<1x16xf32> to vector<16x16xf32>
    %287 = arith.subf %283, %286 : vector<16x16xf32>
    %288 = math.exp %287 : vector<16x16xf32>
    %289 = arith.mulf %288, %12 : vector<16x16xf32>
    %cst_187 = arith.constant dense<0.000000e+00> : vector<16xf32>
    %290 = vector.multi_reduction <add>, %289, %cst_187 [0] : vector<16x16xf32> to vector<16xf32>
    %291 = vector.shape_cast %290 : vector<16xf32> to vector<1x16xf32>
    %cst_188 = arith.constant 1.000000e-30 : f32
    %292 = vector.broadcast %cst_188 : f32 to vector<1x16xf32>
    %293 = arith.maximumf %291, %292 : vector<1x16xf32>
    %294 = tpu.reciprocal %293 {approx = true} : vector<1x16xf32> -> vector<1x16xf32>
    %295 = vector.broadcast %294 : vector<1x16xf32> to vector<16x16xf32>
    %296 = arith.mulf %289, %295 : vector<16x16xf32>
    %cst_189 = arith.constant dense<0.000000e+00> : vector<16x32xf32>
    %297 = tpu.matmul %296, %267, %cst_189 {dimension_numbers = #tpu.dot_dimension_numbers<[0], [0], [1], [1], [0, 1, 1, 1], [], []>} : vector<16x16xf32>, vector<16x32xf32>, vector<16x32xf32> -> vector<16x32xf32>
    %c1_190 = arith.constant 1 : index
    %c1_191 = arith.constant 1 : index
    %c0_192 = arith.constant 0 : index
    %c0_193 = arith.constant 0 : index
    %298 = vector.load %arg7[%c1_190, %c1_191, %c0_192, %c0_193] : memref<3x4x1x32xf32, #tpu.memory_space<vmem>>, vector<1x1x1x32xf32>
    %299 = vector.shape_cast %298 : vector<1x1x1x32xf32> to vector<1x32xf32>
    %300 = vector.broadcast %299 : vector<1x32xf32> to vector<16x32xf32>
    %301 = arith.addf %297, %300 : vector<16x32xf32>
    %cst_194 = arith.constant 0.000000e+00 : f32
    %302 = vector.broadcast %cst_194 : f32 to vector<16x32xf32>
    %303 = arith.maximumf %301, %302 : vector<16x32xf32>
    %304 = arith.addf %264, %303 : vector<16x32xf32>
    %c1_195 = arith.constant 1 : index
    %c2_196 = arith.constant 2 : index
    %c0_197 = arith.constant 0 : index
    %c0_198 = arith.constant 0 : index
    %305 = vector.load %arg4[%c1_195, %c2_196, %c0_197, %c0_198] : memref<3x4x32x32xf32, #tpu.memory_space<vmem>>, vector<1x1x32x32xf32>
    %306 = vector.shape_cast %305 : vector<1x1x32x32xf32> to vector<32x32xf32>
    %cst_199 = arith.constant dense<0.000000e+00> : vector<16x32xf32>
    %307 = tpu.matmul %199, %306, %cst_199 {dimension_numbers = #tpu.dot_dimension_numbers<[1], [0], [0], [1], [0, 0, 1, 1], [], []>} : vector<16x32xf32>, vector<32x32xf32>, vector<16x32xf32> -> vector<16x32xf32>
    %c1_200 = arith.constant 1 : index
    %c2_201 = arith.constant 2 : index
    %c0_202 = arith.constant 0 : index
    %c0_203 = arith.constant 0 : index
    %308 = vector.load %arg5[%c1_200, %c2_201, %c0_202, %c0_203] : memref<3x4x1x32xf32, #tpu.memory_space<vmem>>, vector<1x1x1x32xf32>
    %309 = vector.shape_cast %308 : vector<1x1x1x32xf32> to vector<1x32xf32>
    %c1_204 = arith.constant 1 : index
    %c2_205 = arith.constant 2 : index
    %c0_206 = arith.constant 0 : index
    %c0_207 = arith.constant 0 : index
    %310 = vector.load %arg6[%c1_204, %c2_205, %c0_206, %c0_207] : memref<3x4x1x32xf32, #tpu.memory_space<vmem>>, vector<1x1x1x32xf32>
    %311 = vector.shape_cast %310 : vector<1x1x1x32xf32> to vector<1x32xf32>
    %cst_208 = arith.constant dense<0.000000e+00> : vector<16x1xf32>
    %312 = tpu.matmul %307, %309, %cst_208 {dimension_numbers = #tpu.dot_dimension_numbers<[1], [1], [0], [0], [0, 0, 1, 0], [], []>} : vector<16x32xf32>, vector<1x32xf32>, vector<16x1xf32> -> vector<16x1xf32>
    %cst_209 = arith.constant dense<0.000000e+00> : vector<1x16xf32>
    %313 = tpu.matmul %311, %307, %cst_209 {dimension_numbers = #tpu.dot_dimension_numbers<[1], [1], [0], [0], [0, 0, 1, 0], [], []>} : vector<1x32xf32>, vector<16x32xf32>, vector<1x16xf32> -> vector<1x16xf32>
    %314 = vector.broadcast %312 : vector<16x1xf32> to vector<16x16xf32>
    %315 = vector.broadcast %313 : vector<1x16xf32> to vector<16x16xf32>
    %316 = arith.addf %314, %315 : vector<16x16xf32>
    %cst_210 = arith.constant 0.000000e+00 : f32
    %317 = vector.broadcast %cst_210 : f32 to vector<16x16xf32>
    %318 = arith.cmpf ogt, %316, %317 : vector<16x16xf32>
    %cst_211 = arith.constant 2.000000e-01 : f32
    %319 = vector.broadcast %cst_211 : f32 to vector<16x16xf32>
    %320 = arith.mulf %319, %316 : vector<16x16xf32>
    %321 = arith.select %318, %316, %320 : vector<16x16xi1>, vector<16x16xf32>
    %cst_212 = arith.constant -1.000000e+09 : f32
    %322 = vector.broadcast %cst_212 : f32 to vector<16x16xf32>
    %323 = arith.select %10, %321, %322 : vector<16x16xi1>, vector<16x16xf32>
    %cst_213 = arith.constant dense<0xFF800000> : vector<16xf32>
    %324 = vector.multi_reduction <maximumf>, %323, %cst_213 [0] : vector<16x16xf32> to vector<16xf32>
    %325 = vector.shape_cast %324 : vector<16xf32> to vector<1x16xf32>
    %326 = vector.broadcast %325 : vector<1x16xf32> to vector<16x16xf32>
    %327 = arith.subf %323, %326 : vector<16x16xf32>
    %328 = math.exp %327 : vector<16x16xf32>
    %329 = arith.mulf %328, %12 : vector<16x16xf32>
    %cst_214 = arith.constant dense<0.000000e+00> : vector<16xf32>
    %330 = vector.multi_reduction <add>, %329, %cst_214 [0] : vector<16x16xf32> to vector<16xf32>
    %331 = vector.shape_cast %330 : vector<16xf32> to vector<1x16xf32>
    %cst_215 = arith.constant 1.000000e-30 : f32
    %332 = vector.broadcast %cst_215 : f32 to vector<1x16xf32>
    %333 = arith.maximumf %331, %332 : vector<1x16xf32>
    %334 = tpu.reciprocal %333 {approx = true} : vector<1x16xf32> -> vector<1x16xf32>
    %335 = vector.broadcast %334 : vector<1x16xf32> to vector<16x16xf32>
    %336 = arith.mulf %329, %335 : vector<16x16xf32>
    %cst_216 = arith.constant dense<0.000000e+00> : vector<16x32xf32>
    %337 = tpu.matmul %336, %307, %cst_216 {dimension_numbers = #tpu.dot_dimension_numbers<[0], [0], [1], [1], [0, 1, 1, 1], [], []>} : vector<16x16xf32>, vector<16x32xf32>, vector<16x32xf32> -> vector<16x32xf32>
    %c1_217 = arith.constant 1 : index
    %c2_218 = arith.constant 2 : index
    %c0_219 = arith.constant 0 : index
    %c0_220 = arith.constant 0 : index
    %338 = vector.load %arg7[%c1_217, %c2_218, %c0_219, %c0_220] : memref<3x4x1x32xf32, #tpu.memory_space<vmem>>, vector<1x1x1x32xf32>
    %339 = vector.shape_cast %338 : vector<1x1x1x32xf32> to vector<1x32xf32>
    %340 = vector.broadcast %339 : vector<1x32xf32> to vector<16x32xf32>
    %341 = arith.addf %337, %340 : vector<16x32xf32>
    %cst_221 = arith.constant 0.000000e+00 : f32
    %342 = vector.broadcast %cst_221 : f32 to vector<16x32xf32>
    %343 = arith.maximumf %341, %342 : vector<16x32xf32>
    %344 = arith.addf %304, %343 : vector<16x32xf32>
    %c1_222 = arith.constant 1 : index
    %c3_223 = arith.constant 3 : index
    %c0_224 = arith.constant 0 : index
    %c0_225 = arith.constant 0 : index
    %345 = vector.load %arg4[%c1_222, %c3_223, %c0_224, %c0_225] : memref<3x4x32x32xf32, #tpu.memory_space<vmem>>, vector<1x1x32x32xf32>
    %346 = vector.shape_cast %345 : vector<1x1x32x32xf32> to vector<32x32xf32>
    %cst_226 = arith.constant dense<0.000000e+00> : vector<16x32xf32>
    %347 = tpu.matmul %199, %346, %cst_226 {dimension_numbers = #tpu.dot_dimension_numbers<[1], [0], [0], [1], [0, 0, 1, 1], [], []>} : vector<16x32xf32>, vector<32x32xf32>, vector<16x32xf32> -> vector<16x32xf32>
    %c1_227 = arith.constant 1 : index
    %c3_228 = arith.constant 3 : index
    %c0_229 = arith.constant 0 : index
    %c0_230 = arith.constant 0 : index
    %348 = vector.load %arg5[%c1_227, %c3_228, %c0_229, %c0_230] : memref<3x4x1x32xf32, #tpu.memory_space<vmem>>, vector<1x1x1x32xf32>
    %349 = vector.shape_cast %348 : vector<1x1x1x32xf32> to vector<1x32xf32>
    %c1_231 = arith.constant 1 : index
    %c3_232 = arith.constant 3 : index
    %c0_233 = arith.constant 0 : index
    %c0_234 = arith.constant 0 : index
    %350 = vector.load %arg6[%c1_231, %c3_232, %c0_233, %c0_234] : memref<3x4x1x32xf32, #tpu.memory_space<vmem>>, vector<1x1x1x32xf32>
    %351 = vector.shape_cast %350 : vector<1x1x1x32xf32> to vector<1x32xf32>
    %cst_235 = arith.constant dense<0.000000e+00> : vector<16x1xf32>
    %352 = tpu.matmul %347, %349, %cst_235 {dimension_numbers = #tpu.dot_dimension_numbers<[1], [1], [0], [0], [0, 0, 1, 0], [], []>} : vector<16x32xf32>, vector<1x32xf32>, vector<16x1xf32> -> vector<16x1xf32>
    %cst_236 = arith.constant dense<0.000000e+00> : vector<1x16xf32>
    %353 = tpu.matmul %351, %347, %cst_236 {dimension_numbers = #tpu.dot_dimension_numbers<[1], [1], [0], [0], [0, 0, 1, 0], [], []>} : vector<1x32xf32>, vector<16x32xf32>, vector<1x16xf32> -> vector<1x16xf32>
    %354 = vector.broadcast %352 : vector<16x1xf32> to vector<16x16xf32>
    %355 = vector.broadcast %353 : vector<1x16xf32> to vector<16x16xf32>
    %356 = arith.addf %354, %355 : vector<16x16xf32>
    %cst_237 = arith.constant 0.000000e+00 : f32
    %357 = vector.broadcast %cst_237 : f32 to vector<16x16xf32>
    %358 = arith.cmpf ogt, %356, %357 : vector<16x16xf32>
    %cst_238 = arith.constant 2.000000e-01 : f32
    %359 = vector.broadcast %cst_238 : f32 to vector<16x16xf32>
    %360 = arith.mulf %359, %356 : vector<16x16xf32>
    %361 = arith.select %358, %356, %360 : vector<16x16xi1>, vector<16x16xf32>
    %cst_239 = arith.constant -1.000000e+09 : f32
    %362 = vector.broadcast %cst_239 : f32 to vector<16x16xf32>
    %363 = arith.select %10, %361, %362 : vector<16x16xi1>, vector<16x16xf32>
    %cst_240 = arith.constant dense<0xFF800000> : vector<16xf32>
    %364 = vector.multi_reduction <maximumf>, %363, %cst_240 [0] : vector<16x16xf32> to vector<16xf32>
    %365 = vector.shape_cast %364 : vector<16xf32> to vector<1x16xf32>
    %366 = vector.broadcast %365 : vector<1x16xf32> to vector<16x16xf32>
    %367 = arith.subf %363, %366 : vector<16x16xf32>
    %368 = math.exp %367 : vector<16x16xf32>
    %369 = arith.mulf %368, %12 : vector<16x16xf32>
    %cst_241 = arith.constant dense<0.000000e+00> : vector<16xf32>
    %370 = vector.multi_reduction <add>, %369, %cst_241 [0] : vector<16x16xf32> to vector<16xf32>
    %371 = vector.shape_cast %370 : vector<16xf32> to vector<1x16xf32>
    %cst_242 = arith.constant 1.000000e-30 : f32
    %372 = vector.broadcast %cst_242 : f32 to vector<1x16xf32>
    %373 = arith.maximumf %371, %372 : vector<1x16xf32>
    %374 = tpu.reciprocal %373 {approx = true} : vector<1x16xf32> -> vector<1x16xf32>
    %375 = vector.broadcast %374 : vector<1x16xf32> to vector<16x16xf32>
    %376 = arith.mulf %369, %375 : vector<16x16xf32>
    %cst_243 = arith.constant dense<0.000000e+00> : vector<16x32xf32>
    %377 = tpu.matmul %376, %347, %cst_243 {dimension_numbers = #tpu.dot_dimension_numbers<[0], [0], [1], [1], [0, 1, 1, 1], [], []>} : vector<16x16xf32>, vector<16x32xf32>, vector<16x32xf32> -> vector<16x32xf32>
    %c1_244 = arith.constant 1 : index
    %c3_245 = arith.constant 3 : index
    %c0_246 = arith.constant 0 : index
    %c0_247 = arith.constant 0 : index
    %378 = vector.load %arg7[%c1_244, %c3_245, %c0_246, %c0_247] : memref<3x4x1x32xf32, #tpu.memory_space<vmem>>, vector<1x1x1x32xf32>
    %379 = vector.shape_cast %378 : vector<1x1x1x32xf32> to vector<1x32xf32>
    %380 = vector.broadcast %379 : vector<1x32xf32> to vector<16x32xf32>
    %381 = arith.addf %377, %380 : vector<16x32xf32>
    %cst_248 = arith.constant 0.000000e+00 : f32
    %382 = vector.broadcast %cst_248 : f32 to vector<16x32xf32>
    %383 = arith.maximumf %381, %382 : vector<16x32xf32>
    %384 = arith.addf %344, %383 : vector<16x32xf32>
    %cst_249 = arith.constant 2.500000e-01 : f32
    %385 = vector.broadcast %cst_249 : f32 to vector<16x32xf32>
    %386 = arith.mulf %384, %385 : vector<16x32xf32>
    %c2_250 = arith.constant 2 : index
    %c0_251 = arith.constant 0 : index
    %c0_252 = arith.constant 0 : index
    %387 = vector.load %arg8[%c2_250, %c0_251, %c0_252] : memref<4x1x32xf32, #tpu.memory_space<vmem>>, vector<1x1x32xf32>
    %388 = vector.shape_cast %387 : vector<1x1x32xf32> to vector<1x32xf32>
    %c2_253 = arith.constant 2 : index
    %c0_254 = arith.constant 0 : index
    %c0_255 = arith.constant 0 : index
    %389 = vector.load %arg9[%c2_253, %c0_254, %c0_255] : memref<4x1x1xf32, #tpu.memory_space<vmem>>, vector<1x1x1xf32>
    %390 = vector.shape_cast %389 : vector<1x1x1xf32> to vector<1x1xf32>
    %391 = vector.broadcast %388 : vector<1x32xf32> to vector<16x32xf32>
    %392 = arith.mulf %386, %391 : vector<16x32xf32>
    %cst_256 = arith.constant dense<0.000000e+00> : vector<16xf32>
    %393 = vector.multi_reduction <add>, %392, %cst_256 [1] : vector<16x32xf32> to vector<16xf32>
    %394 = vector.shape_cast %393 : vector<16xf32> to vector<16x1xf32>
    %395 = vector.broadcast %390 : vector<1x1xf32> to vector<16x1xf32>
    %396 = arith.addf %394, %395 : vector<16x1xf32>
    %cst_257 = arith.constant dense<0xFF800000> : vector<1xf32>
    %397 = vector.multi_reduction <maximumf>, %396, %cst_257 [0] : vector<16x1xf32> to vector<1xf32>
    %398 = vector.shape_cast %397 : vector<1xf32> to vector<1x1xf32>
    %399 = vector.broadcast %398 : vector<1x1xf32> to vector<16x1xf32>
    %400 = arith.subf %396, %399 : vector<16x1xf32>
    %401 = math.exp %400 : vector<16x1xf32>
    %cst_258 = arith.constant dense<0.000000e+00> : vector<1xf32>
    %402 = vector.multi_reduction <add>, %401, %cst_258 [0] : vector<16x1xf32> to vector<1xf32>
    %403 = vector.shape_cast %402 : vector<1xf32> to vector<1x1xf32>
    %404 = tpu.reciprocal %403 {approx = true} : vector<1x1xf32> -> vector<1x1xf32>
    %405 = vector.broadcast %404 : vector<1x1xf32> to vector<16x1xf32>
    %406 = arith.mulf %401, %405 : vector<16x1xf32>
    %407 = vector.broadcast %406 : vector<16x1xf32> to vector<16x32xf32>
    %408 = arith.mulf %407, %386 : vector<16x32xf32>
    %cst_259 = arith.constant dense<0.000000e+00> : vector<32xf32>
    %409 = vector.multi_reduction <add>, %408, %cst_259 [0] : vector<16x32xf32> to vector<32xf32>
    %410 = vector.shape_cast %409 : vector<32xf32> to vector<1x32xf32>
    %cst_260 = arith.constant 0.000000e+00 : f32
    %411 = vector.broadcast %cst_260 : f32 to vector<16x32xf32>
    %c2_261 = arith.constant 2 : index
    %c0_262 = arith.constant 0 : index
    %c0_263 = arith.constant 0 : index
    %c0_264 = arith.constant 0 : index
    %412 = vector.load %arg4[%c2_261, %c0_262, %c0_263, %c0_264] : memref<3x4x32x32xf32, #tpu.memory_space<vmem>>, vector<1x1x32x32xf32>
    %413 = vector.shape_cast %412 : vector<1x1x32x32xf32> to vector<32x32xf32>
    %cst_265 = arith.constant dense<0.000000e+00> : vector<16x32xf32>
    %414 = tpu.matmul %386, %413, %cst_265 {dimension_numbers = #tpu.dot_dimension_numbers<[1], [0], [0], [1], [0, 0, 1, 1], [], []>} : vector<16x32xf32>, vector<32x32xf32>, vector<16x32xf32> -> vector<16x32xf32>
    %c2_266 = arith.constant 2 : index
    %c0_267 = arith.constant 0 : index
    %c0_268 = arith.constant 0 : index
    %c0_269 = arith.constant 0 : index
    %415 = vector.load %arg5[%c2_266, %c0_267, %c0_268, %c0_269] : memref<3x4x1x32xf32, #tpu.memory_space<vmem>>, vector<1x1x1x32xf32>
    %416 = vector.shape_cast %415 : vector<1x1x1x32xf32> to vector<1x32xf32>
    %c2_270 = arith.constant 2 : index
    %c0_271 = arith.constant 0 : index
    %c0_272 = arith.constant 0 : index
    %c0_273 = arith.constant 0 : index
    %417 = vector.load %arg6[%c2_270, %c0_271, %c0_272, %c0_273] : memref<3x4x1x32xf32, #tpu.memory_space<vmem>>, vector<1x1x1x32xf32>
    %418 = vector.shape_cast %417 : vector<1x1x1x32xf32> to vector<1x32xf32>
    %cst_274 = arith.constant dense<0.000000e+00> : vector<16x1xf32>
    %419 = tpu.matmul %414, %416, %cst_274 {dimension_numbers = #tpu.dot_dimension_numbers<[1], [1], [0], [0], [0, 0, 1, 0], [], []>} : vector<16x32xf32>, vector<1x32xf32>, vector<16x1xf32> -> vector<16x1xf32>
    %cst_275 = arith.constant dense<0.000000e+00> : vector<1x16xf32>
    %420 = tpu.matmul %418, %414, %cst_275 {dimension_numbers = #tpu.dot_dimension_numbers<[1], [1], [0], [0], [0, 0, 1, 0], [], []>} : vector<1x32xf32>, vector<16x32xf32>, vector<1x16xf32> -> vector<1x16xf32>
    %421 = vector.broadcast %419 : vector<16x1xf32> to vector<16x16xf32>
    %422 = vector.broadcast %420 : vector<1x16xf32> to vector<16x16xf32>
    %423 = arith.addf %421, %422 : vector<16x16xf32>
    %cst_276 = arith.constant 0.000000e+00 : f32
    %424 = vector.broadcast %cst_276 : f32 to vector<16x16xf32>
    %425 = arith.cmpf ogt, %423, %424 : vector<16x16xf32>
    %cst_277 = arith.constant 2.000000e-01 : f32
    %426 = vector.broadcast %cst_277 : f32 to vector<16x16xf32>
    %427 = arith.mulf %426, %423 : vector<16x16xf32>
    %428 = arith.select %425, %423, %427 : vector<16x16xi1>, vector<16x16xf32>
    %cst_278 = arith.constant -1.000000e+09 : f32
    %429 = vector.broadcast %cst_278 : f32 to vector<16x16xf32>
    %430 = arith.select %10, %428, %429 : vector<16x16xi1>, vector<16x16xf32>
    %cst_279 = arith.constant dense<0xFF800000> : vector<16xf32>
    %431 = vector.multi_reduction <maximumf>, %430, %cst_279 [0] : vector<16x16xf32> to vector<16xf32>
    %432 = vector.shape_cast %431 : vector<16xf32> to vector<1x16xf32>
    %433 = vector.broadcast %432 : vector<1x16xf32> to vector<16x16xf32>
    %434 = arith.subf %430, %433 : vector<16x16xf32>
    %435 = math.exp %434 : vector<16x16xf32>
    %436 = arith.mulf %435, %12 : vector<16x16xf32>
    %cst_280 = arith.constant dense<0.000000e+00> : vector<16xf32>
    %437 = vector.multi_reduction <add>, %436, %cst_280 [0] : vector<16x16xf32> to vector<16xf32>
    %438 = vector.shape_cast %437 : vector<16xf32> to vector<1x16xf32>
    %cst_281 = arith.constant 1.000000e-30 : f32
    %439 = vector.broadcast %cst_281 : f32 to vector<1x16xf32>
    %440 = arith.maximumf %438, %439 : vector<1x16xf32>
    %441 = tpu.reciprocal %440 {approx = true} : vector<1x16xf32> -> vector<1x16xf32>
    %442 = vector.broadcast %441 : vector<1x16xf32> to vector<16x16xf32>
    %443 = arith.mulf %436, %442 : vector<16x16xf32>
    %cst_282 = arith.constant dense<0.000000e+00> : vector<16x32xf32>
    %444 = tpu.matmul %443, %414, %cst_282 {dimension_numbers = #tpu.dot_dimension_numbers<[0], [0], [1], [1], [0, 1, 1, 1], [], []>} : vector<16x16xf32>, vector<16x32xf32>, vector<16x32xf32> -> vector<16x32xf32>
    %c2_283 = arith.constant 2 : index
    %c0_284 = arith.constant 0 : index
    %c0_285 = arith.constant 0 : index
    %c0_286 = arith.constant 0 : index
    %445 = vector.load %arg7[%c2_283, %c0_284, %c0_285, %c0_286] : memref<3x4x1x32xf32, #tpu.memory_space<vmem>>, vector<1x1x1x32xf32>
    %446 = vector.shape_cast %445 : vector<1x1x1x32xf32> to vector<1x32xf32>
    %447 = vector.broadcast %446 : vector<1x32xf32> to vector<16x32xf32>
    %448 = arith.addf %444, %447 : vector<16x32xf32>
    %cst_287 = arith.constant 0.000000e+00 : f32
    %449 = vector.broadcast %cst_287 : f32 to vector<16x32xf32>
    %450 = arith.maximumf %448, %449 : vector<16x32xf32>
    %451 = arith.addf %411, %450 : vector<16x32xf32>
    %c2_288 = arith.constant 2 : index
    %c1_289 = arith.constant 1 : index
    %c0_290 = arith.constant 0 : index
    %c0_291 = arith.constant 0 : index
    %452 = vector.load %arg4[%c2_288, %c1_289, %c0_290, %c0_291] : memref<3x4x32x32xf32, #tpu.memory_space<vmem>>, vector<1x1x32x32xf32>
    %453 = vector.shape_cast %452 : vector<1x1x32x32xf32> to vector<32x32xf32>
    %cst_292 = arith.constant dense<0.000000e+00> : vector<16x32xf32>
    %454 = tpu.matmul %386, %453, %cst_292 {dimension_numbers = #tpu.dot_dimension_numbers<[1], [0], [0], [1], [0, 0, 1, 1], [], []>} : vector<16x32xf32>, vector<32x32xf32>, vector<16x32xf32> -> vector<16x32xf32>
    %c2_293 = arith.constant 2 : index
    %c1_294 = arith.constant 1 : index
    %c0_295 = arith.constant 0 : index
    %c0_296 = arith.constant 0 : index
    %455 = vector.load %arg5[%c2_293, %c1_294, %c0_295, %c0_296] : memref<3x4x1x32xf32, #tpu.memory_space<vmem>>, vector<1x1x1x32xf32>
    %456 = vector.shape_cast %455 : vector<1x1x1x32xf32> to vector<1x32xf32>
    %c2_297 = arith.constant 2 : index
    %c1_298 = arith.constant 1 : index
    %c0_299 = arith.constant 0 : index
    %c0_300 = arith.constant 0 : index
    %457 = vector.load %arg6[%c2_297, %c1_298, %c0_299, %c0_300] : memref<3x4x1x32xf32, #tpu.memory_space<vmem>>, vector<1x1x1x32xf32>
    %458 = vector.shape_cast %457 : vector<1x1x1x32xf32> to vector<1x32xf32>
    %cst_301 = arith.constant dense<0.000000e+00> : vector<16x1xf32>
    %459 = tpu.matmul %454, %456, %cst_301 {dimension_numbers = #tpu.dot_dimension_numbers<[1], [1], [0], [0], [0, 0, 1, 0], [], []>} : vector<16x32xf32>, vector<1x32xf32>, vector<16x1xf32> -> vector<16x1xf32>
    %cst_302 = arith.constant dense<0.000000e+00> : vector<1x16xf32>
    %460 = tpu.matmul %458, %454, %cst_302 {dimension_numbers = #tpu.dot_dimension_numbers<[1], [1], [0], [0], [0, 0, 1, 0], [], []>} : vector<1x32xf32>, vector<16x32xf32>, vector<1x16xf32> -> vector<1x16xf32>
    %461 = vector.broadcast %459 : vector<16x1xf32> to vector<16x16xf32>
    %462 = vector.broadcast %460 : vector<1x16xf32> to vector<16x16xf32>
    %463 = arith.addf %461, %462 : vector<16x16xf32>
    %cst_303 = arith.constant 0.000000e+00 : f32
    %464 = vector.broadcast %cst_303 : f32 to vector<16x16xf32>
    %465 = arith.cmpf ogt, %463, %464 : vector<16x16xf32>
    %cst_304 = arith.constant 2.000000e-01 : f32
    %466 = vector.broadcast %cst_304 : f32 to vector<16x16xf32>
    %467 = arith.mulf %466, %463 : vector<16x16xf32>
    %468 = arith.select %465, %463, %467 : vector<16x16xi1>, vector<16x16xf32>
    %cst_305 = arith.constant -1.000000e+09 : f32
    %469 = vector.broadcast %cst_305 : f32 to vector<16x16xf32>
    %470 = arith.select %10, %468, %469 : vector<16x16xi1>, vector<16x16xf32>
    %cst_306 = arith.constant dense<0xFF800000> : vector<16xf32>
    %471 = vector.multi_reduction <maximumf>, %470, %cst_306 [0] : vector<16x16xf32> to vector<16xf32>
    %472 = vector.shape_cast %471 : vector<16xf32> to vector<1x16xf32>
    %473 = vector.broadcast %472 : vector<1x16xf32> to vector<16x16xf32>
    %474 = arith.subf %470, %473 : vector<16x16xf32>
    %475 = math.exp %474 : vector<16x16xf32>
    %476 = arith.mulf %475, %12 : vector<16x16xf32>
    %cst_307 = arith.constant dense<0.000000e+00> : vector<16xf32>
    %477 = vector.multi_reduction <add>, %476, %cst_307 [0] : vector<16x16xf32> to vector<16xf32>
    %478 = vector.shape_cast %477 : vector<16xf32> to vector<1x16xf32>
    %cst_308 = arith.constant 1.000000e-30 : f32
    %479 = vector.broadcast %cst_308 : f32 to vector<1x16xf32>
    %480 = arith.maximumf %478, %479 : vector<1x16xf32>
    %481 = tpu.reciprocal %480 {approx = true} : vector<1x16xf32> -> vector<1x16xf32>
    %482 = vector.broadcast %481 : vector<1x16xf32> to vector<16x16xf32>
    %483 = arith.mulf %476, %482 : vector<16x16xf32>
    %cst_309 = arith.constant dense<0.000000e+00> : vector<16x32xf32>
    %484 = tpu.matmul %483, %454, %cst_309 {dimension_numbers = #tpu.dot_dimension_numbers<[0], [0], [1], [1], [0, 1, 1, 1], [], []>} : vector<16x16xf32>, vector<16x32xf32>, vector<16x32xf32> -> vector<16x32xf32>
    %c2_310 = arith.constant 2 : index
    %c1_311 = arith.constant 1 : index
    %c0_312 = arith.constant 0 : index
    %c0_313 = arith.constant 0 : index
    %485 = vector.load %arg7[%c2_310, %c1_311, %c0_312, %c0_313] : memref<3x4x1x32xf32, #tpu.memory_space<vmem>>, vector<1x1x1x32xf32>
    %486 = vector.shape_cast %485 : vector<1x1x1x32xf32> to vector<1x32xf32>
    %487 = vector.broadcast %486 : vector<1x32xf32> to vector<16x32xf32>
    %488 = arith.addf %484, %487 : vector<16x32xf32>
    %cst_314 = arith.constant 0.000000e+00 : f32
    %489 = vector.broadcast %cst_314 : f32 to vector<16x32xf32>
    %490 = arith.maximumf %488, %489 : vector<16x32xf32>
    %491 = arith.addf %451, %490 : vector<16x32xf32>
    %c2_315 = arith.constant 2 : index
    %c2_316 = arith.constant 2 : index
    %c0_317 = arith.constant 0 : index
    %c0_318 = arith.constant 0 : index
    %492 = vector.load %arg4[%c2_315, %c2_316, %c0_317, %c0_318] : memref<3x4x32x32xf32, #tpu.memory_space<vmem>>, vector<1x1x32x32xf32>
    %493 = vector.shape_cast %492 : vector<1x1x32x32xf32> to vector<32x32xf32>
    %cst_319 = arith.constant dense<0.000000e+00> : vector<16x32xf32>
    %494 = tpu.matmul %386, %493, %cst_319 {dimension_numbers = #tpu.dot_dimension_numbers<[1], [0], [0], [1], [0, 0, 1, 1], [], []>} : vector<16x32xf32>, vector<32x32xf32>, vector<16x32xf32> -> vector<16x32xf32>
    %c2_320 = arith.constant 2 : index
    %c2_321 = arith.constant 2 : index
    %c0_322 = arith.constant 0 : index
    %c0_323 = arith.constant 0 : index
    %495 = vector.load %arg5[%c2_320, %c2_321, %c0_322, %c0_323] : memref<3x4x1x32xf32, #tpu.memory_space<vmem>>, vector<1x1x1x32xf32>
    %496 = vector.shape_cast %495 : vector<1x1x1x32xf32> to vector<1x32xf32>
    %c2_324 = arith.constant 2 : index
    %c2_325 = arith.constant 2 : index
    %c0_326 = arith.constant 0 : index
    %c0_327 = arith.constant 0 : index
    %497 = vector.load %arg6[%c2_324, %c2_325, %c0_326, %c0_327] : memref<3x4x1x32xf32, #tpu.memory_space<vmem>>, vector<1x1x1x32xf32>
    %498 = vector.shape_cast %497 : vector<1x1x1x32xf32> to vector<1x32xf32>
    %cst_328 = arith.constant dense<0.000000e+00> : vector<16x1xf32>
    %499 = tpu.matmul %494, %496, %cst_328 {dimension_numbers = #tpu.dot_dimension_numbers<[1], [1], [0], [0], [0, 0, 1, 0], [], []>} : vector<16x32xf32>, vector<1x32xf32>, vector<16x1xf32> -> vector<16x1xf32>
    %cst_329 = arith.constant dense<0.000000e+00> : vector<1x16xf32>
    %500 = tpu.matmul %498, %494, %cst_329 {dimension_numbers = #tpu.dot_dimension_numbers<[1], [1], [0], [0], [0, 0, 1, 0], [], []>} : vector<1x32xf32>, vector<16x32xf32>, vector<1x16xf32> -> vector<1x16xf32>
    %501 = vector.broadcast %499 : vector<16x1xf32> to vector<16x16xf32>
    %502 = vector.broadcast %500 : vector<1x16xf32> to vector<16x16xf32>
    %503 = arith.addf %501, %502 : vector<16x16xf32>
    %cst_330 = arith.constant 0.000000e+00 : f32
    %504 = vector.broadcast %cst_330 : f32 to vector<16x16xf32>
    %505 = arith.cmpf ogt, %503, %504 : vector<16x16xf32>
    %cst_331 = arith.constant 2.000000e-01 : f32
    %506 = vector.broadcast %cst_331 : f32 to vector<16x16xf32>
    %507 = arith.mulf %506, %503 : vector<16x16xf32>
    %508 = arith.select %505, %503, %507 : vector<16x16xi1>, vector<16x16xf32>
    %cst_332 = arith.constant -1.000000e+09 : f32
    %509 = vector.broadcast %cst_332 : f32 to vector<16x16xf32>
    %510 = arith.select %10, %508, %509 : vector<16x16xi1>, vector<16x16xf32>
    %cst_333 = arith.constant dense<0xFF800000> : vector<16xf32>
    %511 = vector.multi_reduction <maximumf>, %510, %cst_333 [0] : vector<16x16xf32> to vector<16xf32>
    %512 = vector.shape_cast %511 : vector<16xf32> to vector<1x16xf32>
    %513 = vector.broadcast %512 : vector<1x16xf32> to vector<16x16xf32>
    %514 = arith.subf %510, %513 : vector<16x16xf32>
    %515 = math.exp %514 : vector<16x16xf32>
    %516 = arith.mulf %515, %12 : vector<16x16xf32>
    %cst_334 = arith.constant dense<0.000000e+00> : vector<16xf32>
    %517 = vector.multi_reduction <add>, %516, %cst_334 [0] : vector<16x16xf32> to vector<16xf32>
    %518 = vector.shape_cast %517 : vector<16xf32> to vector<1x16xf32>
    %cst_335 = arith.constant 1.000000e-30 : f32
    %519 = vector.broadcast %cst_335 : f32 to vector<1x16xf32>
    %520 = arith.maximumf %518, %519 : vector<1x16xf32>
    %521 = tpu.reciprocal %520 {approx = true} : vector<1x16xf32> -> vector<1x16xf32>
    %522 = vector.broadcast %521 : vector<1x16xf32> to vector<16x16xf32>
    %523 = arith.mulf %516, %522 : vector<16x16xf32>
    %cst_336 = arith.constant dense<0.000000e+00> : vector<16x32xf32>
    %524 = tpu.matmul %523, %494, %cst_336 {dimension_numbers = #tpu.dot_dimension_numbers<[0], [0], [1], [1], [0, 1, 1, 1], [], []>} : vector<16x16xf32>, vector<16x32xf32>, vector<16x32xf32> -> vector<16x32xf32>
    %c2_337 = arith.constant 2 : index
    %c2_338 = arith.constant 2 : index
    %c0_339 = arith.constant 0 : index
    %c0_340 = arith.constant 0 : index
    %525 = vector.load %arg7[%c2_337, %c2_338, %c0_339, %c0_340] : memref<3x4x1x32xf32, #tpu.memory_space<vmem>>, vector<1x1x1x32xf32>
    %526 = vector.shape_cast %525 : vector<1x1x1x32xf32> to vector<1x32xf32>
    %527 = vector.broadcast %526 : vector<1x32xf32> to vector<16x32xf32>
    %528 = arith.addf %524, %527 : vector<16x32xf32>
    %cst_341 = arith.constant 0.000000e+00 : f32
    %529 = vector.broadcast %cst_341 : f32 to vector<16x32xf32>
    %530 = arith.maximumf %528, %529 : vector<16x32xf32>
    %531 = arith.addf %491, %530 : vector<16x32xf32>
    %c2_342 = arith.constant 2 : index
    %c3_343 = arith.constant 3 : index
    %c0_344 = arith.constant 0 : index
    %c0_345 = arith.constant 0 : index
    %532 = vector.load %arg4[%c2_342, %c3_343, %c0_344, %c0_345] : memref<3x4x32x32xf32, #tpu.memory_space<vmem>>, vector<1x1x32x32xf32>
    %533 = vector.shape_cast %532 : vector<1x1x32x32xf32> to vector<32x32xf32>
    %cst_346 = arith.constant dense<0.000000e+00> : vector<16x32xf32>
    %534 = tpu.matmul %386, %533, %cst_346 {dimension_numbers = #tpu.dot_dimension_numbers<[1], [0], [0], [1], [0, 0, 1, 1], [], []>} : vector<16x32xf32>, vector<32x32xf32>, vector<16x32xf32> -> vector<16x32xf32>
    %c2_347 = arith.constant 2 : index
    %c3_348 = arith.constant 3 : index
    %c0_349 = arith.constant 0 : index
    %c0_350 = arith.constant 0 : index
    %535 = vector.load %arg5[%c2_347, %c3_348, %c0_349, %c0_350] : memref<3x4x1x32xf32, #tpu.memory_space<vmem>>, vector<1x1x1x32xf32>
    %536 = vector.shape_cast %535 : vector<1x1x1x32xf32> to vector<1x32xf32>
    %c2_351 = arith.constant 2 : index
    %c3_352 = arith.constant 3 : index
    %c0_353 = arith.constant 0 : index
    %c0_354 = arith.constant 0 : index
    %537 = vector.load %arg6[%c2_351, %c3_352, %c0_353, %c0_354] : memref<3x4x1x32xf32, #tpu.memory_space<vmem>>, vector<1x1x1x32xf32>
    %538 = vector.shape_cast %537 : vector<1x1x1x32xf32> to vector<1x32xf32>
    %cst_355 = arith.constant dense<0.000000e+00> : vector<16x1xf32>
    %539 = tpu.matmul %534, %536, %cst_355 {dimension_numbers = #tpu.dot_dimension_numbers<[1], [1], [0], [0], [0, 0, 1, 0], [], []>} : vector<16x32xf32>, vector<1x32xf32>, vector<16x1xf32> -> vector<16x1xf32>
    %cst_356 = arith.constant dense<0.000000e+00> : vector<1x16xf32>
    %540 = tpu.matmul %538, %534, %cst_356 {dimension_numbers = #tpu.dot_dimension_numbers<[1], [1], [0], [0], [0, 0, 1, 0], [], []>} : vector<1x32xf32>, vector<16x32xf32>, vector<1x16xf32> -> vector<1x16xf32>
    %541 = vector.broadcast %539 : vector<16x1xf32> to vector<16x16xf32>
    %542 = vector.broadcast %540 : vector<1x16xf32> to vector<16x16xf32>
    %543 = arith.addf %541, %542 : vector<16x16xf32>
    %cst_357 = arith.constant 0.000000e+00 : f32
    %544 = vector.broadcast %cst_357 : f32 to vector<16x16xf32>
    %545 = arith.cmpf ogt, %543, %544 : vector<16x16xf32>
    %cst_358 = arith.constant 2.000000e-01 : f32
    %546 = vector.broadcast %cst_358 : f32 to vector<16x16xf32>
    %547 = arith.mulf %546, %543 : vector<16x16xf32>
    %548 = arith.select %545, %543, %547 : vector<16x16xi1>, vector<16x16xf32>
    %cst_359 = arith.constant -1.000000e+09 : f32
    %549 = vector.broadcast %cst_359 : f32 to vector<16x16xf32>
    %550 = arith.select %10, %548, %549 : vector<16x16xi1>, vector<16x16xf32>
    %cst_360 = arith.constant dense<0xFF800000> : vector<16xf32>
    %551 = vector.multi_reduction <maximumf>, %550, %cst_360 [0] : vector<16x16xf32> to vector<16xf32>
    %552 = vector.shape_cast %551 : vector<16xf32> to vector<1x16xf32>
    %553 = vector.broadcast %552 : vector<1x16xf32> to vector<16x16xf32>
    %554 = arith.subf %550, %553 : vector<16x16xf32>
    %555 = math.exp %554 : vector<16x16xf32>
    %556 = arith.mulf %555, %12 : vector<16x16xf32>
    %cst_361 = arith.constant dense<0.000000e+00> : vector<16xf32>
    %557 = vector.multi_reduction <add>, %556, %cst_361 [0] : vector<16x16xf32> to vector<16xf32>
    %558 = vector.shape_cast %557 : vector<16xf32> to vector<1x16xf32>
    %cst_362 = arith.constant 1.000000e-30 : f32
    %559 = vector.broadcast %cst_362 : f32 to vector<1x16xf32>
    %560 = arith.maximumf %558, %559 : vector<1x16xf32>
    %561 = tpu.reciprocal %560 {approx = true} : vector<1x16xf32> -> vector<1x16xf32>
    %562 = vector.broadcast %561 : vector<1x16xf32> to vector<16x16xf32>
    %563 = arith.mulf %556, %562 : vector<16x16xf32>
    %cst_363 = arith.constant dense<0.000000e+00> : vector<16x32xf32>
    %564 = tpu.matmul %563, %534, %cst_363 {dimension_numbers = #tpu.dot_dimension_numbers<[0], [0], [1], [1], [0, 1, 1, 1], [], []>} : vector<16x16xf32>, vector<16x32xf32>, vector<16x32xf32> -> vector<16x32xf32>
    %c2_364 = arith.constant 2 : index
    %c3_365 = arith.constant 3 : index
    %c0_366 = arith.constant 0 : index
    %c0_367 = arith.constant 0 : index
    %565 = vector.load %arg7[%c2_364, %c3_365, %c0_366, %c0_367] : memref<3x4x1x32xf32, #tpu.memory_space<vmem>>, vector<1x1x1x32xf32>
    %566 = vector.shape_cast %565 : vector<1x1x1x32xf32> to vector<1x32xf32>
    %567 = vector.broadcast %566 : vector<1x32xf32> to vector<16x32xf32>
    %568 = arith.addf %564, %567 : vector<16x32xf32>
    %cst_368 = arith.constant 0.000000e+00 : f32
    %569 = vector.broadcast %cst_368 : f32 to vector<16x32xf32>
    %570 = arith.maximumf %568, %569 : vector<16x32xf32>
    %571 = arith.addf %531, %570 : vector<16x32xf32>
    %cst_369 = arith.constant 2.500000e-01 : f32
    %572 = vector.broadcast %cst_369 : f32 to vector<16x32xf32>
    %573 = arith.mulf %571, %572 : vector<16x32xf32>
    %c3_370 = arith.constant 3 : index
    %c0_371 = arith.constant 0 : index
    %c0_372 = arith.constant 0 : index
    %574 = vector.load %arg8[%c3_370, %c0_371, %c0_372] : memref<4x1x32xf32, #tpu.memory_space<vmem>>, vector<1x1x32xf32>
    %575 = vector.shape_cast %574 : vector<1x1x32xf32> to vector<1x32xf32>
    %c3_373 = arith.constant 3 : index
    %c0_374 = arith.constant 0 : index
    %c0_375 = arith.constant 0 : index
    %576 = vector.load %arg9[%c3_373, %c0_374, %c0_375] : memref<4x1x1xf32, #tpu.memory_space<vmem>>, vector<1x1x1xf32>
    %577 = vector.shape_cast %576 : vector<1x1x1xf32> to vector<1x1xf32>
    %578 = vector.broadcast %575 : vector<1x32xf32> to vector<16x32xf32>
    %579 = arith.mulf %573, %578 : vector<16x32xf32>
    %cst_376 = arith.constant dense<0.000000e+00> : vector<16xf32>
    %580 = vector.multi_reduction <add>, %579, %cst_376 [1] : vector<16x32xf32> to vector<16xf32>
    %581 = vector.shape_cast %580 : vector<16xf32> to vector<16x1xf32>
    %582 = vector.broadcast %577 : vector<1x1xf32> to vector<16x1xf32>
    %583 = arith.addf %581, %582 : vector<16x1xf32>
    %cst_377 = arith.constant dense<0xFF800000> : vector<1xf32>
    %584 = vector.multi_reduction <maximumf>, %583, %cst_377 [0] : vector<16x1xf32> to vector<1xf32>
    %585 = vector.shape_cast %584 : vector<1xf32> to vector<1x1xf32>
    %586 = vector.broadcast %585 : vector<1x1xf32> to vector<16x1xf32>
    %587 = arith.subf %583, %586 : vector<16x1xf32>
    %588 = math.exp %587 : vector<16x1xf32>
    %cst_378 = arith.constant dense<0.000000e+00> : vector<1xf32>
    %589 = vector.multi_reduction <add>, %588, %cst_378 [0] : vector<16x1xf32> to vector<1xf32>
    %590 = vector.shape_cast %589 : vector<1xf32> to vector<1x1xf32>
    %591 = tpu.reciprocal %590 {approx = true} : vector<1x1xf32> -> vector<1x1xf32>
    %592 = vector.broadcast %591 : vector<1x1xf32> to vector<16x1xf32>
    %593 = arith.mulf %588, %592 : vector<16x1xf32>
    %594 = vector.broadcast %593 : vector<16x1xf32> to vector<16x32xf32>
    %595 = arith.mulf %594, %573 : vector<16x32xf32>
    %cst_379 = arith.constant dense<0.000000e+00> : vector<32xf32>
    %596 = vector.multi_reduction <add>, %595, %cst_379 [0] : vector<16x32xf32> to vector<32xf32>
    %597 = vector.shape_cast %596 : vector<32xf32> to vector<1x32xf32>
    %c0_380 = arith.constant 0 : index
    %c0_381 = arith.constant 0 : index
    %c0_382 = arith.constant 0 : index
    %598 = vector.load %arg10[%c0_380, %c0_381, %c0_382] : memref<2x32x128xf32, #tpu.memory_space<vmem>>, vector<1x32x128xf32>
    %599 = vector.shape_cast %598 : vector<1x32x128xf32> to vector<32x128xf32>
    %c0_383 = arith.constant 0 : index
    %c0_384 = arith.constant 0 : index
    %c0_385 = arith.constant 0 : index
    %600 = vector.load %arg11[%c0_383, %c0_384, %c0_385] : memref<2x32x128xf32, #tpu.memory_space<vmem>>, vector<1x32x128xf32>
    %601 = vector.shape_cast %600 : vector<1x32x128xf32> to vector<32x128xf32>
    %c0_386 = arith.constant 0 : index
    %c0_387 = arith.constant 0 : index
    %c0_388 = arith.constant 0 : index
    %602 = vector.load %arg12[%c0_386, %c0_387, %c0_388] : memref<2x1x128xf32, #tpu.memory_space<vmem>>, vector<1x1x128xf32>
    %603 = vector.shape_cast %602 : vector<1x1x128xf32> to vector<1x128xf32>
    %cst_389 = arith.constant 0.000000e+00 : f32
    %604 = vector.broadcast %cst_389 : f32 to vector<1x32xf32>
    %cst_390 = arith.constant 0.000000e+00 : f32
    %605 = vector.broadcast %cst_390 : f32 to vector<1x32xf32>
    %cst_391 = arith.constant dense<0.000000e+00> : vector<1x128xf32>
    %606 = tpu.matmul %36, %599, %cst_391 {dimension_numbers = #tpu.dot_dimension_numbers<[1], [0], [0], [1], [0, 0, 1, 1], [], []>} : vector<1x32xf32>, vector<32x128xf32>, vector<1x128xf32> -> vector<1x128xf32>
    %cst_392 = arith.constant dense<0.000000e+00> : vector<1x128xf32>
    %607 = tpu.matmul %604, %601, %cst_392 {dimension_numbers = #tpu.dot_dimension_numbers<[1], [0], [0], [1], [0, 0, 1, 1], [], []>} : vector<1x32xf32>, vector<32x128xf32>, vector<1x128xf32> -> vector<1x128xf32>
    %608 = arith.addf %606, %607 : vector<1x128xf32>
    %609 = arith.addf %608, %603 : vector<1x128xf32>
    %610 = vector.extract_strided_slice %609 {offsets = [0, 0], sizes = [1, 32], strides = [1, 1]} : vector<1x128xf32> to vector<1x32xf32>
    %611 = arith.negf %610 : vector<1x32xf32>
    %612 = math.exp %611 : vector<1x32xf32>
    %cst_393 = arith.constant 1.000000e+00 : f32
    %613 = vector.broadcast %cst_393 : f32 to vector<1x32xf32>
    %614 = arith.addf %613, %612 : vector<1x32xf32>
    %615 = arith.divf %613, %614 : vector<1x32xf32>
    %616 = vector.extract_strided_slice %609 {offsets = [0, 32], sizes = [1, 32], strides = [1, 1]} : vector<1x128xf32> to vector<1x32xf32>
    %617 = arith.negf %616 : vector<1x32xf32>
    %618 = math.exp %617 : vector<1x32xf32>
    %cst_394 = arith.constant 1.000000e+00 : f32
    %619 = vector.broadcast %cst_394 : f32 to vector<1x32xf32>
    %620 = arith.addf %619, %618 : vector<1x32xf32>
    %621 = arith.divf %619, %620 : vector<1x32xf32>
    %622 = vector.extract_strided_slice %609 {offsets = [0, 64], sizes = [1, 32], strides = [1, 1]} : vector<1x128xf32> to vector<1x32xf32>
    %623 = math.tanh %622 : vector<1x32xf32>
    %624 = vector.extract_strided_slice %609 {offsets = [0, 96], sizes = [1, 32], strides = [1, 1]} : vector<1x128xf32> to vector<1x32xf32>
    %625 = arith.negf %624 : vector<1x32xf32>
    %626 = math.exp %625 : vector<1x32xf32>
    %cst_395 = arith.constant 1.000000e+00 : f32
    %627 = vector.broadcast %cst_395 : f32 to vector<1x32xf32>
    %628 = arith.addf %627, %626 : vector<1x32xf32>
    %629 = arith.divf %627, %628 : vector<1x32xf32>
    %630 = arith.mulf %621, %605 : vector<1x32xf32>
    %631 = arith.mulf %615, %623 : vector<1x32xf32>
    %632 = arith.addf %630, %631 : vector<1x32xf32>
    %633 = math.tanh %632 : vector<1x32xf32>
    %634 = arith.mulf %629, %633 : vector<1x32xf32>
    %cst_396 = arith.constant dense<0.000000e+00> : vector<1x128xf32>
    %635 = tpu.matmul %223, %599, %cst_396 {dimension_numbers = #tpu.dot_dimension_numbers<[1], [0], [0], [1], [0, 0, 1, 1], [], []>} : vector<1x32xf32>, vector<32x128xf32>, vector<1x128xf32> -> vector<1x128xf32>
    %cst_397 = arith.constant dense<0.000000e+00> : vector<1x128xf32>
    %636 = tpu.matmul %634, %601, %cst_397 {dimension_numbers = #tpu.dot_dimension_numbers<[1], [0], [0], [1], [0, 0, 1, 1], [], []>} : vector<1x32xf32>, vector<32x128xf32>, vector<1x128xf32> -> vector<1x128xf32>
    %637 = arith.addf %635, %636 : vector<1x128xf32>
    %638 = arith.addf %637, %603 : vector<1x128xf32>
    %639 = vector.extract_strided_slice %638 {offsets = [0, 0], sizes = [1, 32], strides = [1, 1]} : vector<1x128xf32> to vector<1x32xf32>
    %640 = arith.negf %639 : vector<1x32xf32>
    %641 = math.exp %640 : vector<1x32xf32>
    %cst_398 = arith.constant 1.000000e+00 : f32
    %642 = vector.broadcast %cst_398 : f32 to vector<1x32xf32>
    %643 = arith.addf %642, %641 : vector<1x32xf32>
    %644 = arith.divf %642, %643 : vector<1x32xf32>
    %645 = vector.extract_strided_slice %638 {offsets = [0, 32], sizes = [1, 32], strides = [1, 1]} : vector<1x128xf32> to vector<1x32xf32>
    %646 = arith.negf %645 : vector<1x32xf32>
    %647 = math.exp %646 : vector<1x32xf32>
    %cst_399 = arith.constant 1.000000e+00 : f32
    %648 = vector.broadcast %cst_399 : f32 to vector<1x32xf32>
    %649 = arith.addf %648, %647 : vector<1x32xf32>
    %650 = arith.divf %648, %649 : vector<1x32xf32>
    %651 = vector.extract_strided_slice %638 {offsets = [0, 64], sizes = [1, 32], strides = [1, 1]} : vector<1x128xf32> to vector<1x32xf32>
    %652 = math.tanh %651 : vector<1x32xf32>
    %653 = vector.extract_strided_slice %638 {offsets = [0, 96], sizes = [1, 32], strides = [1, 1]} : vector<1x128xf32> to vector<1x32xf32>
    %654 = arith.negf %653 : vector<1x32xf32>
    %655 = math.exp %654 : vector<1x32xf32>
    %cst_400 = arith.constant 1.000000e+00 : f32
    %656 = vector.broadcast %cst_400 : f32 to vector<1x32xf32>
    %657 = arith.addf %656, %655 : vector<1x32xf32>
    %658 = arith.divf %656, %657 : vector<1x32xf32>
    %659 = arith.mulf %650, %632 : vector<1x32xf32>
    %660 = arith.mulf %644, %652 : vector<1x32xf32>
    %661 = arith.addf %659, %660 : vector<1x32xf32>
    %662 = math.tanh %661 : vector<1x32xf32>
    %663 = arith.mulf %658, %662 : vector<1x32xf32>
    %cst_401 = arith.constant dense<0.000000e+00> : vector<1x128xf32>
    %664 = tpu.matmul %410, %599, %cst_401 {dimension_numbers = #tpu.dot_dimension_numbers<[1], [0], [0], [1], [0, 0, 1, 1], [], []>} : vector<1x32xf32>, vector<32x128xf32>, vector<1x128xf32> -> vector<1x128xf32>
    %cst_402 = arith.constant dense<0.000000e+00> : vector<1x128xf32>
    %665 = tpu.matmul %663, %601, %cst_402 {dimension_numbers = #tpu.dot_dimension_numbers<[1], [0], [0], [1], [0, 0, 1, 1], [], []>} : vector<1x32xf32>, vector<32x128xf32>, vector<1x128xf32> -> vector<1x128xf32>
    %666 = arith.addf %664, %665 : vector<1x128xf32>
    %667 = arith.addf %666, %603 : vector<1x128xf32>
    %668 = vector.extract_strided_slice %667 {offsets = [0, 0], sizes = [1, 32], strides = [1, 1]} : vector<1x128xf32> to vector<1x32xf32>
    %669 = arith.negf %668 : vector<1x32xf32>
    %670 = math.exp %669 : vector<1x32xf32>
    %cst_403 = arith.constant 1.000000e+00 : f32
    %671 = vector.broadcast %cst_403 : f32 to vector<1x32xf32>
    %672 = arith.addf %671, %670 : vector<1x32xf32>
    %673 = arith.divf %671, %672 : vector<1x32xf32>
    %674 = vector.extract_strided_slice %667 {offsets = [0, 32], sizes = [1, 32], strides = [1, 1]} : vector<1x128xf32> to vector<1x32xf32>
    %675 = arith.negf %674 : vector<1x32xf32>
    %676 = math.exp %675 : vector<1x32xf32>
    %cst_404 = arith.constant 1.000000e+00 : f32
    %677 = vector.broadcast %cst_404 : f32 to vector<1x32xf32>
    %678 = arith.addf %677, %676 : vector<1x32xf32>
    %679 = arith.divf %677, %678 : vector<1x32xf32>
    %680 = vector.extract_strided_slice %667 {offsets = [0, 64], sizes = [1, 32], strides = [1, 1]} : vector<1x128xf32> to vector<1x32xf32>
    %681 = math.tanh %680 : vector<1x32xf32>
    %682 = vector.extract_strided_slice %667 {offsets = [0, 96], sizes = [1, 32], strides = [1, 1]} : vector<1x128xf32> to vector<1x32xf32>
    %683 = arith.negf %682 : vector<1x32xf32>
    %684 = math.exp %683 : vector<1x32xf32>
    %cst_405 = arith.constant 1.000000e+00 : f32
    %685 = vector.broadcast %cst_405 : f32 to vector<1x32xf32>
    %686 = arith.addf %685, %684 : vector<1x32xf32>
    %687 = arith.divf %685, %686 : vector<1x32xf32>
    %688 = arith.mulf %679, %661 : vector<1x32xf32>
    %689 = arith.mulf %673, %681 : vector<1x32xf32>
    %690 = arith.addf %688, %689 : vector<1x32xf32>
    %691 = math.tanh %690 : vector<1x32xf32>
    %692 = arith.mulf %687, %691 : vector<1x32xf32>
    %cst_406 = arith.constant dense<0.000000e+00> : vector<1x128xf32>
    %693 = tpu.matmul %597, %599, %cst_406 {dimension_numbers = #tpu.dot_dimension_numbers<[1], [0], [0], [1], [0, 0, 1, 1], [], []>} : vector<1x32xf32>, vector<32x128xf32>, vector<1x128xf32> -> vector<1x128xf32>
    %cst_407 = arith.constant dense<0.000000e+00> : vector<1x128xf32>
    %694 = tpu.matmul %692, %601, %cst_407 {dimension_numbers = #tpu.dot_dimension_numbers<[1], [0], [0], [1], [0, 0, 1, 1], [], []>} : vector<1x32xf32>, vector<32x128xf32>, vector<1x128xf32> -> vector<1x128xf32>
    %695 = arith.addf %693, %694 : vector<1x128xf32>
    %696 = arith.addf %695, %603 : vector<1x128xf32>
    %697 = vector.extract_strided_slice %696 {offsets = [0, 0], sizes = [1, 32], strides = [1, 1]} : vector<1x128xf32> to vector<1x32xf32>
    %698 = arith.negf %697 : vector<1x32xf32>
    %699 = math.exp %698 : vector<1x32xf32>
    %cst_408 = arith.constant 1.000000e+00 : f32
    %700 = vector.broadcast %cst_408 : f32 to vector<1x32xf32>
    %701 = arith.addf %700, %699 : vector<1x32xf32>
    %702 = arith.divf %700, %701 : vector<1x32xf32>
    %703 = vector.extract_strided_slice %696 {offsets = [0, 32], sizes = [1, 32], strides = [1, 1]} : vector<1x128xf32> to vector<1x32xf32>
    %704 = arith.negf %703 : vector<1x32xf32>
    %705 = math.exp %704 : vector<1x32xf32>
    %cst_409 = arith.constant 1.000000e+00 : f32
    %706 = vector.broadcast %cst_409 : f32 to vector<1x32xf32>
    %707 = arith.addf %706, %705 : vector<1x32xf32>
    %708 = arith.divf %706, %707 : vector<1x32xf32>
    %709 = vector.extract_strided_slice %696 {offsets = [0, 64], sizes = [1, 32], strides = [1, 1]} : vector<1x128xf32> to vector<1x32xf32>
    %710 = math.tanh %709 : vector<1x32xf32>
    %711 = vector.extract_strided_slice %696 {offsets = [0, 96], sizes = [1, 32], strides = [1, 1]} : vector<1x128xf32> to vector<1x32xf32>
    %712 = arith.negf %711 : vector<1x32xf32>
    %713 = math.exp %712 : vector<1x32xf32>
    %cst_410 = arith.constant 1.000000e+00 : f32
    %714 = vector.broadcast %cst_410 : f32 to vector<1x32xf32>
    %715 = arith.addf %714, %713 : vector<1x32xf32>
    %716 = arith.divf %714, %715 : vector<1x32xf32>
    %717 = arith.mulf %708, %690 : vector<1x32xf32>
    %718 = arith.mulf %702, %710 : vector<1x32xf32>
    %719 = arith.addf %717, %718 : vector<1x32xf32>
    %720 = math.tanh %719 : vector<1x32xf32>
    %721 = arith.mulf %716, %720 : vector<1x32xf32>
    %c1_411 = arith.constant 1 : index
    %c0_412 = arith.constant 0 : index
    %c0_413 = arith.constant 0 : index
    %722 = vector.load %arg10[%c1_411, %c0_412, %c0_413] : memref<2x32x128xf32, #tpu.memory_space<vmem>>, vector<1x32x128xf32>
    %723 = vector.shape_cast %722 : vector<1x32x128xf32> to vector<32x128xf32>
    %c1_414 = arith.constant 1 : index
    %c0_415 = arith.constant 0 : index
    %c0_416 = arith.constant 0 : index
    %724 = vector.load %arg11[%c1_414, %c0_415, %c0_416] : memref<2x32x128xf32, #tpu.memory_space<vmem>>, vector<1x32x128xf32>
    %725 = vector.shape_cast %724 : vector<1x32x128xf32> to vector<32x128xf32>
    %c1_417 = arith.constant 1 : index
    %c0_418 = arith.constant 0 : index
    %c0_419 = arith.constant 0 : index
    %726 = vector.load %arg12[%c1_417, %c0_418, %c0_419] : memref<2x1x128xf32, #tpu.memory_space<vmem>>, vector<1x1x128xf32>
    %727 = vector.shape_cast %726 : vector<1x1x128xf32> to vector<1x128xf32>
    %cst_420 = arith.constant 0.000000e+00 : f32
    %728 = vector.broadcast %cst_420 : f32 to vector<1x32xf32>
    %cst_421 = arith.constant 0.000000e+00 : f32
    %729 = vector.broadcast %cst_421 : f32 to vector<1x32xf32>
    %cst_422 = arith.constant dense<0.000000e+00> : vector<1x128xf32>
    %730 = tpu.matmul %634, %723, %cst_422 {dimension_numbers = #tpu.dot_dimension_numbers<[1], [0], [0], [1], [0, 0, 1, 1], [], []>} : vector<1x32xf32>, vector<32x128xf32>, vector<1x128xf32> -> vector<1x128xf32>
    %cst_423 = arith.constant dense<0.000000e+00> : vector<1x128xf32>
    %731 = tpu.matmul %728, %725, %cst_423 {dimension_numbers = #tpu.dot_dimension_numbers<[1], [0], [0], [1], [0, 0, 1, 1], [], []>} : vector<1x32xf32>, vector<32x128xf32>, vector<1x128xf32> -> vector<1x128xf32>
    %732 = arith.addf %730, %731 : vector<1x128xf32>
    %733 = arith.addf %732, %727 : vector<1x128xf32>
    %734 = vector.extract_strided_slice %733 {offsets = [0, 0], sizes = [1, 32], strides = [1, 1]} : vector<1x128xf32> to vector<1x32xf32>
    %735 = arith.negf %734 : vector<1x32xf32>
    %736 = math.exp %735 : vector<1x32xf32>
    %cst_424 = arith.constant 1.000000e+00 : f32
    %737 = vector.broadcast %cst_424 : f32 to vector<1x32xf32>
    %738 = arith.addf %737, %736 : vector<1x32xf32>
    %739 = arith.divf %737, %738 : vector<1x32xf32>
    %740 = vector.extract_strided_slice %733 {offsets = [0, 32], sizes = [1, 32], strides = [1, 1]} : vector<1x128xf32> to vector<1x32xf32>
    %741 = arith.negf %740 : vector<1x32xf32>
    %742 = math.exp %741 : vector<1x32xf32>
    %cst_425 = arith.constant 1.000000e+00 : f32
    %743 = vector.broadcast %cst_425 : f32 to vector<1x32xf32>
    %744 = arith.addf %743, %742 : vector<1x32xf32>
    %745 = arith.divf %743, %744 : vector<1x32xf32>
    %746 = vector.extract_strided_slice %733 {offsets = [0, 64], sizes = [1, 32], strides = [1, 1]} : vector<1x128xf32> to vector<1x32xf32>
    %747 = math.tanh %746 : vector<1x32xf32>
    %748 = vector.extract_strided_slice %733 {offsets = [0, 96], sizes = [1, 32], strides = [1, 1]} : vector<1x128xf32> to vector<1x32xf32>
    %749 = arith.negf %748 : vector<1x32xf32>
    %750 = math.exp %749 : vector<1x32xf32>
    %cst_426 = arith.constant 1.000000e+00 : f32
    %751 = vector.broadcast %cst_426 : f32 to vector<1x32xf32>
    %752 = arith.addf %751, %750 : vector<1x32xf32>
    %753 = arith.divf %751, %752 : vector<1x32xf32>
    %754 = arith.mulf %745, %729 : vector<1x32xf32>
    %755 = arith.mulf %739, %747 : vector<1x32xf32>
    %756 = arith.addf %754, %755 : vector<1x32xf32>
    %757 = math.tanh %756 : vector<1x32xf32>
    %758 = arith.mulf %753, %757 : vector<1x32xf32>
    %cst_427 = arith.constant dense<0.000000e+00> : vector<1x128xf32>
    %759 = tpu.matmul %663, %723, %cst_427 {dimension_numbers = #tpu.dot_dimension_numbers<[1], [0], [0], [1], [0, 0, 1, 1], [], []>} : vector<1x32xf32>, vector<32x128xf32>, vector<1x128xf32> -> vector<1x128xf32>
    %cst_428 = arith.constant dense<0.000000e+00> : vector<1x128xf32>
    %760 = tpu.matmul %758, %725, %cst_428 {dimension_numbers = #tpu.dot_dimension_numbers<[1], [0], [0], [1], [0, 0, 1, 1], [], []>} : vector<1x32xf32>, vector<32x128xf32>, vector<1x128xf32> -> vector<1x128xf32>
    %761 = arith.addf %759, %760 : vector<1x128xf32>
    %762 = arith.addf %761, %727 : vector<1x128xf32>
    %763 = vector.extract_strided_slice %762 {offsets = [0, 0], sizes = [1, 32], strides = [1, 1]} : vector<1x128xf32> to vector<1x32xf32>
    %764 = arith.negf %763 : vector<1x32xf32>
    %765 = math.exp %764 : vector<1x32xf32>
    %cst_429 = arith.constant 1.000000e+00 : f32
    %766 = vector.broadcast %cst_429 : f32 to vector<1x32xf32>
    %767 = arith.addf %766, %765 : vector<1x32xf32>
    %768 = arith.divf %766, %767 : vector<1x32xf32>
    %769 = vector.extract_strided_slice %762 {offsets = [0, 32], sizes = [1, 32], strides = [1, 1]} : vector<1x128xf32> to vector<1x32xf32>
    %770 = arith.negf %769 : vector<1x32xf32>
    %771 = math.exp %770 : vector<1x32xf32>
    %cst_430 = arith.constant 1.000000e+00 : f32
    %772 = vector.broadcast %cst_430 : f32 to vector<1x32xf32>
    %773 = arith.addf %772, %771 : vector<1x32xf32>
    %774 = arith.divf %772, %773 : vector<1x32xf32>
    %775 = vector.extract_strided_slice %762 {offsets = [0, 64], sizes = [1, 32], strides = [1, 1]} : vector<1x128xf32> to vector<1x32xf32>
    %776 = math.tanh %775 : vector<1x32xf32>
    %777 = vector.extract_strided_slice %762 {offsets = [0, 96], sizes = [1, 32], strides = [1, 1]} : vector<1x128xf32> to vector<1x32xf32>
    %778 = arith.negf %777 : vector<1x32xf32>
    %779 = math.exp %778 : vector<1x32xf32>
    %cst_431 = arith.constant 1.000000e+00 : f32
    %780 = vector.broadcast %cst_431 : f32 to vector<1x32xf32>
    %781 = arith.addf %780, %779 : vector<1x32xf32>
    %782 = arith.divf %780, %781 : vector<1x32xf32>
    %783 = arith.mulf %774, %756 : vector<1x32xf32>
    %784 = arith.mulf %768, %776 : vector<1x32xf32>
    %785 = arith.addf %783, %784 : vector<1x32xf32>
    %786 = math.tanh %785 : vector<1x32xf32>
    %787 = arith.mulf %782, %786 : vector<1x32xf32>
    %cst_432 = arith.constant dense<0.000000e+00> : vector<1x128xf32>
    %788 = tpu.matmul %692, %723, %cst_432 {dimension_numbers = #tpu.dot_dimension_numbers<[1], [0], [0], [1], [0, 0, 1, 1], [], []>} : vector<1x32xf32>, vector<32x128xf32>, vector<1x128xf32> -> vector<1x128xf32>
    %cst_433 = arith.constant dense<0.000000e+00> : vector<1x128xf32>
    %789 = tpu.matmul %787, %725, %cst_433 {dimension_numbers = #tpu.dot_dimension_numbers<[1], [0], [0], [1], [0, 0, 1, 1], [], []>} : vector<1x32xf32>, vector<32x128xf32>, vector<1x128xf32> -> vector<1x128xf32>
    %790 = arith.addf %788, %789 : vector<1x128xf32>
    %791 = arith.addf %790, %727 : vector<1x128xf32>
    %792 = vector.extract_strided_slice %791 {offsets = [0, 0], sizes = [1, 32], strides = [1, 1]} : vector<1x128xf32> to vector<1x32xf32>
    %793 = arith.negf %792 : vector<1x32xf32>
    %794 = math.exp %793 : vector<1x32xf32>
    %cst_434 = arith.constant 1.000000e+00 : f32
    %795 = vector.broadcast %cst_434 : f32 to vector<1x32xf32>
    %796 = arith.addf %795, %794 : vector<1x32xf32>
    %797 = arith.divf %795, %796 : vector<1x32xf32>
    %798 = vector.extract_strided_slice %791 {offsets = [0, 32], sizes = [1, 32], strides = [1, 1]} : vector<1x128xf32> to vector<1x32xf32>
    %799 = arith.negf %798 : vector<1x32xf32>
    %800 = math.exp %799 : vector<1x32xf32>
    %cst_435 = arith.constant 1.000000e+00 : f32
    %801 = vector.broadcast %cst_435 : f32 to vector<1x32xf32>
    %802 = arith.addf %801, %800 : vector<1x32xf32>
    %803 = arith.divf %801, %802 : vector<1x32xf32>
    %804 = vector.extract_strided_slice %791 {offsets = [0, 64], sizes = [1, 32], strides = [1, 1]} : vector<1x128xf32> to vector<1x32xf32>
    %805 = math.tanh %804 : vector<1x32xf32>
    %806 = vector.extract_strided_slice %791 {offsets = [0, 96], sizes = [1, 32], strides = [1, 1]} : vector<1x128xf32> to vector<1x32xf32>
    %807 = arith.negf %806 : vector<1x32xf32>
    %808 = math.exp %807 : vector<1x32xf32>
    %cst_436 = arith.constant 1.000000e+00 : f32
    %809 = vector.broadcast %cst_436 : f32 to vector<1x32xf32>
    %810 = arith.addf %809, %808 : vector<1x32xf32>
    %811 = arith.divf %809, %810 : vector<1x32xf32>
    %812 = arith.mulf %803, %785 : vector<1x32xf32>
    %813 = arith.mulf %797, %805 : vector<1x32xf32>
    %814 = arith.addf %812, %813 : vector<1x32xf32>
    %815 = math.tanh %814 : vector<1x32xf32>
    %816 = arith.mulf %811, %815 : vector<1x32xf32>
    %cst_437 = arith.constant dense<0.000000e+00> : vector<1x128xf32>
    %817 = tpu.matmul %721, %723, %cst_437 {dimension_numbers = #tpu.dot_dimension_numbers<[1], [0], [0], [1], [0, 0, 1, 1], [], []>} : vector<1x32xf32>, vector<32x128xf32>, vector<1x128xf32> -> vector<1x128xf32>
    %cst_438 = arith.constant dense<0.000000e+00> : vector<1x128xf32>
    %818 = tpu.matmul %816, %725, %cst_438 {dimension_numbers = #tpu.dot_dimension_numbers<[1], [0], [0], [1], [0, 0, 1, 1], [], []>} : vector<1x32xf32>, vector<32x128xf32>, vector<1x128xf32> -> vector<1x128xf32>
    %819 = arith.addf %817, %818 : vector<1x128xf32>
    %820 = arith.addf %819, %727 : vector<1x128xf32>
    %821 = vector.extract_strided_slice %820 {offsets = [0, 0], sizes = [1, 32], strides = [1, 1]} : vector<1x128xf32> to vector<1x32xf32>
    %822 = arith.negf %821 : vector<1x32xf32>
    %823 = math.exp %822 : vector<1x32xf32>
    %cst_439 = arith.constant 1.000000e+00 : f32
    %824 = vector.broadcast %cst_439 : f32 to vector<1x32xf32>
    %825 = arith.addf %824, %823 : vector<1x32xf32>
    %826 = arith.divf %824, %825 : vector<1x32xf32>
    %827 = vector.extract_strided_slice %820 {offsets = [0, 32], sizes = [1, 32], strides = [1, 1]} : vector<1x128xf32> to vector<1x32xf32>
    %828 = arith.negf %827 : vector<1x32xf32>
    %829 = math.exp %828 : vector<1x32xf32>
    %cst_440 = arith.constant 1.000000e+00 : f32
    %830 = vector.broadcast %cst_440 : f32 to vector<1x32xf32>
    %831 = arith.addf %830, %829 : vector<1x32xf32>
    %832 = arith.divf %830, %831 : vector<1x32xf32>
    %833 = vector.extract_strided_slice %820 {offsets = [0, 64], sizes = [1, 32], strides = [1, 1]} : vector<1x128xf32> to vector<1x32xf32>
    %834 = math.tanh %833 : vector<1x32xf32>
    %835 = vector.extract_strided_slice %820 {offsets = [0, 96], sizes = [1, 32], strides = [1, 1]} : vector<1x128xf32> to vector<1x32xf32>
    %836 = arith.negf %835 : vector<1x32xf32>
    %837 = math.exp %836 : vector<1x32xf32>
    %cst_441 = arith.constant 1.000000e+00 : f32
    %838 = vector.broadcast %cst_441 : f32 to vector<1x32xf32>
    %839 = arith.addf %838, %837 : vector<1x32xf32>
    %840 = arith.divf %838, %839 : vector<1x32xf32>
    %841 = arith.mulf %832, %814 : vector<1x32xf32>
    %842 = arith.mulf %826, %834 : vector<1x32xf32>
    %843 = arith.addf %841, %842 : vector<1x32xf32>
    %844 = math.tanh %843 : vector<1x32xf32>
    %845 = arith.mulf %840, %844 : vector<1x32xf32>
    %c0_442 = arith.constant 0 : index
    %c0_443 = arith.constant 0 : index
    %846 = vector.load %arg13[%c0_442, %c0_443] : memref<32x1xf32, #tpu.memory_space<vmem>>, vector<32x1xf32>
    %cst_444 = arith.constant dense<0.000000e+00> : vector<1x1xf32>
    %847 = tpu.matmul %845, %846, %cst_444 {dimension_numbers = #tpu.dot_dimension_numbers<[1], [0], [0], [1], [0, 0, 1, 1], [], []>} : vector<1x32xf32>, vector<32x1xf32>, vector<1x1xf32> -> vector<1x1xf32>
    %c0_445 = arith.constant 0 : index
    %c0_446 = arith.constant 0 : index
    %848 = vector.load %arg14[%c0_445, %c0_446] : memref<1x1xf32, #tpu.memory_space<vmem>>, vector<1x1xf32>
    %849 = arith.addf %847, %848 : vector<1x1xf32>
    %850 = arith.negf %849 : vector<1x1xf32>
    %851 = math.exp %850 : vector<1x1xf32>
    %cst_447 = arith.constant 1.000000e+00 : f32
    %852 = vector.broadcast %cst_447 : f32 to vector<1x1xf32>
    %853 = arith.addf %852, %851 : vector<1x1xf32>
    %854 = arith.divf %852, %853 : vector<1x1xf32>
    %c0_448 = arith.constant 0 : index
    %c0_449 = arith.constant 0 : index
    %c0_450 = arith.constant 0 : index
    %855 = vector.load %arg15[%c0_448, %c0_449, %c0_450] : memref<1x1x1xf32, #tpu.memory_space<vmem>>, vector<1x1x1xf32>
    %856 = vector.shape_cast %855 : vector<1x1x1xf32> to vector<1x1xf32>
    %857 = vector.shape_cast %854 : vector<1x1xf32> to vector<1x1x1xf32>
    tpu.vector_store %arg15[%c0_448, %c0_449, %c0_450], %857 {strides = array<i32>} : memref<1x1x1xf32, #tpu.memory_space<vmem>>, vector<1x1x1xf32>,
    return
  }
  func.func @transform_0(%arg0: i32) -> (i32, i32, i32) {
    %c0_i32 = arith.constant 0 : i32
    %c0_i32_0 = arith.constant 0 : i32
    %c0_i32_1 = arith.constant 0 : i32
    return %arg0, %c0_i32, %c0_i32_0 : i32, i32, i32
  }
  func.func @transform_1(%arg0: i32) -> (i32, i32, i32) {
    %c0_i32 = arith.constant 0 : i32
    %c0_i32_0 = arith.constant 0 : i32
    %c0_i32_1 = arith.constant 0 : i32
    return %arg0, %c0_i32, %c0_i32_0 : i32, i32, i32
  }
  func.func @transform_2(%arg0: i32) -> (i32, i32, i32) {
    %c0_i32 = arith.constant 0 : i32
    %c0_i32_0 = arith.constant 0 : i32
    %c0_i32_1 = arith.constant 0 : i32
    return %arg0, %c0_i32, %c0_i32_0 : i32, i32, i32
  }
  func.func @transform_3(%arg0: i32) -> (i32, i32, i32, i32) {
    %c0_i32 = arith.constant 0 : i32
    %c0_i32_0 = arith.constant 0 : i32
    %c0_i32_1 = arith.constant 0 : i32
    %c0_i32_2 = arith.constant 0 : i32
    %c0_i32_3 = arith.constant 0 : i32
    return %c0_i32, %c0_i32_0, %c0_i32_1, %c0_i32_2 : i32, i32, i32, i32
  }
  func.func @transform_4(%arg0: i32) -> (i32, i32, i32, i32) {
    %c0_i32 = arith.constant 0 : i32
    %c0_i32_0 = arith.constant 0 : i32
    %c0_i32_1 = arith.constant 0 : i32
    %c0_i32_2 = arith.constant 0 : i32
    %c0_i32_3 = arith.constant 0 : i32
    return %c0_i32, %c0_i32_0, %c0_i32_1, %c0_i32_2 : i32, i32, i32, i32
  }
  func.func @transform_5(%arg0: i32) -> (i32, i32, i32, i32) {
    %c0_i32 = arith.constant 0 : i32
    %c0_i32_0 = arith.constant 0 : i32
    %c0_i32_1 = arith.constant 0 : i32
    %c0_i32_2 = arith.constant 0 : i32
    %c0_i32_3 = arith.constant 0 : i32
    return %c0_i32, %c0_i32_0, %c0_i32_1, %c0_i32_2 : i32, i32, i32, i32
  }
  func.func @transform_6(%arg0: i32) -> (i32, i32, i32, i32) {
    %c0_i32 = arith.constant 0 : i32
    %c0_i32_0 = arith.constant 0 : i32
    %c0_i32_1 = arith.constant 0 : i32
    %c0_i32_2 = arith.constant 0 : i32
    %c0_i32_3 = arith.constant 0 : i32
    return %c0_i32, %c0_i32_0, %c0_i32_1, %c0_i32_2 : i32, i32, i32, i32
  }
  func.func @transform_7(%arg0: i32) -> (i32, i32, i32) {
    %c0_i32 = arith.constant 0 : i32
    %c0_i32_0 = arith.constant 0 : i32
    %c0_i32_1 = arith.constant 0 : i32
    %c0_i32_2 = arith.constant 0 : i32
    return %c0_i32, %c0_i32_0, %c0_i32_1 : i32, i32, i32
  }
  func.func @transform_8(%arg0: i32) -> (i32, i32, i32) {
    %c0_i32 = arith.constant 0 : i32
    %c0_i32_0 = arith.constant 0 : i32
    %c0_i32_1 = arith.constant 0 : i32
    %c0_i32_2 = arith.constant 0 : i32
    return %c0_i32, %c0_i32_0, %c0_i32_1 : i32, i32, i32
  }
  func.func @transform_9(%arg0: i32) -> (i32, i32, i32) {
    %c0_i32 = arith.constant 0 : i32
    %c0_i32_0 = arith.constant 0 : i32
    %c0_i32_1 = arith.constant 0 : i32
    %c0_i32_2 = arith.constant 0 : i32
    return %c0_i32, %c0_i32_0, %c0_i32_1 : i32, i32, i32
  }
  func.func @transform_10(%arg0: i32) -> (i32, i32, i32) {
    %c0_i32 = arith.constant 0 : i32
    %c0_i32_0 = arith.constant 0 : i32
    %c0_i32_1 = arith.constant 0 : i32
    %c0_i32_2 = arith.constant 0 : i32
    return %c0_i32, %c0_i32_0, %c0_i32_1 : i32, i32, i32
  }
  func.func @transform_11(%arg0: i32) -> (i32, i32, i32) {
    %c0_i32 = arith.constant 0 : i32
    %c0_i32_0 = arith.constant 0 : i32
    %c0_i32_1 = arith.constant 0 : i32
    %c0_i32_2 = arith.constant 0 : i32
    return %c0_i32, %c0_i32_0, %c0_i32_1 : i32, i32, i32
  }
  func.func @transform_12(%arg0: i32) -> (i32, i32) {
    %c0_i32 = arith.constant 0 : i32
    %c0_i32_0 = arith.constant 0 : i32
    %c0_i32_1 = arith.constant 0 : i32
    return %c0_i32, %c0_i32_0 : i32, i32
  }
  func.func @transform_13(%arg0: i32) -> (i32, i32) {
    %c0_i32 = arith.constant 0 : i32
    %c0_i32_0 = arith.constant 0 : i32
    %c0_i32_1 = arith.constant 0 : i32
    return %c0_i32, %c0_i32_0 : i32, i32
  }
  func.func @transform_14(%arg0: i32) -> (i32, i32, i32) {
    %c0_i32 = arith.constant 0 : i32
    %c0_i32_0 = arith.constant 0 : i32
    %c0_i32_1 = arith.constant 0 : i32
    return %arg0, %c0_i32, %c0_i32_0 : i32, i32, i32
  }
}

</mosaic_0001>

<bundles_post_ra>
// kernel: gat3_names_lstm_forward.1
= control target key start
LH: loop header
LB: loop body
LE: loop exit
PB: predicated region body
PF: predicated region fallthrough
CT: control target
= control target key end

     0   :  { %s9381_s0 = inlined_call_operand.vmem [shape: f32[2,16,24], index: 0, kind: input, shape index: {}]   ;;  %s9382_s1 = inlined_call_operand.vmem [shape: f32[2,16,8], index: 1, kind: input, shape index: {}]   ;;  %s9383_s2 = inlined_call_operand.vmem [shape: f32[2,16,16], index: 2, kind: input, shape index: {}]   ;;  %s9384_s3 = inlined_call_operand.hbm [shape: f32[3,4,32,32], index: 3, kind: input, shape index: {}]   ;;  %s9385_s4 = inlined_call_operand.hbm [shape: f32[3,4,1,32], index: 4, kind: input, shape index: {}]   ;;  %s9386_s5 = inlined_call_operand.hbm [shape: f32[3,4,1,32], index: 5, kind: input, shape index: {}]   ;;  %s9387_s6 = inlined_call_operand.hbm [shape: f32[3,4,1,32], index: 6, kind: input, shape index: {}]   ;;  %s9388_s7 = inlined_call_operand.hbm [shape: f32[4,1,32], index: 7, kind: input, shape index: {}]   ;;  %s9389_s8 = inlined_call_operand.vmem [shape: f32[4,1,1], index: 8, kind: input, shape index: {}]   ;;  %s9390_s9 = inlined_call_operand.vmem [shape: f32[2,32,128], index: 9, kind: input, shape index: {}]   ;;  %s9391_s10 = inlined_call_operand.hbm [shape: f32[2,32,128], index: 10, kind: input, shape index: {}]   ;;  %s9392_s11 = inlined_call_operand.vmem [shape: f32[2,1,128], index: 11, kind: input, shape index: {}]   ;;  %s9393_s12 = inlined_call_operand.vmem [shape: f32[32,1], index: 12, kind: input, shape index: {}]   ;;  %s9394_s13 = inlined_call_operand.<no memory space> [shape: f32[1,1], index: 13, kind: input, shape index: {}]   ;;  %s9395_s14 = inlined_call_operand.vmem [shape: f32[2,1,1], index: 14, kind: output, shape index: {}]  }
   0x1   :  { %9405 = sst [smem:[#allocation19_spill]] %s9395_s14  ;;  %v19_v0 = vstv %s9394_s13 }
   0x2   :  { %20 = vst [vmem:[#allocation3] sm:$0x1] %v19_v0 }
   0x3   :  { %21 = vsyncpa [#allocation5], 0 }
   0x4   :  { %22 = vsyncpa [#allocation7], 0 }
   0x5   :  { %23 = vsyncpa [#allocation10], 0 }
   0x6   :  { %24 = vsyncpa [#allocation13], 0  ;;  %s8436_s15 = smov 0  }
   0x7 LB: > { %9406 = sst [smem:[#allocation18_spill]] %s8339_s15  ;;  %s8341_s16 = smov [#allocation6]   ;;  %s8339_s15 = sphi %s8436_s15, %s30_s15  }
   0x8   : > { %s395_s17 = sshll.u32 %s8341_s16, 4  ;;  %s8442_s18 = sadd.s32 4294967295, %s8339_s15   ;;  %s8447_s17 = int_to_ptr.vmem [resolvable:$true] %s395_s17 }
   0x9   : > { %p6703_p0 = scmp.ge.s32.totalorder %s8339_s15, 1  ;;  %p370_p1 = scmp.lt.s32.totalorder %s8339_s15, 3 }
   0xa   : > { %p9401_p2 = scmp.eq.s32.totalorder %s8442_s18, 0  ;;  %s8342_s19 = smov [#allocation9]  }
   0xb   : > { %p8449_p3 = pnand %p6703_p0, %p370_p1  ;;  %s421_s20 = sshll.u32 %s8342_s19, 4  ;;  %s8455_s20 = int_to_ptr.vmem [resolvable:$true] %s421_s20 }
   0xc   : > { %s8343_s22 = smov [#allocation4]   ;;  %s8149_s26 = scalar_lea.hbm %s9385_s4, 192 }
   0xd   : > { %s9407_s13 = scalar_select %p8449_p3, 1, 0 }
   0xe   : > { %p7925_p4 = pneg %p8449_p3  ;;  %s382_s23 = sshll.u32 %s8343_s22, 4  ;;  %s8463_s23 = int_to_ptr.vmem [resolvable:$true] %s382_s23 }
   0xf   : > { %p8150_p6 = scmp.ne.s32.totalorder %s9385_s4, %s8149_s26  ;;  %p8156_p10 = scmp.lt.u32.totalorder %s8149_s26, %s9385_s4 }
  0x10   : > { %p8459_p5 = pnand %p9401_p2, %p7925_p4 }
  0x12   : > { %p8473_p7 = pneg %p8459_p5 }
  0x14   : > { %p8152_p8 = pnand %p8473_p7, %p8150_p6 }
  0x16   : > { %p8153_p9 = pneg %p8152_p8 }
  0x18   : > { %p8158_p11 = pnand %p8156_p10, %p8153_p9 }
  0x1a   : > { %8161 = shalt.err (!%p8158_p11)
}
  0x1b   : > { %s8162_s19 = scalar_lea.vmem %s8447_s17, 192  ;;  %p8170_p1 = scmp.lt.s32.totalorder %s8447_s17, %s8447_s17 }
  0x1c   : > { %p8163_p12 = scmp.ne.s32.totalorder %s8447_s17, %s8162_s19  ;;  %p8171_p4 = scmp.lt.s32.totalorder %s8162_s19, %s8162_s19 }
  0x1e   : > { %p8165_p13 = pnand %p8163_p12, %p8473_p7  ;;  %p8172_p6 = por %p8171_p4, %p8170_p1 }
  0x20   : > { %p8166_p0 = pneg %p8165_p13 }
  0x22   : > { %p8173_p8 = pnand %p8172_p6, %p8166_p0 }
  0x24   : > { %8176 = shalt.err (!%p8173_p8)
}
  0x25   : > { %s9397_s22 = smov 16   ;;  %s9399_s24 = smov 1  }
  0x26   : > { %7931 = dma.hbm_to_vmem [thread:$0]  (!%p8459_p5), %s9385_s4, 192, %s8447_s17, [#allocation7], %s9397_s22, %s9397_s22, %s9399_s24  }
  0x27   : > { %s8177_s30 = scalar_lea.hbm %s9387_s6, 192 }
  0x28   : > { %p8178_p9 = scmp.ne.s32.totalorder %s9387_s6, %s8177_s30  ;;  %p8184_p12 = scmp.lt.u32.totalorder %s8177_s30, %s9387_s6 }
  0x2a   : > { %p8180_p10 = pnand %p8178_p9, %p8473_p7 }
  0x2c   : > { %p8181_p11 = pneg %p8180_p10 }
  0x2e   : > { %p8186_p13 = pnand %p8184_p12, %p8181_p11 }
  0x30   : > { %8189 = shalt.err (!%p8186_p13)
}
  0x31   : > { %s8190_s17 = scalar_lea.vmem %s8455_s20, 192  ;;  %p8198_p6 = scmp.lt.s32.totalorder %s8455_s20, %s8455_s20 }
  0x32   : > { %p8191_p0 = scmp.ne.s32.totalorder %s8455_s20, %s8190_s17  ;;  %p8199_p8 = scmp.lt.s32.totalorder %s8190_s17, %s8190_s17 }
  0x34   : > { %p8193_p1 = pnand %p8191_p0, %p8473_p7  ;;  %p8200_p9 = por %p8199_p8, %p8198_p6 }
  0x36   : > { %p8194_p4 = pneg %p8193_p1 }
  0x38   : > { %p8201_p10 = pnand %p8200_p9, %p8194_p4 }
  0x3a   : > { %8204 = shalt.err (!%p8201_p10)
}
  0x3b   : > { %7937 = dma.hbm_to_vmem [thread:$0]  (!%p8459_p5), %s9387_s6, 192, %s8455_s20, [#allocation10], %s9397_s22, %s9397_s22, %s9399_s24  }
  0x3c   : > { %s8205_s27 = scalar_lea.hbm %s9384_s3, 6144 }
  0x3d   : > { %p8206_p11 = scmp.ne.s32.totalorder %s9384_s3, %s8205_s27  ;;  %p8212_p0 = scmp.lt.u32.totalorder %s8205_s27, %s9384_s3 }
  0x3f   : > { %p8208_p12 = pnand %p8206_p11, %p8473_p7 }
  0x41   : > { %p8209_p13 = pneg %p8208_p12 }
  0x43   : > { %p8214_p1 = pnand %p8212_p0, %p8209_p13 }
  0x45   : > { %8217 = shalt.err (!%p8214_p1)
}
  0x46   : > { %s8218_s20 = scalar_lea.vmem %s8463_s23, 6144  ;;  %p8226_p9 = scmp.lt.s32.totalorder %s8463_s23, %s8463_s23 }
  0x47   : > { %p8219_p4 = scmp.ne.s32.totalorder %s8463_s23, %s8218_s20  ;;  %p8227_p10 = scmp.lt.s32.totalorder %s8218_s20, %s8218_s20 }
  0x49   : > { %p8221_p6 = pnand %p8219_p4, %p8473_p7  ;;  %p8228_p11 = por %p8227_p10, %p8226_p9 }
  0x4b   : > { %p8222_p8 = pneg %p8221_p6 }
  0x4d   : > { %p8229_p12 = pnand %p8228_p11, %p8222_p8 }
  0x4f   : > { %8232 = shalt.err (!%p8229_p12)
}
  0x50   : > { %s9403_s17 = smov 128   ;;  %s9404_s14 = smov 8  }
  0x51   : > { %7928 = dma.hbm_to_vmem [thread:$0]  (!%p8459_p5), %s9384_s3, 6144, %s8463_s23, [#allocation5], %s9403_s17, %s9403_s17, %s9404_s14  }
  0x52   : > { %s8348_s26 = smov [#allocation8]   ;;  %s8349_s28 = smov [#allocation11]  }
  0x53   : > { %s408_s27 = sshll.u32 %s8348_s26, 4  ;;  %s434_s30 = sshll.u32 %s8349_s28, 4  ;;  %s409_s27 = int_to_ptr.vmem [resolvable:$true] %s408_s27  ;;  %s8549_s30 = int_to_ptr.vmem [resolvable:$true] %s434_s30 }
  0x54   : > { %s8233_s20 = scalar_lea.hbm %s9386_s5, 192 }
  0x55   : > { %p8234_p13 = scmp.ne.s32.totalorder %s9386_s5, %s8233_s20  ;;  %p8240_p4 = scmp.lt.u32.totalorder %s8233_s20, %s9386_s5 }
  0x57   : > { %p8236_p0 = pnand %p8234_p13, %p8473_p7 }
  0x59   : > { %p8237_p1 = pneg %p8236_p0 }
  0x5b   : > { %p8242_p6 = pnand %p8240_p4, %p8237_p1 }
  0x5d   : > { %8245 = shalt.err (!%p8242_p6)
}
  0x5e   : > { %s8246_s25 = scalar_lea.vmem %s409_s27, 192  ;;  %p8254_p11 = scmp.lt.s32.totalorder %s409_s27, %s409_s27 }
  0x5f   : > { %p8247_p8 = scmp.ne.s32.totalorder %s409_s27, %s8246_s25  ;;  %p8255_p12 = scmp.lt.s32.totalorder %s8246_s25, %s8246_s25 }
  0x61   : > { %p8249_p9 = pnand %p8247_p8, %p8473_p7  ;;  %p8256_p2 = por %p8255_p12, %p8254_p11 }
  0x63   : > { %p8250_p10 = pneg %p8249_p9 }
  0x65   : > { %p8257_p3 = pnand %p8256_p2, %p8250_p10 }
  0x67   : > { %8260 = shalt.err (!%p8257_p3)
}
  0x68   : > { %s9410_s22 = smov 1   ;;  %s9411_s24 = smov 16  }
  0x69   : > { %7934 = dma.hbm_to_vmem [thread:$0]  (!%p8459_p5), %s9386_s5, 192, %s409_s27, [#allocation7], %s9411_s24, %s9411_s24, %s9410_s22  }
  0x6a   : > { %s8261_s20 = scalar_lea.hbm %s9388_s7, 64 }
  0x6b   : > { %p8262_p13 = scmp.ne.s32.totalorder %s9388_s7, %s8261_s20  ;;  %p8268_p0 = scmp.lt.u32.totalorder %s8261_s20, %s9388_s7 }
  0x6d   : > { %p8264_p2 = pnand %p8262_p13, %p8473_p7 }
  0x6f   : > { %p8265_p3 = pneg %p8264_p2 }
  0x71   : > { %p8270_p1 = pnand %p8268_p0, %p8265_p3 }
  0x73   : > { %8273 = shalt.err (!%p8270_p1)
}
  0x74   : > { %s8274_s27 = scalar_lea.vmem %s8549_s30, 64  ;;  %p8282_p9 = scmp.lt.s32.totalorder %s8549_s30, %s8549_s30 }
  0x75   : > { %p8275_p4 = scmp.ne.s32.totalorder %s8549_s30, %s8274_s27  ;;  %p8283_p10 = scmp.lt.s32.totalorder %s8274_s27, %s8274_s27 }
  0x77   : > { %p8277_p6 = pnand %p8275_p4, %p8473_p7  ;;  %p8284_p11 = por %p8283_p10, %p8282_p9 }
  0x79   : > { %p8278_p8 = pneg %p8277_p6 }
  0x7b   : > { %p8285_p12 = pnand %p8284_p11, %p8278_p8 }
  0x7d   : > { %8288 = shalt.err (!%p8285_p12)
}
  0x7e   : > { %7940 = dma.hbm_to_vmem [thread:$0]  (!%p8459_p5), %s9388_s7, 64, %s8549_s30, [#allocation10], %s9411_s24, %s9411_s24, %s9410_s22  }
  0x7f   : > { %s8350_s28 = smov [#allocation12]   ;;  %s8289_s15 = scalar_lea.hbm %s9391_s10, 1024 }
  0x80   : > { %s453_s16 = sshll.u32 %s8350_s28, 4  ;;  %p8290_p13 = scmp.ne.s32.totalorder %s9391_s10, %s8289_s15  ;;  %s454_s16 = int_to_ptr.vmem [resolvable:$true] %s453_s16 }
  0x81   : > { %p8296_p0 = scmp.lt.u32.totalorder %s8289_s15, %s9391_s10 }
  0x82   : > { %p8292_p2 = pnand %p8290_p13, %p8473_p7 }
  0x84   : > { %p8293_p3 = pneg %p8292_p2 }
  0x86   : > { %p8298_p1 = pnand %p8296_p0, %p8293_p3 }
  0x88   : > { %8301 = shalt.err (!%p8298_p1)
}
  0x89   : > { %s8302_s30 = scalar_lea.vmem %s454_s16, 1024  ;;  %p8310_p9 = scmp.lt.s32.totalorder %s454_s16, %s454_s16 }
  0x8a   : > { %p8303_p4 = scmp.ne.s32.totalorder %s454_s16, %s8302_s30  ;;  %p8311_p10 = scmp.lt.s32.totalorder %s8302_s30, %s8302_s30 }
  0x8c   : > { %p8305_p6 = pnand %p8303_p4, %p8473_p7  ;;  %p8312_p11 = por %p8311_p10, %p8310_p9 }
  0x8e   : > { %p8306_p8 = pneg %p8305_p6 }
  0x90   : > { %p8313_p12 = pnand %p8312_p11, %p8306_p8 }
  0x92   : > { %8316 = shalt.err (!%p8313_p12)
}
  0x93   : > { %s9412_s22 = smov 8   ;;  %s9413_s24 = smov 128  }
  0x94   : > { %7943 = dma.hbm_to_vmem [thread:$0]  (!%p8459_p5), %s9391_s10, 1024, %s454_s16, [#allocation13], %s9413_s24, %s9413_s24, %s9412_s22  }
  0x95   : > { %p9414_p13 = scmp.ne.s32.totalorder %s9407_s13, 0 }
  0x96   : > { %p9415_p7 = scmp.eq.s32.totalorder (!%p9414_p13), %s8442_s18, 0 }
  0x97   : > { %502 = sbr.rel (%p9414_p13) target bundleno = 11883 (0x2e6b), region = 76 }
  0x9e   : > { %8322 = dma.done.wait (%p9415_p7), [#allocation5], 6144   ;;  %p9416_p2 = pmov %p9415_p7 }
  0xa0   : > { %8324 = vsyncadd (%p9416_p2), [#allocation5], 4294961152  ;;  %p9417_p3 = pmov %p9416_p2 }
  0xa1   : > { %p9418_p0 = pmov %p9416_p2 }
  0xa2   : > { %8326 = dma.done.wait (%p9417_p3), [#allocation7], 384  }
  0xa3   : > { %8328 = vsyncadd (%p9418_p0), [#allocation7], 4294966912  ;;  %p9419_p1 = pmov %p9418_p0 }
  0xa4   : > { %p9420_p5 = pmov %p9418_p0 }
  0xa5   : > { %8330 = dma.done.wait (%p9419_p1), [#allocation10], 256  }
  0xa6   : > { %8332 = vsyncadd (%p9420_p5), [#allocation10], 4294967040  ;;  %p9421_p4 = pmov %p9418_p0 }
  0xa7   : > { %p9422_p6 = pmov %p9418_p0 }
  0xa8   : > { %8334 = dma.done.wait (%p9421_p4), [#allocation13], 1024  }
  0xa9   : > { %8336 = vsyncadd (%p9422_p6), [#allocation13], 4294966272  ;;  %p576_p8 = scmp.lt.s32.totalorder %s8442_s18, 1  ;;  %vm596_vm0 = vcmask 195584   ;;  %s8351_s20 = smov 24   ;;  %v696_v5 = vld [vmem:[#allocation4] sm:$0xff]  ;;  %v876_v27 = vlaneseq }
  0xaa   : > { %v697_v6 = vld [vmem:[#allocation4 + $0x8] sm:$0xff]  ;;  %v698_v7 = vld [vmem:[#allocation4 + $0x10] sm:$0xff]  ;;  %v699_v9 = vld [vmem:[#allocation4 + $0x18] sm:$0xff]  ;;  %vm609_vm1 = vcmask 261312   ;;  %vm632_vm2 = vcmask 261120   ;;  %v8352_v15 = vmov 0.0|0.0  }
  0xab   : > { %s9428_s18 = smov (!%p576_p8, %s8442_s18), 1  ;;  %v7607_v8 = vpack.c.bf16 %v697_v6, %v696_v5  ;;  %v7611_v10 = vpack.c.bf16 %v699_v9, %v698_v7  ;;  %7615 = vmatprep.subr.bf16.mxu1 %v8352_v15  ;;  %vm8353_vm3 = vmmov 0   ;;  %v8354_v16 = vmov 0.0   ;;  %v6730_v17 = vld [vmem:[#allocation6] ss:$0 sm:$0xff]  ;;  %vm8668_vm4 = vmpackc.low %vm632_vm2, %vm632_vm2  ;;  %s9425_s29 = sld [smem:[#allocation19_spill]] }
  0xac   : > { %s8642_s13 = sshll.u32 %s9428_s18, 4  ;;  %7135 = vmatprep.mubr.msk.f32.mxu1 %vm8353_vm3, %v8354_v16  ;;  %v782_v26 = vld [vmem:[#allocation8] sm:$0x1]  ;;  %v877_v28 = vshrl.u32 %v876_v27, 7  ;;  %vm890_vm9 = vcmask 130048  }
  0xad   : > { %s580_s26 = scalar_lea.vmem %s9381_s0, %s8642_s13  ;;  %s585_s19 = scalar_lea.vmem %s9382_s1, %s8642_s13  ;;  %7608 = vmatprep.subr.bf16.mxu0 %v7607_v8 }
  0xae   : > { %v599_v1 = vld [vmem:[%s585_s19] sm:$0xff]  ;;  %v595_v3 = vld [vmem:[%s580_s26 + $0x8] sm:$0xff]  ;;  %7610 = vmatpush3.bf16.msra.mxu0 %v7607_v8  ;;  %v8677_v30 = vsub.s32 0, %v877_v28  ;;  %s590_s25 = scalar_lea.vmem %s9383_s2, %s8642_s13  ;;  %v6739_v28 = vld [vmem:[#allocation6 + $0x1] ss:$0 sm:$0xff] }
  0xaf   : > { %603 = vrot.lane.b32.xlu0 %v599_v1, %s8351_s20  ;;  %v594_v2 = vld [vmem:[%s580_s26] sm:$0xff]  ;;  %v600_v4 = vld [vmem:[%s585_s19 + $0x8] sm:$0xff]  ;;  %598 = vst.msk [vmem:[#allocation2 + $0x8] sm:$0xff] %vm596_vm0, %v595_v3  ;;  %7612 = vmatprep.subr.bf16.mxu0 %v7611_v10  ;;  %s8356_s19 = smov 64  }
  0xb0   : > { %597 = vst.msk [vmem:[#allocation2] sm:$0xff] %vm596_vm0, %v594_v2  ;;  %v8683_v32 = vld [vmem:[%s590_s25] sm:$0xff]  ;;  %v8685_v33 = vld [vmem:[%s590_s25 + $0x8] sm:$0xff] }
  0xb1   : > { %vm616_vm5 = vcmp.gt.f32.partialorder %v8683_v32, 0.0  ;;  %vm617_vm6 = vcmp.gt.f32.partialorder %v8685_v33, 0.0 }
  0xb2   : > { %7614 = vmatpush3.bf16.msra.mxu0 %v7611_v10  ;;  %v8699_v58 = vsel %vm616_vm5, 1.0, %v8354_v16  ;;  %v8704_v59 = vsel %vm617_vm6, 1.0, %v8354_v16 }
  0xb3   : > { %605 = vrot.lane.b32.xlu0 %v600_v4, %s8351_s20  ;;  %7631 = vmatprep.subr.bf16.mxu0 %v8352_v15  ;;  %s8357_s20 = smov 32  }
 0x121   : > { %v604_v11 = vpop.permute.xlu0 %603 }
 0x122   : > { %610 = vst.msk [vmem:[#allocation2] sm:$0xff] %vm609_vm1, %v604_v11 }
 0x125   : > { %v606_v12 = vpop.permute.xlu0 %605 }
 0x126   : > { %611 = vst.msk [vmem:[#allocation2 + $0x8] sm:$0xff] %vm609_vm1, %v606_v12  ;;  %v1046_v12 = vld [vmem:[#allocation4 + $0x20] sm:$0xff] }
 0x129   : > { %v8652_v13 = vld [vmem:[#allocation2] sm:$0xff] }
 0x12a   : > { %7128 = vmatprep.mubr.msk.f32.mxu0 %vm632_vm2, %v8652_v13 }
 0x12d   : > { %v8656_v14 = vld [vmem:[#allocation2 + $0x8] sm:$0xff] }
 0x12e   : > { %7129 = vmatmul.mubr.msk.f32.vlgmr.msra.gmra.mrb[0].mxu0 %vm632_vm2, %v8656_v14 }
 0x12f   : > { %7160 = vmatprep.mubr.msk.f32.mxu0 %vm8353_vm3, %v8354_v16 }
 0x201   : > { %v7130_v18 = vpop.f32.mrb[0].mxu0 }
 0x202   : > { %v772_v19 = vpop.f32.mrb[1].mxu0  ;;  %v790_v23 = vmul.f32 %v7130_v18, %v6730_v17 }
 0x203   : > { %v7616_v21 = vpack.c.bf16 %v7130_v18, %v772_v19  ;;  %v789_v22 = vmul.f32 %v6730_v17, %v772_v19  ;;  %v1047_v17 = vld [vmem:[#allocation4 + $0x28] sm:$0xff] }
 0x204   : > { %v794_v25 = vsel %vm632_vm2, %v790_v23, 0.0  ;;  %v7623_v19 = vpack.c.bf16 %v1047_v17, %v1046_v12  ;;  %v1049_v23 = vld [vmem:[#allocation4 + $0x38] sm:$0xff] }
 0x205   : > { %7618 = vmatpush3.bf16.xpose.msk.msra.mxu1 %vm8668_vm4, %v7616_v21  ;;  %v791_v24 = vsel %vm632_vm2, %v789_v22, 0.0  ;;  %v1048_v22 = vld [vmem:[#allocation4 + $0x30] sm:$0xff] }
 0x206   : > { %7620 = vmatprep.subr.bf16.mxu1 %v7616_v21  ;;  %792 = vadd.xlane.f32.xlu1 %v791_v24  ;;  %v7627_v24 = vpack.c.bf16 %v1049_v23, %v1048_v22 }
 0x20a   : > { %795 = vadd.xlane.f32.xlu1 %v794_v25 }
 0x20c   : > { %7136 = vmatmul.mubr.msk.f32.vlgmr.msra.gmra.mrb[0].mxu1 %vm632_vm2, %v782_v26 }
 0x20d   : > { %7622 = vmatpush3.bf16.msra.mxu1 %v7616_v21 }
 0x20e   : > { %7624 = vmatprep.subr.bf16.mxu1 %v7623_v19 }
 0x293   : > { %v793_v29 = vpop.xlane.xlu1 %792 }
 0x297   : > { %v796_v36 = vpop.xlane.xlu1 %795 }
 0x2df   : > { %v872_v31 = vpop.f32.mrb[0].mxu1 }
 0x2e0   : > { %v879_v34 = vrot.slane %v872_v31, %v8677_v30  ;;  %v7137_v35 = vpop.f32.mrb[1].mxu1  ;;  %v1393_v31 = vld [vmem:[#allocation4 + $0x48] sm:$0xff] }
 0x2e2   : > { %v880_v37 = vadd.f32 %v879_v34, %v793_v29  ;;  %v881_v38 = vadd.f32 %v879_v34, %v796_v36  ;;  %v1392_v29 = vld [vmem:[#allocation4 + $0x40] sm:$0xff] }
 0x2e4   : > { %vm882_vm7 = vcmp.gt.f32.partialorder %v880_v37, 0.0  ;;  %vm883_vm8 = vcmp.gt.f32.partialorder %v881_v38, 0.0  ;;  %v884_v39 = vmul.f32 0.2, %v880_v37  ;;  %v885_v40 = vmul.f32 0.2, %v881_v38 }
 0x2e6   : > { %v886_v41 = vsel %vm882_vm7, %v880_v37, %v884_v39  ;;  %v887_v42 = vsel %vm883_vm8, %v881_v38, %v885_v40  ;;  %v7639_v38 = vpack.c.bf16 %v1393_v31, %v1392_v29 }
 0x2e7   : > { %v888_v43 = vsel %vm616_vm5, %v886_v41, -1e+09  ;;  %v889_v44 = vsel %vm617_vm6, %v887_v42, -1e+09  ;;  %v1394_v41 = vld [vmem:[#allocation4 + $0x50] sm:$0xff]  ;;  %v1395_v42 = vld [vmem:[#allocation4 + $0x58] sm:$0xff] }
 0x2e8   : > { %v891_v45 = vsel %vm890_vm9, %v888_v43, -inf  ;;  %v892_v46 = vsel %vm890_vm9, %v889_v44, -inf }
 0x2e9   : > { %v893_v47 = vmax.f32 %v891_v45, %v892_v46  ;;  %v7643_v45 = vpack.c.bf16 %v1395_v42, %v1394_v41 }
 0x2eb   : > { %v894_v48 = vrot.slane %v893_v47, 4 }
 0x2ed   : > { %v895_v49 = vmax.f32 %v893_v47, %v894_v48 }
 0x2ef   : > { %v896_v50 = vrot.slane %v895_v49, 2 }
 0x2f1   : > { %v897_v51 = vmax.f32 %v895_v49, %v896_v50 }
 0x2f3   : > { %v898_v52 = vrot.slane %v897_v51, 1 }
 0x2f5   : > { %v899_v53 = vmax.f32 %v897_v51, %v898_v52 }
 0x2f7   : > { %v900_v54 = vsub.f32 %v888_v43, %v899_v53  ;;  %v901_v55 = vsub.f32 %v889_v44, %v899_v53  ;;  %v1128_v44 = vld [vmem:[#allocation8 + $0x1] sm:$0x1] }
 0x2f9   : > { %v902_v56 = vmul.f32 1.442695, %v900_v54  ;;  %v904_v57 = vmul.f32 1.442695, %v901_v55  ;;  %v6748_v55 = vld [vmem:[#allocation6 + $0x2] ss:$0 sm:$0xff] }
 0x2fb   : > { %7983 = vpow2.f32 %v902_v56 }
 0x2fc   : > { %7985 = vpow2.f32 %v904_v57 }
 0x305   : > { %v7984_v60 = vpop.eup %7983 }
 0x306   : > { %v7986_v61 = vpop.eup %7985  ;;  %v906_v62 = vmul.f32 %v7984_v60, %v8699_v58 }
 0x307   : > { %v907_v63 = vmul.f32 %v7986_v61, %v8704_v59 }
 0x308   : > { %v908_v0 = vsel %vm890_vm9, %v906_v62, 0.0 }
 0x309   : > { %v909_v1 = vsel %vm890_vm9, %v907_v63, 0.0 }
 0x30a   : > { %v910_v2 = vadd.f32 %v909_v1, %v908_v0 }
 0x30c   : > { %v911_v3 = vrot.slane %v910_v2, 4 }
 0x30e   : > { %v912_v4 = vadd.f32 %v911_v3, %v910_v2 }
 0x310   : > { %v913_v5 = vrot.slane %v912_v4, 2 }
 0x312   : > { %v914_v6 = vadd.f32 %v913_v5, %v912_v4 }
 0x314   : > { %v915_v7 = vrot.slane %v914_v6, 1 }
 0x316   : > { %v916_v8 = vadd.f32 %v915_v7, %v914_v6 }
 0x318   : > { %v917_v9 = vmax.f32 %v916_v8, 1e-30 }
 0x31a   : > { %7987 = vrcp.f32 %v917_v9 }
 0x324   : > { %v7988_v10 = vpop.eup %7987 }
 0x325   : > { %v919_v11 = vmul.f32 %v7988_v10, %v906_v62  ;;  %v920_v18 = vmul.f32 %v7988_v10, %v907_v63 }
 0x327   : > { %928 = vxpose.xlu0.b32.start [1/2] (short) (narrow) %v919_v11, 16 }
 0x32b   : > { %929 = vxpose.xlu0.b32.end [2/2] (short) (narrow) %v920_v18, 16 }
 0x3a7   : > { %v944_v21 = vpop.trf.xlu0 }
 0x3a8   : > { %7142 = vmatprep.mubr.msk.f32.mxu1 %vm890_vm9, %v944_v21 }
 0x3ab   : > { %v945_v25 = vpop.trf.xlu0 }
 0x3ac   : > { %7143 = vmatmul.mubr.msk.f32.vlgmr.msra.gmra.mrb[2].mxu1 %vm890_vm9, %v945_v25 }
 0x3ad   : > { %7626 = vmatpush3.bf16.msra.mxu1 %v7623_v19  ;;  %7153 = vmatprep.mubr.msk.f32.mxu1 %vm632_vm2, %v8652_v13 }
 0x3ae   : > { %7628 = vmatprep.subr.bf16.mxu1 %v7627_v24 }
 0x3b1   : > { %7630 = vmatpush3.bf16.msra.mxu1 %v7627_v24 }
 0x3b4   : > { %7154 = vmatmul.mubr.msk.f32.vlgmr.msra.gmra.mrb[4].mxu1 %vm632_vm2, %v8656_v14 }
 0x47f   : > { %v8716_v26 = vpop.f32.mrb[2].mxu1 }
 0x480   : > { %v8718_v27 = vpop.f32.mrb[3].mxu1 }
 0x487   : > { %v7155_v34 = vpop.f32.mrb[4].mxu1 }
 0x488   : > { %v1116_v35 = vpop.f32.mrb[5].mxu1  ;;  %v1136_v39 = vmul.f32 %v7155_v34, %v6739_v28 }
 0x489   : > { %v1135_v36 = vmul.f32 %v6739_v28, %v1116_v35  ;;  %v7632_v37 = vpack.c.bf16 %v7155_v34, %v1116_v35 }
 0x48a   : > { %v1140_v43 = vsel %vm632_vm2, %v1136_v39, 0.0 }
 0x48b   : > { %7634 = vmatpush3.bf16.xpose.msk.msra.mxu0 %vm8668_vm4, %v7632_v37  ;;  %7636 = vmatprep.subr.bf16.mxu1 %v7632_v37  ;;  %v1137_v40 = vsel %vm632_vm2, %v1135_v36, 0.0 }
 0x48c   : > { %7638 = vmatpush3.bf16.msra.mxu1 %v7632_v37  ;;  %1138 = vadd.xlane.f32.xlu1 %v1137_v40 }
 0x48d   : > { %7640 = vmatprep.subr.bf16.mxu0 %v7639_v38  ;;  %7647 = vmatprep.subr.bf16.mxu1 %v8352_v15 }
 0x490   : > { %1141 = vadd.xlane.f32.xlu1 %v1140_v43 }
 0x492   : > { %7161 = vmatmul.mubr.msk.f32.vlgmr.msra.gmra.mrb[2].mxu0 %vm632_vm2, %v1128_v44 }
 0x493   : > { %7642 = vmatpush3.bf16.msra.mxu0 %v7639_v38  ;;  %7178 = vmatprep.mubr.msk.f32.mxu0 %vm632_vm2, %v8652_v13 }
 0x494   : > { %7644 = vmatprep.subr.bf16.mxu0 %v7643_v45 }
 0x497   : > { %7646 = vmatpush3.bf16.msra.mxu0 %v7643_v45 }
 0x49a   : > { %7179 = vmatmul.mubr.msk.f32.vlgmr.msra.gmra.mrb[4].mxu0 %vm632_vm2, %v8656_v14 }
 0x519   : > { %v1139_v46 = vpop.xlane.xlu1 %1138 }
 0x51d   : > { %v1142_v50 = vpop.xlane.xlu1 %1141 }
 0x565   : > { %v1218_v47 = vpop.f32.mrb[2].mxu0 }
 0x566   : > { %v1225_v48 = vrot.slane %v1218_v47, %v8677_v30  ;;  %v7162_v49 = vpop.f32.mrb[3].mxu0  ;;  %v1739_v47 = vld [vmem:[#allocation4 + $0x68] sm:$0xff] }
 0x568   : > { %v1226_v51 = vadd.f32 %v1225_v48, %v1139_v46  ;;  %v1227_v52 = vadd.f32 %v1225_v48, %v1142_v50  ;;  %v1738_v46 = vld [vmem:[#allocation4 + $0x60] sm:$0xff]  ;;  %v1740_v50 = vld [vmem:[#allocation4 + $0x70] sm:$0xff] }
 0x569   : > { %v7655_v48 = vpack.c.bf16 %v1739_v47, %v1738_v46 }
 0x56a   : > { %vm1228_vm10 = vcmp.gt.f32.partialorder %v1226_v51, 0.0  ;;  %vm1229_vm11 = vcmp.gt.f32.partialorder %v1227_v52, 0.0  ;;  %v1230_v53 = vmul.f32 0.2, %v1226_v51  ;;  %v1231_v54 = vmul.f32 0.2, %v1227_v52 }
 0x56c   : > { %v1232_v56 = vsel %vm1228_vm10, %v1226_v51, %v1230_v53  ;;  %v1233_v57 = vsel %vm1229_vm11, %v1227_v52, %v1231_v54  ;;  %v1741_v51 = vld [vmem:[#allocation4 + $0x78] sm:$0xff]  ;;  %v1474_v52 = vld [vmem:[#allocation8 + $0x2] sm:$0x1] }
 0x56d   : > { %v1234_v60 = vsel %vm616_vm5, %v1232_v56, -1e+09  ;;  %v1235_v61 = vsel %vm617_vm6, %v1233_v57, -1e+09  ;;  %v7180_v62 = vpop.f32.mrb[4].mxu0  ;;  %v7659_v53 = vpack.c.bf16 %v1741_v51, %v1740_v50 }
 0x56e   : > { %v1236_v63 = vsel %vm890_vm9, %v1234_v60, -inf  ;;  %v1237_v0 = vsel %vm890_vm9, %v1235_v61, -inf  ;;  %v1482_v1 = vmul.f32 %v7180_v62, %v6748_v55  ;;  %v1462_v2 = vpop.f32.mrb[5].mxu0  ;;  %v6734_v54 = vld [vmem:[#allocation9] ss:$0 sm:$0xff] }
 0x56f   : > { %v1238_v3 = vmax.f32 %v1236_v63, %v1237_v0  ;;  %v1481_v4 = vmul.f32 %v6748_v55, %v1462_v2  ;;  %v7648_v5 = vpack.c.bf16 %v7180_v62, %v1462_v2  ;;  %v6743_v55 = vld [vmem:[#allocation9 + $0x1] ss:$0 sm:$0xff]  ;;  %v1038_v56 = vadd.f32 %v8716_v26, %v6734_v54 }
 0x570   : > { %v1486_v44 = vsel %vm632_vm2, %v1482_v1, 0.0  ;;  %v1033_v57 = vadd.f32 %v6734_v54, %v8718_v27 }
 0x571   : > { %v1239_v6 = vrot.slane %v1238_v3, 4  ;;  %7652 = vmatprep.subr.bf16.mxu0 %v7648_v5  ;;  %v1483_v7 = vsel %vm632_vm2, %v1481_v4, 0.0  ;;  %v1042_v0 = vmax.f32 %v1038_v56, 0.0 }
 0x572   : > { %7654 = vmatpush3.bf16.msra.mxu0 %v7648_v5  ;;  %1484 = vadd.xlane.f32.xlu0 %v1483_v7  ;;  %v1041_v2 = vmax.f32 %v1033_v57, 0.0 }
 0x573   : > { %v1240_v8 = vmax.f32 %v1238_v3, %v1239_v6  ;;  %7663 = vmatprep.subr.bf16.mxu0 %v8352_v15 }
 0x575   : > { %v1241_v9 = vrot.slane %v1240_v8, 2 }
 0x577   : > { %v1242_v10 = vmax.f32 %v1240_v8, %v1241_v9 }
 0x579   : > { %v1243_v11 = vrot.slane %v1242_v10, 1 }
 0x57b   : > { %v1244_v12 = vmax.f32 %v1242_v10, %v1243_v11 }
 0x57d   : > { %v1245_v17 = vsub.f32 %v1234_v60, %v1244_v12  ;;  %v1246_v18 = vsub.f32 %v1235_v61, %v1244_v12 }
 0x57f   : > { %v1247_v19 = vmul.f32 1.442695, %v1245_v17  ;;  %v1249_v21 = vmul.f32 1.442695, %v1246_v18  ;;  %v6757_v17 = vld [vmem:[#allocation6 + $0x3] ss:$0 sm:$0xff] }
 0x581   : > { %7989 = vpow2.f32 %v1247_v19 }
 0x582   : > { %7991 = vpow2.f32 %v1249_v21 }
 0x58b   : > { %v7990_v22 = vpop.eup %7989 }
 0x58c   : > { %v7992_v23 = vpop.eup %7991  ;;  %v1251_v24 = vmul.f32 %v7990_v22, %v8699_v58 }
 0x58d   : > { %v1252_v25 = vmul.f32 %v7992_v23, %v8704_v59 }
 0x58e   : > { %v1253_v28 = vsel %vm890_vm9, %v1251_v24, 0.0 }
 0x58f   : > { %v1254_v29 = vsel %vm890_vm9, %v1252_v25, 0.0 }
 0x590   : > { %v1255_v31 = vadd.f32 %v1254_v29, %v1253_v28 }
 0x592   : > { %v1256_v34 = vrot.slane %v1255_v31, 4 }
 0x594   : > { %v1257_v35 = vadd.f32 %v1256_v34, %v1255_v31 }
 0x596   : > { %v1258_v36 = vrot.slane %v1257_v35, 2 }
 0x598   : > { %v1259_v37 = vadd.f32 %v1258_v36, %v1257_v35 }
 0x59a   : > { %v1260_v38 = vrot.slane %v1259_v37, 1 }
 0x59c   : > { %v1261_v39 = vadd.f32 %v1260_v38, %v1259_v37 }
 0x59e   : > { %v1262_v40 = vmax.f32 %v1261_v39, 1e-30 }
 0x5a0   : > { %7993 = vrcp.f32 %v1262_v40 }
 0x5aa   : > { %v7994_v41 = vpop.eup %7993 }
 0x5ab   : > { %v1264_v42 = vmul.f32 %v7994_v41, %v1251_v24  ;;  %v1265_v43 = vmul.f32 %v7994_v41, %v1252_v25 }
 0x5ad   : > { %1274 = vxpose.xlu1.b32.start [1/2] (short) (narrow) %v1264_v42, 16 }
 0x5b1   : > { %1275 = vxpose.xlu1.b32.end [2/2] (short) (narrow) %v1265_v43, 16 }
 0x5d8   : > { %1487 = vadd.xlane.f32.xlu1 %v1486_v44 }
 0x5ff   : > { %v1485_v7 = vpop.xlane.xlu0 %1484 }
 0x62d   : > { %v1290_v45 = vpop.trf.xlu1 }
 0x62e   : > { %7167 = vmatprep.mubr.msk.f32.mxu1 %vm890_vm9, %v1290_v45 }
 0x631   : > { %v1291_v49 = vpop.trf.xlu1 }
 0x632   : > { %7168 = vmatmul.mubr.msk.f32.vlgmr.msra.gmra.mrb[6].mxu1 %vm890_vm9, %v1291_v49 }
 0x633   : > { %7650 = vmatpush3.bf16.xpose.msk.msra.mxu1 %vm8668_vm4, %v7648_v5  ;;  %7185 = vmatprep.mubr.msk.f32.mxu1 %vm8353_vm3, %v8354_v16 }
 0x634   : > { %7656 = vmatprep.subr.bf16.mxu1 %v7655_v48 }
 0x63a   : > { %7186 = vmatmul.mubr.msk.f32.vlgmr.msra.gmra.mrb[8].mxu1 %vm632_vm2, %v1474_v52 }
 0x63b   : > { %7658 = vmatpush3.bf16.msra.mxu1 %v7655_v48  ;;  %7203 = vmatprep.mubr.msk.f32.mxu1 %vm632_vm2, %v8652_v13 }
 0x63c   : > { %7660 = vmatprep.subr.bf16.mxu1 %v7659_v53 }
 0x63f   : > { %7662 = vmatpush3.bf16.msra.mxu1 %v7659_v53 }
 0x642   : > { %7204 = vmatmul.mubr.msk.f32.vlgmr.msra.gmra.mrb[10].mxu1 %vm632_vm2, %v8656_v14 }
 0x665   : > { %v1488_v26 = vpop.xlane.xlu1 %1487 }
 0x705   : > { %v7169_v60 = vpop.f32.mrb[6].mxu1 }
 0x706   : > { %v1384_v61 = vadd.f32 %v7169_v60, %v6743_v55  ;;  %v1378_v62 = vpop.f32.mrb[7].mxu1 }
 0x707   : > { %v1379_v63 = vadd.f32 %v6743_v55, %v1378_v62 }
 0x708   : > { %v1388_v1 = vmax.f32 %v1384_v61, 0.0 }
 0x709   : > { %v1387_v3 = vmax.f32 %v1379_v63, 0.0 }
 0x70a   : > { %v8757_v13 = vadd.f32 %v1388_v1, %v1042_v0 }
 0x70b   : > { %v8759_v4 = vadd.f32 %v1387_v3, %v1041_v2  ;;  %v1820_v3 = vld [vmem:[#allocation8 + $0x3] sm:$0x1] }
 0x70d   : > { %v1564_v5 = vpop.f32.mrb[8].mxu1 }
 0x70e   : > { %v1571_v14 = vrot.slane %v1564_v5, %v8677_v30  ;;  %v7187_v6 = vpop.f32.mrb[9].mxu1  ;;  %v6752_v5 = vld [vmem:[#allocation9 + $0x2] ss:$0 sm:$0xff] }
 0x710   : > { %v1572_v8 = vadd.f32 %v1571_v14, %v1485_v7  ;;  %v1573_v27 = vadd.f32 %v1571_v14, %v1488_v26 }
 0x712   : > { %vm1574_vm12 = vcmp.gt.f32.partialorder %v1572_v8, 0.0  ;;  %vm1575_vm13 = vcmp.gt.f32.partialorder %v1573_v27, 0.0  ;;  %v1576_v9 = vmul.f32 0.2, %v1572_v8  ;;  %v1577_v10 = vmul.f32 0.2, %v1573_v27 }
 0x714   : > { %v1578_v11 = vsel %vm1574_vm12, %v1572_v8, %v1576_v9  ;;  %v1579_v12 = vsel %vm1575_vm13, %v1573_v27, %v1577_v10 }
 0x715   : > { %v1580_v18 = vsel %vm616_vm5, %v1578_v11, -1e+09  ;;  %v1581_v19 = vsel %vm617_vm6, %v1579_v12, -1e+09  ;;  %v7205_v21 = vpop.f32.mrb[10].mxu1 }
 0x716   : > { %v1582_v22 = vsel %vm890_vm9, %v1580_v18, -inf  ;;  %v1583_v23 = vsel %vm890_vm9, %v1581_v19, -inf  ;;  %v1808_v24 = vpop.f32.mrb[11].mxu1  ;;  %v1828_v34 = vmul.f32 %v7205_v21, %v6757_v17 }
 0x717   : > { %v1584_v25 = vmax.f32 %v1582_v22, %v1583_v23  ;;  %v1827_v28 = vmul.f32 %v6757_v17, %v1808_v24  ;;  %v7664_v29 = vpack.c.bf16 %v7205_v21, %v1808_v24 }
 0x718   : > { %v1832_v38 = vsel %vm632_vm2, %v1828_v34, 0.0 }
 0x719   : > { %v1585_v31 = vrot.slane %v1584_v25, 4  ;;  %7668 = vmatprep.subr.bf16.mxu1 %v7664_v29  ;;  %v1829_v35 = vsel %vm632_vm2, %v1827_v28, 0.0 }
 0x71a   : > { %7670 = vmatpush3.bf16.msra.mxu1 %v7664_v29  ;;  %1830 = vadd.xlane.f32.xlu1 %v1829_v35 }
 0x71b   : > { %v1586_v36 = vmax.f32 %v1584_v25, %v1585_v31  ;;  %7679 = vmatprep.subr.bf16.mxu1 %v8352_v15 }
 0x71d   : > { %v1587_v37 = vrot.slane %v1586_v36, 2 }
 0x71e   : > { %1833 = vadd.xlane.f32.xlu1 %v1832_v38 }
 0x71f   : > { %v1588_v39 = vmax.f32 %v1586_v36, %v1587_v37 }
 0x721   : > { %v1589_v40 = vrot.slane %v1588_v39, 1 }
 0x723   : > { %v1590_v41 = vmax.f32 %v1588_v39, %v1589_v40 }
 0x725   : > { %v1591_v42 = vsub.f32 %v1580_v18, %v1590_v41  ;;  %v1592_v43 = vsub.f32 %v1581_v19, %v1590_v41 }
 0x727   : > { %v1593_v44 = vmul.f32 1.442695, %v1591_v42  ;;  %v1595_v45 = vmul.f32 1.442695, %v1592_v43 }
 0x729   : > { %7995 = vpow2.f32 %v1593_v44 }
 0x72a   : > { %7997 = vpow2.f32 %v1595_v45 }
 0x733   : > { %v7996_v46 = vpop.eup %7995 }
 0x734   : > { %v7998_v47 = vpop.eup %7997  ;;  %v1597_v48 = vmul.f32 %v7996_v46, %v8699_v58 }
 0x735   : > { %v1598_v49 = vmul.f32 %v7998_v47, %v8704_v59 }
 0x736   : > { %v1599_v50 = vsel %vm890_vm9, %v1597_v48, 0.0 }
 0x737   : > { %v1600_v51 = vsel %vm890_vm9, %v1598_v49, 0.0 }
 0x738   : > { %v1601_v52 = vadd.f32 %v1600_v51, %v1599_v50 }
 0x73a   : > { %v1602_v53 = vrot.slane %v1601_v52, 4 }
 0x73c   : > { %v1603_v54 = vadd.f32 %v1602_v53, %v1601_v52 }
 0x73e   : > { %v1604_v55 = vrot.slane %v1603_v54, 2 }
 0x740   : > { %v1605_v56 = vadd.f32 %v1604_v55, %v1603_v54 }
 0x742   : > { %v1606_v57 = vrot.slane %v1605_v56, 1 }
 0x744   : > { %v1607_v60 = vadd.f32 %v1606_v57, %v1605_v56 }
 0x746   : > { %v1608_v61 = vmax.f32 %v1607_v60, 1e-30 }
 0x748   : > { %7999 = vrcp.f32 %v1608_v61 }
 0x752   : > { %v8000_v62 = vpop.eup %7999 }
 0x753   : > { %v1610_v63 = vmul.f32 %v8000_v62, %v1597_v48  ;;  %v1611_v0 = vmul.f32 %v8000_v62, %v1598_v49 }
 0x755   : > { %1620 = vxpose.xlu0.b32.start [1/2] (short) (narrow) %v1610_v63, 16 }
 0x759   : > { %1621 = vxpose.xlu0.b32.end [2/2] (short) (narrow) %v1611_v0, 16 }
 0x7a7   : > { %v1831_v27 = vpop.xlane.xlu1 %1830 }
 0x7ab   : > { %v1834_v19 = vpop.xlane.xlu1 %1833 }
 0x7d5   : > { %v1636_v1 = vpop.trf.xlu0 }
 0x7d6   : > { %7192 = vmatprep.mubr.msk.f32.mxu0 %vm890_vm9, %v1636_v1 }
 0x7d9   : > { %v1637_v2 = vpop.trf.xlu0 }
 0x7da   : > { %7193 = vmatmul.mubr.msk.f32.vlgmr.msra.gmra.mrb[6].mxu0 %vm890_vm9, %v1637_v2  ;;  %v2160_v2 = vld [vmem:[#allocation4 + $0x80] sm:$0xff] }
 0x7db   : > { %7666 = vmatpush3.bf16.xpose.msk.msra.mxu0 %vm8668_vm4, %v7664_v29  ;;  %7210 = vmatprep.mubr.msk.f32.mxu0 %vm8353_vm3, %v8354_v16 }
 0x7e2   : > { %7211 = vmatmul.mubr.msk.f32.vlgmr.msra.gmra.mrb[8].mxu0 %vm632_vm2, %v1820_v3  ;;  %v2161_v3 = vld [vmem:[#allocation4 + $0x88] sm:$0xff] }
 0x8ad   : > { %v7194_v14 = vpop.f32.mrb[6].mxu0 }
 0x8ae   : > { %v1730_v6 = vadd.f32 %v7194_v14, %v6752_v5  ;;  %v1724_v7 = vpop.f32.mrb[7].mxu0  ;;  %v2162_v14 = vld [vmem:[#allocation4 + $0x90] sm:$0xff] }
 0x8af   : > { %v1725_v26 = vadd.f32 %v6752_v5, %v1724_v7  ;;  %v7671_v5 = vpack.c.bf16 %v2161_v3, %v2160_v2 }
 0x8b0   : > { %v1734_v8 = vmax.f32 %v1730_v6, 0.0  ;;  %v2163_v6 = vld [vmem:[#allocation4 + $0x98] sm:$0xff] }
 0x8b1   : > { %v1733_v9 = vmax.f32 %v1725_v26, 0.0  ;;  %7672 = vmatprep.subr.bf16.mxu0 %v7671_v5  ;;  %v7675_v7 = vpack.c.bf16 %v2163_v6, %v2162_v14  ;;  %v6761_v26 = vld [vmem:[#allocation9 + $0x3] ss:$0 sm:$0xff] }
 0x8b2   : > { %v8783_v10 = vadd.f32 %v1734_v8, %v8757_v13  ;;  %7674 = vmatpush3.bf16.msra.mxu0 %v7671_v5 }
 0x8b3   : > { %v8786_v11 = vadd.f32 %v1733_v9, %v8759_v4  ;;  %7676 = vmatprep.subr.bf16.mxu0 %v7675_v7 }
 0x8b5   : > { %v1910_v12 = vpop.f32.mrb[8].mxu0 }
 0x8b6   : > { %v1917_v17 = vrot.slane %v1910_v12, %v8677_v30  ;;  %v7212_v18 = vpop.f32.mrb[9].mxu0  ;;  %7678 = vmatpush3.bf16.msra.mxu0 %v7675_v7 }
 0x8b8   : > { %v1918_v21 = vadd.f32 %v1917_v17, %v1831_v27  ;;  %v1919_v22 = vadd.f32 %v1917_v17, %v1834_v19 }
 0x8ba   : > { %vm1920_vm14 = vcmp.gt.f32.partialorder %v1918_v21, 0.0  ;;  %vm1921_vm15 = vcmp.gt.f32.partialorder %v1919_v22, 0.0  ;;  %v1922_v23 = vmul.f32 0.2, %v1918_v21  ;;  %v1923_v24 = vmul.f32 0.2, %v1919_v22 }
 0x8bc   : > { %v1924_v25 = vsel %vm1920_vm14, %v1918_v21, %v1922_v23  ;;  %v1925_v28 = vsel %vm1921_vm15, %v1919_v22, %v1923_v24  ;;  %v6769_v24 = vld [vmem:[#allocation6 + $0x4] ss:$0 sm:$0xff] }
 0x8bd   : > { %v1926_v13 = vsel %vm616_vm5, %v1924_v25, -1e+09  ;;  %v1927_v4 = vsel %vm617_vm6, %v1925_v28, -1e+09  ;;  %v2512_v25 = vld [vmem:[#allocation4 + $0xa0] sm:$0xff]  ;;  %v2513_v28 = vld [vmem:[#allocation4 + $0xa8] sm:$0xff] }
 0x8be   : > { %v1928_v29 = vsel %vm890_vm9, %v1926_v13, -inf  ;;  %v1929_v31 = vsel %vm890_vm9, %v1927_v4, -inf }
 0x8bf   : > { %v1930_v34 = vmax.f32 %v1928_v29, %v1929_v31 }
 0x8c1   : > { %v1931_v35 = vrot.slane %v1930_v34, 4 }
 0x8c3   : > { %v1932_v36 = vmax.f32 %v1930_v34, %v1931_v35  ;;  %v7687_v34 = vpack.c.bf16 %v2513_v28, %v2512_v25 }
 0x8c5   : > { %v1933_v37 = vrot.slane %v1932_v36, 2 }
 0x8c7   : > { %v1934_v38 = vmax.f32 %v1932_v36, %v1933_v37  ;;  %v2514_v36 = vld [vmem:[#allocation4 + $0xb0] sm:$0xff]  ;;  %v2515_v37 = vld [vmem:[#allocation4 + $0xb8] sm:$0xff] }
 0x8c9   : > { %v1935_v39 = vrot.slane %v1934_v38, 1 }
 0x8cb   : > { %v1936_v40 = vmax.f32 %v1934_v38, %v1935_v39  ;;  %v2248_v38 = vld [vmem:[#allocation8 + $0x4] sm:$0x1]  ;;  %v7691_v39 = vpack.c.bf16 %v2515_v37, %v2514_v36 }
 0x8cd   : > { %v1937_v41 = vsub.f32 %v1926_v13, %v1936_v40  ;;  %v1938_v42 = vsub.f32 %v1927_v4, %v1936_v40 }
 0x8cf   : > { %v1939_v43 = vmul.f32 1.442695, %v1937_v41  ;;  %v1941_v44 = vmul.f32 1.442695, %v1938_v42 }
 0x8d1   : > { %8001 = vpow2.f32 %v1939_v43 }
 0x8d2   : > { %8003 = vpow2.f32 %v1941_v44 }
 0x8db   : > { %v8002_v45 = vpop.eup %8001 }
 0x8dc   : > { %v8004_v46 = vpop.eup %8003  ;;  %v1943_v47 = vmul.f32 %v8002_v45, %v8699_v58 }
 0x8dd   : > { %v1944_v48 = vmul.f32 %v8004_v46, %v8704_v59 }
 0x8de   : > { %v1945_v49 = vsel %vm890_vm9, %v1943_v47, 0.0 }
 0x8df   : > { %v1946_v50 = vsel %vm890_vm9, %v1944_v48, 0.0 }
 0x8e0   : > { %v1947_v51 = vadd.f32 %v1946_v50, %v1945_v49 }
 0x8e2   : > { %v1948_v52 = vrot.slane %v1947_v51, 4 }
 0x8e4   : > { %v1949_v53 = vadd.f32 %v1948_v52, %v1947_v51  ;;  %v6778_v51 = vld [vmem:[#allocation6 + $0x5] ss:$0 sm:$0xff] }
 0x8e6   : > { %v1950_v54 = vrot.slane %v1949_v53, 2 }
 0x8e8   : > { %v1951_v55 = vadd.f32 %v1950_v54, %v1949_v53 }
 0x8ea   : > { %v1952_v56 = vrot.slane %v1951_v55, 1 }
 0x8ec   : > { %v1953_v57 = vadd.f32 %v1952_v56, %v1951_v55 }
 0x8ee   : > { %v1954_v60 = vmax.f32 %v1953_v57, 1e-30 }
 0x8f0   : > { %8005 = vrcp.f32 %v1954_v60 }
 0x8fa   : > { %v8006_v61 = vpop.eup %8005 }
 0x8fb   : > { %v1956_v62 = vmul.f32 %v8006_v61, %v1943_v47  ;;  %v1957_v63 = vmul.f32 %v8006_v61, %v1944_v48 }
 0x8fd   : > { %1966 = vxpose.xlu1.b32.start [1/2] (short) (narrow) %v1956_v62, 16 }
 0x901   : > { %1967 = vxpose.xlu1.b32.end [2/2] (short) (narrow) %v1957_v63, 16 }
 0x97d   : > { %v1982_v0 = vpop.trf.xlu1 }
 0x97e   : > { %7217 = vmatprep.mubr.msk.f32.mxu1 %vm890_vm9, %v1982_v0 }
 0x981   : > { %v1983_v1 = vpop.trf.xlu1 }
 0x982   : > { %7218 = vmatmul.mubr.msk.f32.vlgmr.msra.gmra.mrb[12].mxu1 %vm890_vm9, %v1983_v1 }
 0x983   : > { %7235 = vmatprep.mubr.msk.f32.mxu1 %vm8353_vm3, %v8354_v16 }
 0xa55   : > { %v7219_v8 = vpop.f32.mrb[12].mxu1 }
 0xa56   : > { %v2076_v27 = vadd.f32 %v7219_v8, %v6761_v26  ;;  %v2070_v9 = vpop.f32.mrb[13].mxu1 }
 0xa57   : > { %v2071_v12 = vadd.f32 %v6761_v26, %v2070_v9 }
 0xa58   : > { %v2080_v17 = vmax.f32 %v2076_v27, 0.0 }
 0xa59   : > { %v2079_v18 = vmax.f32 %v2071_v12, 0.0 }
 0xa5a   : > { %v2082_v19 = vadd.f32 %v2080_v17, %v8783_v10 }
 0xa5b   : > { %v2081_v21 = vadd.f32 %v2079_v18, %v8786_v11 }
 0xa5c   : > { %v8807_v23 = vmul.f32 0.25, %v2082_v19 }
 0xa5d   : > { %v8805_v22 = vmul.f32 0.25, %v2081_v21 }
 0xa5f   : > { %7228 = vmatprep.mubr.msk.f32.mxu0 %vm632_vm2, %v8805_v22 }
 0xa60   : > { %7229 = vmatmul.mubr.msk.f32.vlgmr.msra.gmra.mrb[10].mxu0 %vm632_vm2, %v8807_v23 }
 0xb33   : > { %v7230_v13 = vpop.f32.mrb[10].mxu0 }
 0xb34   : > { %v2256_v4 = vmul.f32 %v7230_v13, %v6769_v24  ;;  %v2236_v29 = vpop.f32.mrb[11].mxu0 }
 0xb35   : > { %v2255_v31 = vmul.f32 %v6769_v24, %v2236_v29  ;;  %v7680_v10 = vpack.c.bf16 %v7230_v13, %v2236_v29 }
 0xb36   : > { %v2260_v11 = vsel %vm632_vm2, %v2256_v4, 0.0 }
 0xb37   : > { %2261 = vadd.xlane.f32.xlu1 %v2260_v11  ;;  %7682 = vmatpush3.bf16.xpose.msk.msra.mxu1 %vm8668_vm4, %v7680_v10  ;;  %v2257_v35 = vsel %vm632_vm2, %v2255_v31, 0.0 }
 0xb38   : > { %7684 = vmatprep.subr.bf16.mxu0 %v7680_v10  ;;  %2258 = vadd.xlane.f32.xlu0 %v2257_v35 }
 0xb39   : > { %7686 = vmatpush3.bf16.msra.mxu0 %v7680_v10  ;;  %7688 = vmatprep.subr.bf16.mxu1 %v7687_v34 }
 0xb3a   : > { %7695 = vmatprep.subr.bf16.mxu0 %v8352_v15 }
 0xb3e   : > { %7236 = vmatmul.mubr.msk.f32.vlgmr.msra.gmra.mrb[14].mxu1 %vm632_vm2, %v2248_v38  ;;  %v2858_v38 = vld [vmem:[#allocation4 + $0xc0] sm:$0xff] }
 0xb3f   : > { %7690 = vmatpush3.bf16.msra.mxu1 %v7687_v34  ;;  %7253 = vmatprep.mubr.msk.f32.mxu1 %vm632_vm2, %v8805_v22 }
 0xb40   : > { %7692 = vmatprep.subr.bf16.mxu1 %v7691_v39 }
 0xb43   : > { %7694 = vmatpush3.bf16.msra.mxu1 %v7691_v39  ;;  %v2859_v39 = vld [vmem:[#allocation4 + $0xc8] sm:$0xff] }
 0xb46   : > { %7254 = vmatmul.mubr.msk.f32.vlgmr.msra.gmra.mrb[16].mxu1 %vm632_vm2, %v8807_v23 }
 0xbc4   : > { %v2262_v43 = vpop.xlane.xlu1 %2261 }
 0xbc5   : > { %v2259_v44 = vpop.xlane.xlu0 %2258 }
 0xc11   : > { %v2338_v40 = vpop.f32.mrb[14].mxu1 }
 0xc12   : > { %v2345_v41 = vrot.slane %v2338_v40, %v8677_v30  ;;  %v7237_v42 = vpop.f32.mrb[15].mxu1  ;;  %v7703_v40 = vpack.c.bf16 %v2859_v39, %v2858_v38 }
 0xc13   : > { %v2860_v42 = vld [vmem:[#allocation4 + $0xd0] sm:$0xff] }
 0xc14   : > { %v2346_v45 = vadd.f32 %v2345_v41, %v2259_v44  ;;  %v2347_v46 = vadd.f32 %v2345_v41, %v2262_v43  ;;  %v2861_v43 = vld [vmem:[#allocation4 + $0xd8] sm:$0xff]  ;;  %v2594_v44 = vld [vmem:[#allocation8 + $0x5] sm:$0x1] }
 0xc16   : > { %vm2348_vm0 = vcmp.gt.f32.partialorder %v2346_v45, 0.0  ;;  %vm2349_vm1 = vcmp.gt.f32.partialorder %v2347_v46, 0.0  ;;  %v2350_v47 = vmul.f32 0.2, %v2346_v45  ;;  %v2351_v48 = vmul.f32 0.2, %v2347_v46 }
 0xc18   : > { %v2352_v49 = vsel %vm2348_vm0, %v2346_v45, %v2350_v47  ;;  %v2353_v50 = vsel %vm2349_vm1, %v2347_v46, %v2351_v48  ;;  %v7707_v45 = vpack.c.bf16 %v2861_v43, %v2860_v42 }
 0xc19   : > { %v2354_v52 = vsel %vm616_vm5, %v2352_v49, -1e+09  ;;  %v2355_v53 = vsel %vm617_vm6, %v2353_v50, -1e+09  ;;  %v7255_v54 = vpop.f32.mrb[16].mxu1 }
 0xc1a   : > { %v2356_v55 = vsel %vm890_vm9, %v2354_v52, -inf  ;;  %v2357_v56 = vsel %vm890_vm9, %v2355_v53, -inf  ;;  %v2582_v57 = vpop.f32.mrb[17].mxu1  ;;  %v2602_v0 = vmul.f32 %v7255_v54, %v6778_v51 }
 0xc1b   : > { %v2358_v60 = vmax.f32 %v2356_v55, %v2357_v56  ;;  %v2601_v61 = vmul.f32 %v6778_v51, %v2582_v57  ;;  %v7696_v62 = vpack.c.bf16 %v7255_v54, %v2582_v57 }
 0xc1c   : > { %v2606_v5 = vsel %vm632_vm2, %v2602_v0, 0.0 }
 0xc1d   : > { %v2359_v63 = vrot.slane %v2358_v60, 4  ;;  %7700 = vmatprep.subr.bf16.mxu1 %v7696_v62  ;;  %v2603_v1 = vsel %vm632_vm2, %v2601_v61, 0.0  ;;  %v6787_v61 = vld [vmem:[#allocation6 + $0x6] ss:$0 sm:$0xff] }
 0xc1e   : > { %7702 = vmatpush3.bf16.msra.mxu1 %v7696_v62  ;;  %2604 = vadd.xlane.f32.xlu1 %v2603_v1 }
 0xc1f   : > { %v2360_v2 = vmax.f32 %v2358_v60, %v2359_v63  ;;  %7711 = vmatprep.subr.bf16.mxu1 %v8352_v15 }
 0xc21   : > { %v2361_v3 = vrot.slane %v2360_v2, 2 }
 0xc22   : > { %2607 = vadd.xlane.f32.xlu1 %v2606_v5 }
 0xc23   : > { %v2362_v14 = vmax.f32 %v2360_v2, %v2361_v3 }
 0xc25   : > { %v2363_v6 = vrot.slane %v2362_v14, 1 }
 0xc27   : > { %v2364_v7 = vmax.f32 %v2362_v14, %v2363_v6 }
 0xc29   : > { %v2365_v26 = vsub.f32 %v2354_v52, %v2364_v7  ;;  %v2366_v8 = vsub.f32 %v2355_v53, %v2364_v7 }
 0xc2b   : > { %v2367_v27 = vmul.f32 1.442695, %v2365_v26  ;;  %v2369_v9 = vmul.f32 1.442695, %v2366_v8 }
 0xc2d   : > { %8007 = vpow2.f32 %v2367_v27 }
 0xc2e   : > { %8009 = vpow2.f32 %v2369_v9 }
 0xc37   : > { %v8008_v12 = vpop.eup %8007 }
 0xc38   : > { %v8010_v17 = vpop.eup %8009  ;;  %v2371_v18 = vmul.f32 %v8008_v12, %v8699_v58 }
 0xc39   : > { %v2372_v19 = vmul.f32 %v8010_v17, %v8704_v59 }
 0xc3a   : > { %v2373_v21 = vsel %vm890_vm9, %v2371_v18, 0.0 }
 0xc3b   : > { %v2374_v24 = vsel %vm890_vm9, %v2372_v19, 0.0 }
 0xc3c   : > { %v2375_v25 = vadd.f32 %v2374_v24, %v2373_v21 }
 0xc3e   : > { %v2376_v28 = vrot.slane %v2375_v25, 4 }
 0xc40   : > { %v2377_v13 = vadd.f32 %v2376_v28, %v2375_v25 }
 0xc42   : > { %v2378_v4 = vrot.slane %v2377_v13, 2 }
 0xc44   : > { %v2379_v29 = vadd.f32 %v2378_v4, %v2377_v13 }
 0xc46   : > { %v2380_v31 = vrot.slane %v2379_v29, 1 }
 0xc48   : > { %v2381_v10 = vadd.f32 %v2380_v31, %v2379_v29 }
 0xc4a   : > { %v2382_v34 = vmax.f32 %v2381_v10, 1e-30 }
 0xc4c   : > { %8011 = vrcp.f32 %v2382_v34 }
 0xc56   : > { %v8012_v11 = vpop.eup %8011 }
 0xc57   : > { %v2384_v35 = vmul.f32 %v8012_v11, %v2371_v18  ;;  %v2385_v36 = vmul.f32 %v8012_v11, %v2372_v19 }
 0xc59   : > { %2394 = vxpose.xlu0.b32.start [1/2] (short) (narrow) %v2384_v35, 16 }
 0xc5d   : > { %2395 = vxpose.xlu0.b32.end [2/2] (short) (narrow) %v2385_v36, 16 }
 0xcab   : > { %v2605_v48 = vpop.xlane.xlu1 %2604 }
 0xcaf   : > { %v2608_v52 = vpop.xlane.xlu1 %2607 }
 0xcd9   : > { %v2410_v37 = vpop.trf.xlu0 }
 0xcda   : > { %7242 = vmatprep.mubr.msk.f32.mxu0 %vm890_vm9, %v2410_v37 }
 0xcdd   : > { %v2411_v41 = vpop.trf.xlu0 }
 0xcde   : > { %7243 = vmatmul.mubr.msk.f32.vlgmr.msra.gmra.mrb[12].mxu0 %vm890_vm9, %v2411_v41 }
 0xcdf   : > { %7698 = vmatpush3.bf16.xpose.msk.msra.mxu0 %vm8668_vm4, %v7696_v62  ;;  %7260 = vmatprep.mubr.msk.f32.mxu0 %vm8353_vm3, %v8354_v16 }
 0xce0   : > { %7704 = vmatprep.subr.bf16.mxu0 %v7703_v40 }
 0xce6   : > { %7261 = vmatmul.mubr.msk.f32.vlgmr.msra.gmra.mrb[14].mxu0 %vm632_vm2, %v2594_v44 }
 0xce7   : > { %7706 = vmatpush3.bf16.msra.mxu0 %v7703_v40  ;;  %7278 = vmatprep.mubr.msk.f32.mxu0 %vm632_vm2, %v8805_v22 }
 0xce8   : > { %7708 = vmatprep.subr.bf16.mxu0 %v7707_v45 }
 0xceb   : > { %7710 = vmatpush3.bf16.msra.mxu0 %v7707_v45 }
 0xcee   : > { %7279 = vmatmul.mubr.msk.f32.vlgmr.msra.gmra.mrb[16].mxu0 %vm632_vm2, %v8807_v23 }
 0xdb1   : > { %v8848_v46 = vpop.f32.mrb[12].mxu0 }
 0xdb2   : > { %v8850_v47 = vpop.f32.mrb[13].mxu0 }
 0xdb9   : > { %v2684_v49 = vpop.f32.mrb[14].mxu0 }
 0xdba   : > { %v2691_v50 = vrot.slane %v2684_v49, %v8677_v30  ;;  %v7262_v51 = vpop.f32.mrb[15].mxu0  ;;  %v3205_v49 = vld [vmem:[#allocation4 + $0xe8] sm:$0xff] }
 0xdbc   : > { %v2692_v53 = vadd.f32 %v2691_v50, %v2605_v48  ;;  %v2693_v54 = vadd.f32 %v2691_v50, %v2608_v52  ;;  %v3204_v48 = vld [vmem:[#allocation4 + $0xe0] sm:$0xff]  ;;  %v3206_v52 = vld [vmem:[#allocation4 + $0xf0] sm:$0xff] }
 0xdbd   : > { %v7719_v50 = vpack.c.bf16 %v3205_v49, %v3204_v48 }
 0xdbe   : > { %vm2694_vm7 = vcmp.gt.f32.partialorder %v2692_v53, 0.0  ;;  %vm2695_vm8 = vcmp.gt.f32.partialorder %v2693_v54, 0.0  ;;  %v2696_v55 = vmul.f32 0.2, %v2692_v53  ;;  %v2697_v56 = vmul.f32 0.2, %v2693_v54 }
 0xdc0   : > { %v2698_v57 = vsel %vm2694_vm7, %v2692_v53, %v2696_v55  ;;  %v2699_v60 = vsel %vm2695_vm8, %v2693_v54, %v2697_v56  ;;  %v3207_v53 = vld [vmem:[#allocation4 + $0xf8] sm:$0xff]  ;;  %v2940_v54 = vld [vmem:[#allocation8 + $0x6] sm:$0x1]  ;;  %vm647_vm7 = vcmask 7168  }
 0xdc1   : > { %v2700_v62 = vsel %vm616_vm5, %v2698_v57, -1e+09  ;;  %v2701_v63 = vsel %vm617_vm6, %v2699_v60, -1e+09  ;;  %v7280_v0 = vpop.f32.mrb[16].mxu0  ;;  %v7723_v55 = vpack.c.bf16 %v3207_v53, %v3206_v52 }
 0xdc2   : > { %v2702_v1 = vsel %vm890_vm9, %v2700_v62, -inf  ;;  %v2703_v2 = vsel %vm890_vm9, %v2701_v63, -inf  ;;  %v2928_v3 = vpop.f32.mrb[17].mxu0  ;;  %v2948_v26 = vmul.f32 %v7280_v0, %v6787_v61  ;;  %v6773_v56 = vld [vmem:[#allocation9 + $0x4] ss:$0 sm:$0xff] }
 0xdc3   : > { %v2704_v5 = vmax.f32 %v2702_v1, %v2703_v2  ;;  %v2947_v14 = vmul.f32 %v6787_v61, %v2928_v3  ;;  %v7712_v6 = vpack.c.bf16 %v7280_v0, %v2928_v3  ;;  %v6782_v57 = vld [vmem:[#allocation9 + $0x5] ss:$0 sm:$0xff]  ;;  %v2504_v60 = vadd.f32 %v8848_v46, %v6773_v56 }
 0xdc4   : > { %v2952_v12 = vsel %vm632_vm2, %v2948_v26, 0.0  ;;  %v2499_v61 = vadd.f32 %v6773_v56, %v8850_v47 }
 0xdc5   : > { %v2705_v7 = vrot.slane %v2704_v5, 4  ;;  %7716 = vmatprep.subr.bf16.mxu0 %v7712_v6  ;;  %v2949_v8 = vsel %vm632_vm2, %v2947_v14, 0.0  ;;  %v2508_v2 = vmax.f32 %v2504_v60, 0.0 }
 0xdc6   : > { %7718 = vmatpush3.bf16.msra.mxu0 %v7712_v6  ;;  %2950 = vadd.xlane.f32.xlu0 %v2949_v8 }
 0xdc7   : > { %v2706_v27 = vmax.f32 %v2704_v5, %v2705_v7  ;;  %7727 = vmatprep.subr.bf16.mxu0 %v8352_v15  ;;  %v2507_v5 = vmax.f32 %v2499_v61, 0.0 }
 0xdc9   : > { %v2707_v9 = vrot.slane %v2706_v27, 2 }
 0xdca   : > { %2953 = vadd.xlane.f32.xlu0 %v2952_v12 }
 0xdcb   : > { %v2708_v17 = vmax.f32 %v2706_v27, %v2707_v9 }
 0xdcd   : > { %v2709_v18 = vrot.slane %v2708_v17, 1 }
 0xdcf   : > { %v2710_v19 = vmax.f32 %v2708_v17, %v2709_v18 }
 0xdd1   : > { %v2711_v21 = vsub.f32 %v2700_v62, %v2710_v19  ;;  %v2712_v24 = vsub.f32 %v2701_v63, %v2710_v19 }
 0xdd3   : > { %v2713_v25 = vmul.f32 1.442695, %v2711_v21  ;;  %v2715_v28 = vmul.f32 1.442695, %v2712_v24  ;;  %v6796_v24 = vld [vmem:[#allocation6 + $0x7] ss:$0 sm:$0xff] }
 0xdd5   : > { %8013 = vpow2.f32 %v2713_v25 }
 0xdd6   : > { %8015 = vpow2.f32 %v2715_v28 }
 0xddf   : > { %v8014_v13 = vpop.eup %8013 }
 0xde0   : > { %v8016_v4 = vpop.eup %8015  ;;  %v2717_v29 = vmul.f32 %v8014_v13, %v8699_v58 }
 0xde1   : > { %v2718_v31 = vmul.f32 %v8016_v4, %v8704_v59 }
 0xde2   : > { %v2719_v10 = vsel %vm890_vm9, %v2717_v29, 0.0 }
 0xde3   : > { %v2720_v34 = vsel %vm890_vm9, %v2718_v31, 0.0 }
 0xde4   : > { %v2721_v11 = vadd.f32 %v2720_v34, %v2719_v10 }
 0xde6   : > { %v2722_v35 = vrot.slane %v2721_v11, 4 }
 0xde8   : > { %v2723_v36 = vadd.f32 %v2722_v35, %v2721_v11 }
 0xdea   : > { %v2724_v37 = vrot.slane %v2723_v36, 2 }
 0xdec   : > { %v2725_v38 = vadd.f32 %v2724_v37, %v2723_v36 }
 0xdee   : > { %v2726_v39 = vrot.slane %v2725_v38, 1 }
 0xdf0   : > { %v2727_v40 = vadd.f32 %v2726_v39, %v2725_v38 }
 0xdf2   : > { %v2728_v41 = vmax.f32 %v2727_v40, 1e-30 }
 0xdf4   : > { %8017 = vrcp.f32 %v2728_v41 }
 0xdfe   : > { %v8018_v42 = vpop.eup %8017 }
 0xdff   : > { %v2730_v43 = vmul.f32 %v8018_v42, %v2717_v29  ;;  %v2731_v44 = vmul.f32 %v8018_v42, %v2718_v31 }
 0xe01   : > { %2740 = vxpose.xlu1.b32.start [1/2] (short) (narrow) %v2730_v43, 16 }
 0xe05   : > { %2741 = vxpose.xlu1.b32.end [2/2] (short) (narrow) %v2731_v44, 16 }
 0xe53   : > { %v2951_v14 = vpop.xlane.xlu0 %2950 }
 0xe57   : > { %v2954_v46 = vpop.xlane.xlu0 %2953 }
 0xe81   : > { %v2756_v45 = vpop.trf.xlu1 }
 0xe82   : > { %7267 = vmatprep.mubr.msk.f32.mxu1 %vm890_vm9, %v2756_v45 }
 0xe85   : > { %v2757_v51 = vpop.trf.xlu1 }
 0xe86   : > { %7268 = vmatmul.mubr.msk.f32.vlgmr.msra.gmra.mrb[18].mxu1 %vm890_vm9, %v2757_v51 }
 0xe87   : > { %7714 = vmatpush3.bf16.xpose.msk.msra.mxu1 %vm8668_vm4, %v7712_v6  ;;  %7285 = vmatprep.mubr.msk.f32.mxu1 %vm8353_vm3, %v8354_v16 }
 0xe88   : > { %7720 = vmatprep.subr.bf16.mxu1 %v7719_v50 }
 0xe8e   : > { %7286 = vmatmul.mubr.msk.f32.vlgmr.msra.gmra.mrb[20].mxu1 %vm632_vm2, %v2940_v54 }
 0xe8f   : > { %7722 = vmatpush3.bf16.msra.mxu1 %v7719_v50  ;;  %7303 = vmatprep.mubr.msk.f32.mxu1 %vm632_vm2, %v8805_v22 }
 0xe90   : > { %7724 = vmatprep.subr.bf16.mxu1 %v7723_v55 }
 0xe93   : > { %7726 = vmatpush3.bf16.msra.mxu1 %v7723_v55 }
 0xe96   : > { %7304 = vmatmul.mubr.msk.f32.vlgmr.msra.gmra.mrb[22].mxu1 %vm632_vm2, %v8807_v23 }
 0xf59   : > { %v7269_v62 = vpop.f32.mrb[18].mxu1 }
 0xf5a   : > { %v2850_v63 = vadd.f32 %v7269_v62, %v6782_v57  ;;  %v2844_v0 = vpop.f32.mrb[19].mxu1 }
 0xf5b   : > { %v2845_v1 = vadd.f32 %v6782_v57, %v2844_v0 }
 0xf5c   : > { %v2854_v3 = vmax.f32 %v2850_v63, 0.0 }
 0xf5d   : > { %v2853_v6 = vmax.f32 %v2845_v1, 0.0 }
 0xf5e   : > { %v8879_v7 = vadd.f32 %v2854_v3, %v2508_v2 }
 0xf5f   : > { %v8881_v26 = vadd.f32 %v2853_v6, %v2507_v5 }
 0xf61   : > { %v3030_v8 = vpop.f32.mrb[20].mxu1 }
 0xf62   : > { %v3037_v27 = vrot.slane %v3030_v8, %v8677_v30  ;;  %v7287_v9 = vpop.f32.mrb[21].mxu1  ;;  %v3286_v8 = vld [vmem:[#allocation8 + $0x7] sm:$0x1] }
 0xf64   : > { %v3038_v12 = vadd.f32 %v3037_v27, %v2951_v14  ;;  %v3039_v47 = vadd.f32 %v3037_v27, %v2954_v46  ;;  %v6791_v27 = vld [vmem:[#allocation9 + $0x6] ss:$0 sm:$0xff] }
 0xf66   : > { %vm3040_vm10 = vcmp.gt.f32.partialorder %v3038_v12, 0.0  ;;  %vm3041_vm11 = vcmp.gt.f32.partialorder %v3039_v47, 0.0  ;;  %v3042_v17 = vmul.f32 0.2, %v3038_v12  ;;  %v3043_v18 = vmul.f32 0.2, %v3039_v47 }
 0xf68   : > { %v3044_v19 = vsel %vm3040_vm10, %v3038_v12, %v3042_v17  ;;  %v3045_v21 = vsel %vm3041_vm11, %v3039_v47, %v3043_v18 }
 0xf69   : > { %v3046_v25 = vsel %vm616_vm5, %v3044_v19, -1e+09  ;;  %v3047_v28 = vsel %vm617_vm6, %v3045_v21, -1e+09  ;;  %v7305_v13 = vpop.f32.mrb[22].mxu1 }
 0xf6a   : > { %v3048_v4 = vsel %vm890_vm9, %v3046_v25, -inf  ;;  %v3049_v29 = vsel %vm890_vm9, %v3047_v28, -inf  ;;  %v3274_v31 = vpop.f32.mrb[23].mxu1  ;;  %v3294_v36 = vmul.f32 %v7305_v13, %v6796_v24 }
 0xf6b   : > { %v3050_v10 = vmax.f32 %v3048_v4, %v3049_v29  ;;  %v3293_v34 = vmul.f32 %v6796_v24, %v3274_v31  ;;  %v7728_v11 = vpack.c.bf16 %v7305_v13, %v3274_v31 }
 0xf6c   : > { %v3298_v40 = vsel %vm632_vm2, %v3294_v36, 0.0 }
 0xf6d   : > { %v3051_v35 = vrot.slane %v3050_v10, 4  ;;  %7732 = vmatprep.subr.bf16.mxu1 %v7728_v11  ;;  %v3295_v37 = vsel %vm632_vm2, %v3293_v34, 0.0 }
 0xf6e   : > { %7734 = vmatpush3.bf16.msra.mxu1 %v7728_v11  ;;  %3296 = vadd.xlane.f32.xlu0 %v3295_v37 }
 0xf6f   : > { %v3052_v38 = vmax.f32 %v3050_v10, %v3051_v35  ;;  %7743 = vmatprep.subr.bf16.mxu1 %v8352_v15 }
 0xf71   : > { %v3053_v39 = vrot.slane %v3052_v38, 2 }
 0xf72   : > { %3299 = vadd.xlane.f32.xlu0 %v3298_v40 }
 0xf73   : > { %v3054_v41 = vmax.f32 %v3052_v38, %v3053_v39 }
 0xf75   : > { %v3055_v42 = vrot.slane %v3054_v41, 1 }
 0xf77   : > { %v3056_v43 = vmax.f32 %v3054_v41, %v3055_v42 }
 0xf79   : > { %v3057_v44 = vsub.f32 %v3046_v25, %v3056_v43  ;;  %v3058_v45 = vsub.f32 %v3047_v28, %v3056_v43 }
 0xf7b   : > { %v3059_v48 = vmul.f32 1.442695, %v3057_v44  ;;  %v3061_v49 = vmul.f32 1.442695, %v3058_v45 }
 0xf7d   : > { %8019 = vpow2.f32 %v3059_v48 }
 0xf7e   : > { %8021 = vpow2.f32 %v3061_v49 }
 0xf87   : > { %v8020_v50 = vpop.eup %8019 }
 0xf88   : > { %v8022_v51 = vpop.eup %8021  ;;  %v3063_v52 = vmul.f32 %v8020_v50, %v8699_v58 }
 0xf89   : > { %v3064_v53 = vmul.f32 %v8022_v51, %v8704_v59 }
 0xf8a   : > { %v3065_v54 = vsel %vm890_vm9, %v3063_v52, 0.0 }
 0xf8b   : > { %v3066_v55 = vsel %vm890_vm9, %v3064_v53, 0.0 }
 0xf8c   : > { %v3067_v56 = vadd.f32 %v3066_v55, %v3065_v54 }
 0xf8e   : > { %v3068_v57 = vrot.slane %v3067_v56, 4 }
 0xf90   : > { %v3069_v60 = vadd.f32 %v3068_v57, %v3067_v56 }
 0xf92   : > { %v3070_v61 = vrot.slane %v3069_v60, 2 }
 0xf94   : > { %v3071_v62 = vadd.f32 %v3070_v61, %v3069_v60 }
 0xf96   : > { %v3072_v63 = vrot.slane %v3071_v62, 1 }
 0xf98   : > { %v3073_v0 = vadd.f32 %v3072_v63, %v3071_v62 }
 0xf9a   : > { %v3074_v1 = vmax.f32 %v3073_v0, 1e-30 }
 0xf9c   : > { %8023 = vrcp.f32 %v3074_v1 }
 0xfa6   : > { %v8024_v2 = vpop.eup %8023 }
 0xfa7   : > { %v3076_v3 = vmul.f32 %v8024_v2, %v3063_v52  ;;  %v3077_v5 = vmul.f32 %v8024_v2, %v3064_v53 }
 0xfa9   : > { %3086 = vxpose.xlu1.b32.start [1/2] (short) (narrow) %v3076_v3, 16 }
 0xfad   : > { %3087 = vxpose.xlu1.b32.end [2/2] (short) (narrow) %v3077_v5, 16 }
 0xffb   : > { %v3297_v18 = vpop.xlane.xlu0 %3296 }
 0xfff   : > { %v3300_v4 = vpop.xlane.xlu0 %3299 }
0x1029   : > { %v3102_v14 = vpop.trf.xlu1 }
0x102a   : > { %7292 = vmatprep.mubr.msk.f32.mxu0 %vm890_vm9, %v3102_v14 }
0x102d   : > { %v3103_v6 = vpop.trf.xlu1 }
0x102e   : > { %7293 = vmatmul.mubr.msk.f32.vlgmr.msra.gmra.mrb[18].mxu0 %vm890_vm9, %v3103_v6 }
0x102f   : > { %7730 = vmatpush3.bf16.xpose.msk.msra.mxu0 %vm8668_vm4, %v7728_v11  ;;  %7310 = vmatprep.mubr.msk.f32.mxu0 %vm8353_vm3, %v8354_v16 }
0x1036   : > { %7311 = vmatmul.mubr.msk.f32.vlgmr.msra.gmra.mrb[20].mxu0 %vm632_vm2, %v3286_v8 }
0x1101   : > { %v7294_v9 = vpop.f32.mrb[18].mxu0 }
0x1102   : > { %v3196_v46 = vadd.f32 %v7294_v9, %v6791_v27  ;;  %v3190_v12 = vpop.f32.mrb[19].mxu0  ;;  %v3627_v9 = vld [vmem:[#allocation4 + $0x108] sm:$0xff] }
0x1103   : > { %v3191_v47 = vadd.f32 %v6791_v27, %v3190_v12  ;;  %v3626_v27 = vld [vmem:[#allocation4 + $0x100] sm:$0xff]  ;;  %v3628_v12 = vld [vmem:[#allocation4 + $0x110] sm:$0xff] }
0x1104   : > { %v3200_v17 = vmax.f32 %v3196_v46, 0.0  ;;  %v7735_v46 = vpack.c.bf16 %v3627_v9, %v3626_v27 }
0x1105   : > { %v3199_v19 = vmax.f32 %v3191_v47, 0.0  ;;  %v3629_v47 = vld [vmem:[#allocation4 + $0x118] sm:$0xff] }
0x1106   : > { %v8905_v21 = vadd.f32 %v3200_v17, %v8879_v7  ;;  %7736 = vmatprep.subr.bf16.mxu0 %v7735_v46  ;;  %v7739_v17 = vpack.c.bf16 %v3629_v47, %v3628_v12 }
0x1107   : > { %v8908_v24 = vadd.f32 %v3199_v19, %v8881_v26  ;;  %7738 = vmatpush3.bf16.msra.mxu0 %v7735_v46 }
0x1108   : > { %7740 = vmatprep.subr.bf16.mxu0 %v7739_v17 }
0x1109   : > { %v3376_v25 = vpop.f32.mrb[20].mxu0 }
0x110a   : > { %v3383_v28 = vrot.slane %v3376_v25, %v8677_v30  ;;  %v7312_v13 = vpop.f32.mrb[21].mxu0 }
0x110b   : > { %7742 = vmatpush3.bf16.msra.mxu0 %v7739_v17 }
0x110c   : > { %v3384_v29 = vadd.f32 %v3383_v28, %v3297_v18  ;;  %v3385_v31 = vadd.f32 %v3383_v28, %v3300_v4  ;;  %v6800_v18 = vld [vmem:[#allocation9 + $0x7] ss:$0 sm:$0xff] }
0x110e   : > { %vm3386_vm12 = vcmp.gt.f32.partialorder %v3384_v29, 0.0  ;;  %vm3387_vm13 = vcmp.gt.f32.partialorder %v3385_v31, 0.0  ;;  %v3388_v10 = vmul.f32 0.2, %v3384_v29  ;;  %v3389_v34 = vmul.f32 0.2, %v3385_v31 }
0x1110   : > { %v3390_v11 = vsel %vm3386_vm12, %v3384_v29, %v3388_v10  ;;  %v3391_v35 = vsel %vm3387_vm13, %v3385_v31, %v3389_v34 }
0x1111   : > { %v3392_v7 = vsel %vm616_vm5, %v3390_v11, -1e+09  ;;  %v3393_v26 = vsel %vm617_vm6, %v3391_v35, -1e+09  ;;  %v6808_v35 = vld [vmem:[#allocation6 + $0x8] ss:$0 sm:$0xff] }
0x1112   : > { %v3394_v36 = vsel %vm890_vm9, %v3392_v7, -inf  ;;  %v3395_v37 = vsel %vm890_vm9, %v3393_v26, -inf }
0x1113   : > { %v3396_v38 = vmax.f32 %v3394_v36, %v3395_v37 }
0x1115   : > { %v3397_v39 = vrot.slane %v3396_v38, 4 }
0x1117   : > { %v3398_v40 = vmax.f32 %v3396_v38, %v3397_v39 }
0x1119   : > { %v3399_v41 = vrot.slane %v3398_v40, 2 }
0x111b   : > { %v3400_v42 = vmax.f32 %v3398_v40, %v3399_v41  ;;  %v3980_v41 = vld [vmem:[#allocation4 + $0x130] sm:$0xff] }
0x111d   : > { %v3401_v43 = vrot.slane %v3400_v42, 1 }
0x111f   : > { %v3402_v44 = vmax.f32 %v3400_v42, %v3401_v43  ;;  %v3981_v42 = vld [vmem:[#allocation4 + $0x138] sm:$0xff] }
0x1121   : > { %v3403_v45 = vsub.f32 %v3392_v7, %v3402_v44  ;;  %v3404_v48 = vsub.f32 %v3393_v26, %v3402_v44  ;;  %v3978_v7 = vld [vmem:[#allocation4 + $0x120] sm:$0xff]  ;;  %v3979_v26 = vld [vmem:[#allocation4 + $0x128] sm:$0xff]  ;;  %v3714_v44 = vld [vmem:[#allocation8 + $0x8] sm:$0x1] }
0x1123   : > { %v3405_v49 = vmul.f32 1.442695, %v3403_v45  ;;  %v3407_v50 = vmul.f32 1.442695, %v3404_v48  ;;  %v7755_v45 = vpack.c.bf16 %v3981_v42, %v3980_v41 }
0x1125   : > { %8025 = vpow2.f32 %v3405_v49 }
0x1126   : > { %8027 = vpow2.f32 %v3407_v50 }
0x112f   : > { %v8026_v51 = vpop.eup %8025 }
0x1130   : > { %v8028_v52 = vpop.eup %8027  ;;  %v3409_v53 = vmul.f32 %v8026_v51, %v8699_v58 }
0x1131   : > { %v3410_v54 = vmul.f32 %v8028_v52, %v8704_v59 }
0x1132   : > { %v3411_v55 = vsel %vm890_vm9, %v3409_v53, 0.0 }
0x1133   : > { %v3412_v56 = vsel %vm890_vm9, %v3410_v54, 0.0 }
0x1134   : > { %v3413_v57 = vadd.f32 %v3412_v56, %v3411_v55 }
0x1136   : > { %v3414_v60 = vrot.slane %v3413_v57, 4 }
0x1138   : > { %v3415_v61 = vadd.f32 %v3414_v60, %v3413_v57 }
0x113a   : > { %v3416_v62 = vrot.slane %v3415_v61, 2 }
0x113c   : > { %v3417_v63 = vadd.f32 %v3416_v62, %v3415_v61  ;;  %v6817_v61 = vld [vmem:[#allocation6 + $0x9] ss:$0 sm:$0xff] }
0x113e   : > { %v3418_v0 = vrot.slane %v3417_v63, 1 }
0x1140   : > { %v3419_v1 = vadd.f32 %v3418_v0, %v3417_v63 }
0x1142   : > { %v3420_v2 = vmax.f32 %v3419_v1, 1e-30 }
0x1144   : > { %8029 = vrcp.f32 %v3420_v2 }
0x114e   : > { %v8030_v3 = vpop.eup %8029 }
0x114f   : > { %v3422_v5 = vmul.f32 %v8030_v3, %v3409_v53  ;;  %v3423_v14 = vmul.f32 %v8030_v3, %v3410_v54 }
0x1151   : > { %3432 = vxpose.xlu1.b32.start [1/2] (short) (narrow) %v3422_v5, 16 }
0x1155   : > { %3433 = vxpose.xlu1.b32.end [2/2] (short) (narrow) %v3423_v14, 16 }
0x11d1   : > { %v3448_v6 = vpop.trf.xlu1 }
0x11d2   : > { %7317 = vmatprep.mubr.msk.f32.mxu1 %vm890_vm9, %v3448_v6 }
0x11d5   : > { %v3449_v8 = vpop.trf.xlu1 }
0x11d6   : > { %7318 = vmatmul.mubr.msk.f32.vlgmr.msra.gmra.mrb[24].mxu1 %vm890_vm9, %v3449_v8 }
0x11d7   : > { %7335 = vmatprep.mubr.msk.f32.mxu1 %vm8353_vm3, %v8354_v16 }
0x12a9   : > { %v7319_v19 = vpop.f32.mrb[24].mxu1 }
0x12aa   : > { %v3542_v25 = vadd.f32 %v7319_v19, %v6800_v18  ;;  %v3536_v28 = vpop.f32.mrb[25].mxu1 }
0x12ab   : > { %v3537_v13 = vadd.f32 %v6800_v18, %v3536_v28 }
0x12ac   : > { %v3546_v4 = vmax.f32 %v3542_v25, 0.0 }
0x12ad   : > { %v3545_v29 = vmax.f32 %v3537_v13, 0.0 }
0x12ae   : > { %v3548_v31 = vadd.f32 %v3546_v4, %v8905_v21  ;;  %v7751_v21 = vpack.c.bf16 %v3979_v26, %v3978_v7 }
0x12af   : > { %v3547_v10 = vadd.f32 %v3545_v29, %v8908_v24 }
0x12b0   : > { %v8929_v11 = vmul.f32 0.25, %v3548_v31 }
0x12b1   : > { %v8927_v34 = vmul.f32 0.25, %v3547_v10 }
0x12b3   : > { %7328 = vmatprep.mubr.msk.f32.mxu0 %vm632_vm2, %v8927_v34 }
0x12b4   : > { %7329 = vmatmul.mubr.msk.f32.vlgmr.msra.gmra.mrb[22].mxu0 %vm632_vm2, %v8929_v11 }
0x1387   : > { %v7330_v36 = vpop.f32.mrb[22].mxu0 }
0x1388   : > { %v3702_v37 = vpop.f32.mrb[23].mxu0  ;;  %v3722_v40 = vmul.f32 %v7330_v36, %v6808_v35 }
0x1389   : > { %v3721_v38 = vmul.f32 %v6808_v35, %v3702_v37  ;;  %v7744_v39 = vpack.c.bf16 %v7330_v36, %v3702_v37 }
0x138a   : > { %v3726_v43 = vsel %vm632_vm2, %v3722_v40, 0.0 }
0x138b   : > { %7746 = vmatpush3.bf16.xpose.msk.msra.mxu1 %vm8668_vm4, %v7744_v39  ;;  %7748 = vmatprep.subr.bf16.mxu0 %v7744_v39  ;;  %v3723_v24 = vsel %vm632_vm2, %v3721_v38, 0.0 }
0x138c   : > { %7750 = vmatpush3.bf16.msra.mxu0 %v7744_v39  ;;  %3724 = vadd.xlane.f32.xlu0 %v3723_v24 }
0x138d   : > { %7752 = vmatprep.subr.bf16.mxu1 %v7751_v21  ;;  %7759 = vmatprep.subr.bf16.mxu0 %v8352_v15 }
0x1390   : > { %3727 = vadd.xlane.f32.xlu0 %v3726_v43 }
0x1392   : > { %7336 = vmatmul.mubr.msk.f32.vlgmr.msra.gmra.mrb[26].mxu1 %vm632_vm2, %v3714_v44 }
0x1393   : > { %7754 = vmatpush3.bf16.msra.mxu1 %v7751_v21  ;;  %7353 = vmatprep.mubr.msk.f32.mxu1 %vm632_vm2, %v8927_v34 }
0x1394   : > { %7756 = vmatprep.subr.bf16.mxu1 %v7755_v45 }
0x1397   : > { %7758 = vmatpush3.bf16.msra.mxu1 %v7755_v45 }
0x139a   : > { %7354 = vmatmul.mubr.msk.f32.vlgmr.msra.gmra.mrb[28].mxu1 %vm632_vm2, %v8929_v11 }
0x1419   : > { %v3725_v48 = vpop.xlane.xlu0 %3724 }
0x141d   : > { %v3728_v52 = vpop.xlane.xlu0 %3727 }
0x1465   : > { %v3804_v49 = vpop.f32.mrb[26].mxu1 }
0x1466   : > { %v3811_v50 = vrot.slane %v3804_v49, %v8677_v30  ;;  %v7337_v51 = vpop.f32.mrb[27].mxu1  ;;  %v4325_v49 = vld [vmem:[#allocation4 + $0x148] sm:$0xff] }
0x1468   : > { %v3812_v53 = vadd.f32 %v3811_v50, %v3725_v48  ;;  %v3813_v54 = vadd.f32 %v3811_v50, %v3728_v52  ;;  %v4324_v48 = vld [vmem:[#allocation4 + $0x140] sm:$0xff]  ;;  %v4326_v52 = vld [vmem:[#allocation4 + $0x150] sm:$0xff] }
0x1469   : > { %v7767_v50 = vpack.c.bf16 %v4325_v49, %v4324_v48 }
0x146a   : > { %vm3814_vm14 = vcmp.gt.f32.partialorder %v3812_v53, 0.0  ;;  %vm3815_vm15 = vcmp.gt.f32.partialorder %v3813_v54, 0.0  ;;  %v3816_v55 = vmul.f32 0.2, %v3812_v53  ;;  %v3817_v56 = vmul.f32 0.2, %v3813_v54 }
0x146c   : > { %v3818_v57 = vsel %vm3814_vm14, %v3812_v53, %v3816_v55  ;;  %v3819_v60 = vsel %vm3815_vm15, %v3813_v54, %v3817_v56  ;;  %v4327_v53 = vld [vmem:[#allocation4 + $0x158] sm:$0xff]  ;;  %v4060_v54 = vld [vmem:[#allocation8 + $0x9] sm:$0x1]  ;;  %v8970_v56 = vld [vmem:[#allocation9 + $0x8] ss:$0 sm:$0xff] }
0x146d   : > { %v3820_v62 = vsel %vm616_vm5, %v3818_v57, -1e+09  ;;  %v3821_v63 = vsel %vm617_vm6, %v3819_v60, -1e+09  ;;  %v7355_v0 = vpop.f32.mrb[28].mxu1  ;;  %v7771_v55 = vpack.c.bf16 %v4327_v53, %v4326_v52 }
0x146e   : > { %v3822_v1 = vsel %vm890_vm9, %v3820_v62, -inf  ;;  %v3823_v2 = vsel %vm890_vm9, %v3821_v63, -inf  ;;  %v4048_v3 = vpop.f32.mrb[29].mxu1  ;;  %v4068_v27 = vmul.f32 %v7355_v0, %v6817_v61 }
0x146f   : > { %v3824_v5 = vmax.f32 %v3822_v1, %v3823_v2  ;;  %v4067_v14 = vmul.f32 %v6817_v61, %v4048_v3  ;;  %v7760_v6 = vpack.c.bf16 %v7355_v0, %v4048_v3 }
0x1470   : > { %v4072_v47 = vsel %vm632_vm2, %v4068_v27, 0.0 }
0x1471   : > { %v3825_v8 = vrot.slane %v3824_v5, 4  ;;  %7764 = vmatprep.subr.bf16.mxu1 %v7760_v6  ;;  %v4069_v9 = vsel %vm632_vm2, %v4067_v14, 0.0 }
0x1472   : > { %7766 = vmatpush3.bf16.msra.mxu1 %v7760_v6  ;;  %4070 = vadd.xlane.f32.xlu0 %v4069_v9  ;;  %v6826_v9 = vld [vmem:[#allocation6 + $0xa] ss:$0 sm:$0xff] }
0x1473   : > { %v3826_v46 = vmax.f32 %v3824_v5, %v3825_v8  ;;  %7775 = vmatprep.subr.bf16.mxu1 %v8352_v15 }
0x1475   : > { %v3827_v12 = vrot.slane %v3826_v46, 2 }
0x1476   : > { %4073 = vadd.xlane.f32.xlu0 %v4072_v47 }
0x1477   : > { %v3828_v17 = vmax.f32 %v3826_v46, %v3827_v12 }
0x1479   : > { %v3829_v18 = vrot.slane %v3828_v17, 1 }
0x147b   : > { %v3830_v19 = vmax.f32 %v3828_v17, %v3829_v18 }
0x147d   : > { %v3831_v25 = vsub.f32 %v3820_v62, %v3830_v19  ;;  %v3832_v28 = vsub.f32 %v3821_v63, %v3830_v19 }
0x147f   : > { %v3833_v13 = vmul.f32 1.442695, %v3831_v25  ;;  %v3835_v4 = vmul.f32 1.442695, %v3832_v28 }
0x1481   : > { %8031 = vpow2.f32 %v3833_v13 }
0x1482   : > { %8033 = vpow2.f32 %v3835_v4 }
0x148b   : > { %v8032_v29 = vpop.eup %8031 }
0x148c   : > { %v8034_v31 = vpop.eup %8033  ;;  %v3837_v10 = vmul.f32 %v8032_v29, %v8699_v58 }
0x148d   : > { %v3838_v35 = vmul.f32 %v8034_v31, %v8704_v59 }
0x148e   : > { %v3839_v7 = vsel %vm890_vm9, %v3837_v10, 0.0 }
0x148f   : > { %v3840_v26 = vsel %vm890_vm9, %v3838_v35, 0.0 }
0x1490   : > { %v3841_v36 = vadd.f32 %v3840_v26, %v3839_v7 }
0x1492   : > { %v3842_v37 = vrot.slane %v3841_v36, 4 }
0x1494   : > { %v3843_v38 = vadd.f32 %v3842_v37, %v3841_v36  ;;  %v8991_v36 = vld [vmem:[#allocation2] sm:$0xff] }
0x1496   : > { %v3844_v39 = vrot.slane %v3843_v38, 2 }
0x1498   : > { %v3845_v21 = vadd.f32 %v3844_v39, %v3843_v38 }
0x149a   : > { %v3846_v40 = vrot.slane %v3845_v21, 1 }
0x149c   : > { %v3847_v24 = vadd.f32 %v3846_v40, %v3845_v21  ;;  %v8995_v40 = vld [vmem:[#allocation2 + $0x8] sm:$0xff] }
0x149e   : > { %v3848_v41 = vmax.f32 %v3847_v24, 1e-30 }
0x14a0   : > { %8035 = vrcp.f32 %v3848_v41 }
0x14aa   : > { %v8036_v42 = vpop.eup %8035 }
0x14ab   : > { %v3850_v43 = vmul.f32 %v8036_v42, %v3837_v10  ;;  %v3851_v44 = vmul.f32 %v8036_v42, %v3838_v35  ;;  %v6726_v10 = vld [vmem:[#allocation11] ss:$0 sm:$0xff] }
0x14ac   : > { %v630_v37 = vmul.f32 %v8991_v36, %v6726_v10  ;;  %v631_v24 = vmul.f32 %v8995_v40, %v6726_v10 }
0x14ad   : > { %3860 = vxpose.xlu1.b32.start [1/2] (short) (narrow) %v3850_v43, 16 }
0x14ae   : > { %v633_v21 = vsel %vm632_vm2, %v630_v37, 0.0 }
0x14b1   : > { %3861 = vxpose.xlu1.b32.end [2/2] (short) (narrow) %v3851_v44, 16  ;;  %v636_v44 = vsel %vm632_vm2, %v631_v24, 0.0 }
0x14ff   : > { %v4071_v62 = vpop.xlane.xlu0 %4070 }
0x1503   : > { %v4074_v2 = vpop.xlane.xlu0 %4073 }
0x152d   : > { %v3876_v45 = vpop.trf.xlu1 }
0x152e   : > { %7342 = vmatprep.mubr.msk.f32.mxu0 %vm890_vm9, %v3876_v45 }
0x1531   : > { %v3877_v51 = vpop.trf.xlu1 }
0x1532   : > { %7343 = vmatmul.mubr.msk.f32.vlgmr.msra.gmra.mrb[24].mxu0 %vm890_vm9, %v3877_v51 }
0x1533   : > { %7762 = vmatpush3.bf16.xpose.msk.msra.mxu0 %vm8668_vm4, %v7760_v6  ;;  %7360 = vmatprep.mubr.msk.f32.mxu0 %vm8353_vm3, %v8354_v16 }
0x1534   : > { %7768 = vmatprep.subr.bf16.mxu0 %v7767_v50 }
0x153a   : > { %7361 = vmatmul.mubr.msk.f32.vlgmr.msra.gmra.mrb[26].mxu0 %vm632_vm2, %v4060_v54 }
0x153b   : > { %7770 = vmatpush3.bf16.msra.mxu0 %v7767_v50  ;;  %7378 = vmatprep.mubr.msk.f32.mxu0 %vm632_vm2, %v8927_v34 }
0x153c   : > { %7772 = vmatprep.subr.bf16.mxu0 %v7771_v55 }
0x153f   : > { %7774 = vmatpush3.bf16.msra.mxu0 %v7771_v55 }
0x1542   : > { %7379 = vmatmul.mubr.msk.f32.vlgmr.msra.gmra.mrb[28].mxu0 %vm632_vm2, %v8929_v11 }
0x1605   : > { %v7344_v57 = vpop.f32.mrb[24].mxu0 }
0x1606   : > { %v8973_v60 = vadd.f32 %v7344_v57, %v8970_v56  ;;  %v8975_v61 = vpop.f32.mrb[25].mxu0 }
0x160d   : > { %v4150_v63 = vpop.f32.mrb[26].mxu0 }
0x160e   : > { %v4157_v0 = vrot.slane %v4150_v63, %v8677_v30  ;;  %v7362_v1 = vpop.f32.mrb[27].mxu0 }
0x1610   : > { %v4158_v3 = vadd.f32 %v4157_v0, %v4071_v62  ;;  %v4159_v5 = vadd.f32 %v4157_v0, %v4074_v2 }
0x1612   : > { %vm4160_vm0 = vcmp.gt.f32.partialorder %v4158_v3, 0.0  ;;  %vm4161_vm1 = vcmp.gt.f32.partialorder %v4159_v5, 0.0  ;;  %v4162_v14 = vmul.f32 0.2, %v4158_v3  ;;  %v4163_v6 = vmul.f32 0.2, %v4159_v5 }
0x1614   : > { %v4164_v8 = vsel %vm4160_vm0, %v4158_v3, %v4162_v14  ;;  %v4165_v27 = vsel %vm4161_vm1, %v4159_v5, %v4163_v6 }
0x1615   : > { %v4166_v46 = vsel %vm616_vm5, %v4164_v8, -1e+09  ;;  %v4167_v12 = vsel %vm617_vm6, %v4165_v27, -1e+09  ;;  %v7380_v47 = vpop.f32.mrb[28].mxu0 }
0x1616   : > { %v4168_v17 = vsel %vm890_vm9, %v4166_v46, -inf  ;;  %v4169_v18 = vsel %vm890_vm9, %v4167_v12, -inf  ;;  %v4394_v19 = vpop.f32.mrb[29].mxu0  ;;  %v4414_v29 = vmul.f32 %v7380_v47, %v6826_v9 }
0x1617   : > { %v4170_v25 = vmax.f32 %v4168_v17, %v4169_v18  ;;  %v4413_v28 = vmul.f32 %v6826_v9, %v4394_v19  ;;  %v8984_v13 = vpack.c.bf16 %v7380_v47, %v4394_v19  ;;  %v6727_v9 = vld [vmem:[%s9389_s8] ss:$0 sm:$0xff] }
0x1618   : > { %v4418_v26 = vsel %vm632_vm2, %v4414_v29, 0.0 }
0x1619   : > { %v4171_v4 = vrot.slane %v4170_v25, 4  ;;  %7780 = vmatprep.subr.bf16.mxu0 %v8984_v13  ;;  %v4415_v31 = vsel %vm632_vm2, %v4413_v28, 0.0 }
0x161a   : > { %7782 = vmatpush3.bf16.msra.mxu0 %v8984_v13  ;;  %4416 = vadd.xlane.f32.xlu0 %v4415_v31 }
0x161b   : > { %v4172_v35 = vmax.f32 %v4170_v25, %v4171_v4  ;;  %7791 = vmatprep.subr.bf16.mxu0 %v8352_v15 }
0x161d   : > { %v4173_v7 = vrot.slane %v4172_v35, 2 }
0x161e   : > { %4419 = vadd.xlane.f32.xlu0 %v4418_v26 }
0x161f   : > { %v4174_v38 = vmax.f32 %v4172_v35, %v4173_v7 }
0x1621   : > { %v4175_v39 = vrot.slane %v4174_v38, 1 }
0x1622   : > { %634 = vadd.xlane.f32.xlu0 %v633_v21 }
0x1623   : > { %v4176_v41 = vmax.f32 %v4174_v38, %v4175_v39 }
0x1625   : > { %v4177_v42 = vsub.f32 %v4166_v46, %v4176_v41  ;;  %v4178_v43 = vsub.f32 %v4167_v12, %v4176_v41 }
0x1626   : > { %637 = vadd.xlane.f32.xlu0 %v636_v44  ;;  %v4671_v44 = vld [vmem:[#allocation4 + $0x168] sm:$0xff] }
0x1627   : > { %v4179_v45 = vmul.f32 1.442695, %v4177_v42  ;;  %v4181_v48 = vmul.f32 1.442695, %v4178_v43  ;;  %v4670_v43 = vld [vmem:[#allocation4 + $0x160] sm:$0xff] }
0x1629   : > { %8037 = vpow2.f32 %v4179_v45 }
0x162a   : > { %8039 = vpow2.f32 %v4181_v48 }
0x1633   : > { %v8038_v49 = vpop.eup %8037 }
0x1634   : > { %v8040_v50 = vpop.eup %8039  ;;  %v4183_v51 = vmul.f32 %v8038_v49, %v8699_v58  ;;  %v7783_v49 = vpack.c.bf16 %v4671_v44, %v4670_v43 }
0x1635   : > { %v4184_v52 = vmul.f32 %v8040_v50, %v8704_v59 }
0x1636   : > { %v4185_v53 = vsel %vm890_vm9, %v4183_v51, 0.0 }
0x1637   : > { %v4186_v54 = vsel %vm890_vm9, %v4184_v52, 0.0 }
0x1638   : > { %v4187_v55 = vadd.f32 %v4186_v54, %v4185_v53  ;;  %v4672_v53 = vld [vmem:[#allocation4 + $0x170] sm:$0xff]  ;;  %v4673_v54 = vld [vmem:[#allocation4 + $0x178] sm:$0xff] }
0x163a   : > { %v4188_v57 = vrot.slane %v4187_v55, 4 }
0x163c   : > { %v4189_v62 = vadd.f32 %v4188_v57, %v4187_v55  ;;  %v4406_v57 = vld [vmem:[#allocation8 + $0xa] sm:$0x1] }
0x163e   : > { %v4190_v63 = vrot.slane %v4189_v62, 2 }
0x1640   : > { %v4191_v0 = vadd.f32 %v4190_v63, %v4189_v62  ;;  %v7787_v62 = vpack.c.bf16 %v4673_v54, %v4672_v53 }
0x1642   : > { %v4192_v1 = vrot.slane %v4191_v0, 1 }
0x1644   : > { %v4193_v2 = vadd.f32 %v4192_v1, %v4191_v0 }
0x1646   : > { %v4194_v3 = vmax.f32 %v4193_v2, 1e-30  ;;  %v8355_v2 = vmov 0  }
0x1647   : > { %7981 = vset.pattern.permute.xlu0 %v8355_v2 }
0x1648   : > { %8041 = vrcp.f32 %v4194_v3  ;;  %v6821_v3 = vld [vmem:[#allocation9 + $0x9] ss:$0 sm:$0xff] }
0x1652   : > { %v8042_v5 = vpop.eup %8041 }
0x1653   : > { %v4196_v14 = vmul.f32 %v8042_v5, %v4183_v51  ;;  %v4197_v6 = vmul.f32 %v8042_v5, %v4184_v52  ;;  %v3965_v5 = vadd.f32 %v8970_v56, %v8975_v61 }
0x1655   : > { %4206 = vxpose.xlu1.b32.start [1/2] (short) (narrow) %v4196_v14, 16 }
0x1659   : > { %4207 = vxpose.xlu1.b32.end [2/2] (short) (narrow) %v4197_v6, 16 }
0x16a7   : > { %v9003_v8 = vpop.xlane.xlu0 %4416 }
0x16ab   : > { %v9005_v27 = vpop.xlane.xlu0 %4419 }
0x16af   : > { %v635_v46 = vpop.xlane.xlu0 %634 }
0x16b0   : > { %v645_v12 = vadd.f32 %v6727_v9, %v635_v46 }
0x16b2   : > { %v648_v18 = vsel %vm647_vm7, %v645_v12, -inf }
0x16b3   : > { %v638_v47 = vpop.xlane.xlu0 %637 }
0x16b4   : > { %v646_v17 = vadd.f32 %v6727_v9, %v638_v47 }
0x16b6   : > { %v649_v19 = vsel %vm647_vm7, %v646_v17, -inf }
0x16b7   : > { %v650_v25 = vmax.f32 %v648_v18, %v649_v19 }
0x16b9   : > { %v651_v28 = vrot.slane %v650_v25, 4 }
0x16bb   : > { %v652_v4 = vmax.f32 %v650_v25, %v651_v28 }
0x16bd   : > { %v653_v29 = vrot.slane %v652_v4, 2 }
0x16bf   : > { %v654_v31 = vmax.f32 %v652_v4, %v653_v29 }
0x16c1   : > { %v655_v10 = vrot.slane %v654_v31, 1 }
0x16c3   : > { %v656_v35 = vmax.f32 %v654_v31, %v655_v10 }
0x16c5   : > { %v657_v7 = vsub.f32 %v645_v12, %v656_v35  ;;  %v658_v26 = vsub.f32 %v646_v17, %v656_v35  ;;  %v3974_v12 = vmax.f32 %v8973_v60, 0.0  ;;  %v3973_v17 = vmax.f32 %v3965_v5, 0.0  ;;  %v6835_v60 = vld [vmem:[#allocation6 + $0xb] ss:$0 sm:$0xff] }
0x16c7   : > { %v659_v37 = vmul.f32 1.442695, %v657_v7  ;;  %v661_v38 = vmul.f32 1.442695, %v658_v26 }
0x16c9   : > { %8043 = vpow2.f32 %v659_v37 }
0x16ca   : > { %8045 = vpow2.f32 %v661_v38 }
0x16d3   : > { %v9012_v39 = vpop.eup %8043 }
0x16d4   : > { %v8046_v21 = vpop.eup %8045  ;;  %v663_v24 = vsel %vm647_vm7, %v9012_v39, 0.0 }
0x16d5   : > { %v664_v41 = vsel %vm647_vm7, %v8046_v21, 0.0  ;;  %v4222_v42 = vpop.trf.xlu1 }
0x16d6   : > { %v665_v45 = vadd.f32 %v664_v41, %v663_v24  ;;  %7367 = vmatprep.mubr.msk.f32.mxu1 %vm890_vm9, %v4222_v42 }
0x16d8   : > { %v666_v48 = vrot.slane %v665_v45, 4 }
0x16d9   : > { %v4223_v50 = vpop.trf.xlu1 }
0x16da   : > { %v667_v51 = vadd.f32 %v666_v48, %v665_v45  ;;  %7368 = vmatmul.mubr.msk.f32.vlgmr.msra.gmra.mrb[30].mxu1 %vm890_vm9, %v4223_v50 }
0x16db   : > { %7778 = vmatpush3.bf16.xpose.msk.msra.mxu1 %vm8668_vm4, %v8984_v13  ;;  %7385 = vmatprep.mubr.msk.f32.mxu1 %vm8353_vm3, %v8354_v16 }
0x16dc   : > { %7784 = vmatprep.subr.bf16.mxu1 %v7783_v49  ;;  %v668_v52 = vrot.slane %v667_v51, 2 }
0x16de   : > { %v669_v55 = vadd.f32 %v668_v52, %v667_v51 }
0x16e0   : > { %v670_v63 = vrot.slane %v669_v55, 1 }
0x16e2   : > { %7386 = vmatmul.mubr.msk.f32.vlgmr.msra.gmra.mrb[32].mxu1 %vm632_vm2, %v4406_v57  ;;  %v671_v0 = vadd.f32 %v670_v63, %v669_v55 }
0x16e3   : > { %7786 = vmatpush3.bf16.msra.mxu1 %v7783_v49  ;;  %7403 = vmatprep.mubr.msk.f32.mxu1 %vm632_vm2, %v8927_v34 }
0x16e4   : > { %7788 = vmatprep.subr.bf16.mxu1 %v7787_v62  ;;  %8047 = vrcp.f32 %v671_v0 }
0x16e7   : > { %7790 = vmatpush3.bf16.msra.mxu1 %v7787_v62 }
0x16ea   : > { %7404 = vmatmul.mubr.msk.f32.vlgmr.msra.gmra.mrb[34].mxu1 %vm632_vm2, %v8929_v11 }
0x16ee   : > { %v8048_v13 = vpop.eup %8047 }
0x16ef   : > { %v9029_v1 = vmul.f32 %v8048_v13, %v8046_v21  ;;  %v673_v62 = vmul.f32 %v8048_v13, %v9012_v39 }
0x17ad   : > { %v7369_v14 = vpop.f32.mrb[30].mxu1 }
0x17ae   : > { %v4316_v6 = vadd.f32 %v7369_v14, %v6821_v3  ;;  %v4310_v9 = vpop.f32.mrb[31].mxu1 }
0x17af   : > { %v4311_v46 = vadd.f32 %v6821_v3, %v4310_v9 }
0x17b0   : > { %v4320_v47 = vmax.f32 %v4316_v6, 0.0 }
0x17b1   : > { %v4319_v18 = vmax.f32 %v4311_v46, 0.0 }
0x17b2   : > { %v9035_v19 = vadd.f32 %v4320_v47, %v3974_v12 }
0x17b3   : > { %v9037_v25 = vadd.f32 %v4319_v18, %v3973_v17 }
0x17b5   : > { %v4496_v28 = vpop.f32.mrb[32].mxu1 }
0x17b6   : > { %v4503_v4 = vrot.slane %v4496_v28, %v8677_v30  ;;  %v7387_v29 = vpop.f32.mrb[33].mxu1 }
0x17b8   : > { %v4504_v31 = vadd.f32 %v4503_v4, %v9003_v8  ;;  %v4505_v56 = vadd.f32 %v4503_v4, %v9005_v27 }
0x17ba   : > { %vm4506_vm8 = vcmp.gt.f32.partialorder %v4504_v31, 0.0  ;;  %vm4507_vm10 = vcmp.gt.f32.partialorder %v4505_v56, 0.0  ;;  %v4508_v61 = vmul.f32 0.2, %v4504_v31  ;;  %v4509_v10 = vmul.f32 0.2, %v4505_v56 }
0x17bc   : > { %v4510_v35 = vsel %vm4506_vm8, %v4504_v31, %v4508_v61  ;;  %v4511_v7 = vsel %vm4507_vm10, %v4505_v56, %v4509_v10 }
0x17bd   : > { %v4512_v26 = vsel %vm616_vm5, %v4510_v35, -1e+09  ;;  %v4513_v37 = vsel %vm617_vm6, %v4511_v7, -1e+09  ;;  %v7405_v38 = vpop.f32.mrb[34].mxu1 }
0x17be   : > { %v4514_v21 = vsel %vm890_vm9, %v4512_v26, -inf  ;;  %v4515_v8 = vsel %vm890_vm9, %v4513_v37, -inf  ;;  %v4760_v24 = vmul.f32 %v7405_v38, %v6835_v60  ;;  %v4740_v27 = vpop.f32.mrb[35].mxu1 }
0x17bf   : > { %v4516_v41 = vmax.f32 %v4514_v21, %v4515_v8  ;;  %v4759_v42 = vmul.f32 %v6835_v60, %v4740_v27  ;;  %v7792_v43 = vpack.c.bf16 %v7405_v38, %v4740_v27 }
0x17c0   : > { %v4764_v44 = vsel %vm632_vm2, %v4760_v24, 0.0 }
0x17c1   : > { %v4517_v45 = vrot.slane %v4516_v41, 4  ;;  %7796 = vmatprep.subr.bf16.mxu1 %v7792_v43  ;;  %4765 = vadd.xlane.f32.xlu0 %v4764_v44  ;;  %v4761_v31 = vsel %vm632_vm2, %v4759_v42, 0.0 }
0x17c2   : > { %7798 = vmatpush3.bf16.msra.mxu1 %v7792_v43 }
0x17c3   : > { %v4518_v48 = vmax.f32 %v4516_v41, %v4517_v45  ;;  %7805 = vmatprep.subr.bf16.mxu1 %v8352_v15 }
0x17c5   : > { %v4519_v49 = vrot.slane %v4518_v48, 2 }
0x17c7   : > { %v4520_v50 = vmax.f32 %v4518_v48, %v4519_v49 }
0x17c9   : > { %v4521_v51 = vrot.slane %v4520_v50, 1 }
0x17cb   : > { %v4522_v52 = vmax.f32 %v4520_v50, %v4521_v51 }
0x17cd   : > { %v4523_v53 = vsub.f32 %v4512_v26, %v4522_v52  ;;  %v4524_v54 = vsub.f32 %v4513_v37, %v4522_v52 }
0x17cf   : > { %v4525_v55 = vmul.f32 1.442695, %v4523_v53  ;;  %v4527_v57 = vmul.f32 1.442695, %v4524_v54 }
0x17d1   : > { %8049 = vpow2.f32 %v4525_v55 }
0x17d2   : > { %8051 = vpow2.f32 %v4527_v57 }
0x17d7   : > { %677 = vperm.xlu0 %7981, %v673_v62  }
0x17db   : > { %v8050_v63 = vpop.eup %8049 }
0x17dc   : > { %v8052_v0 = vpop.eup %8051  ;;  %v4529_v3 = vmul.f32 %v8050_v63, %v8699_v58 }
0x17dd   : > { %v4530_v5 = vmul.f32 %v8052_v0, %v8704_v59 }
0x17de   : > { %v4531_v14 = vsel %vm890_vm9, %v4529_v3, 0.0 }
0x17df   : > { %v4532_v6 = vsel %vm890_vm9, %v4530_v5, 0.0 }
0x17e0   : > { %v4533_v9 = vadd.f32 %v4532_v6, %v4531_v14 }
0x17e2   : > { %v4534_v46 = vrot.slane %v4533_v9, 4 }
0x17e4   : > { %v4535_v12 = vadd.f32 %v4534_v46, %v4533_v9 }
0x17e6   : > { %v4536_v47 = vrot.slane %v4535_v12, 2 }
0x17e8   : > { %v4537_v17 = vadd.f32 %v4536_v47, %v4535_v12 }
0x17ea   : > { %v4538_v18 = vrot.slane %v4537_v17, 1 }
0x17ec   : > { %v4539_v28 = vadd.f32 %v4538_v18, %v4537_v17 }
0x17ee   : > { %v4540_v4 = vmax.f32 %v4539_v28, 1e-30 }
0x17f0   : > { %8053 = vrcp.f32 %v4540_v4 }
0x17fa   : > { %v8054_v39 = vpop.eup %8053 }
0x17fb   : > { %v4542_v13 = vmul.f32 %v8054_v39, %v4529_v3  ;;  %v4543_v29 = vmul.f32 %v8054_v39, %v4530_v5 }
0x17fd   : > { %4552 = vxpose.xlu1.b32.start [1/2] (short) (narrow) %v4542_v13, 16 }
0x1801   : > { %4553 = vxpose.xlu1.b32.end [2/2] (short) (narrow) %v4543_v29, 16 }
0x181f   : > { %7982 = vset.pattern.permute.xlu1 %v8355_v2  ;;  %v4752_v2 = vld [vmem:[#allocation8 + $0xb] sm:$0x1] }
0x1828   : > { %4762 = vadd.xlane.f32.xlu1 %v4761_v31 }
0x1839   : > { %682 = vperm.xlu1 %7982, %v9029_v1   ;;  %v6830_v1 = vld [vmem:[#allocation9 + $0xa] ss:$0 sm:$0xff] }
0x184e   : > { %v4766_v27 = vpop.xlane.xlu0 %4765 }
0x187d   : > { %v4568_v56 = vpop.trf.xlu1 }
0x187e   : > { %7392 = vmatprep.mubr.msk.f32.mxu0 %vm890_vm9, %v4568_v56  ;;  %v5095_v56 = vld [vmem:[#allocation12] sm:$0xff] }
0x1881   : > { %v4569_v61 = vpop.trf.xlu1 }
0x1882   : > { %7393 = vmatmul.mubr.msk.f32.vlgmr.msra.gmra.mrb[30].mxu0 %vm890_vm9, %v4569_v61 }
0x1883   : > { %7794 = vmatpush3.bf16.xpose.msk.msra.mxu0 %vm8668_vm4, %v7792_v43  ;;  %7410 = vmatprep.mubr.msk.f32.mxu0 %vm8353_vm3, %v8354_v16 }
0x1884   : > { %7799 = vmatprep.subr.bf16.mxu0 %v8352_v15 }
0x188a   : > { %7411 = vmatmul.mubr.msk.f32.vlgmr.msra.gmra.mrb[32].mxu0 %vm632_vm2, %v4752_v2  ;;  %v5097_v2 = vld [vmem:[#allocation12 + $0x10] sm:$0xff] }
0x188b   : > { %7428 = vmatprep.mubr.msk.f32.mxu0 %vm8353_vm3, %v8354_v16 }
0x18b5   : > { %v4763_v41 = vpop.xlane.xlu1 %4762 }
0x1955   : > { %v7394_v10 = vpop.f32.mrb[30].mxu0 }
0x1956   : > { %v4662_v60 = vadd.f32 %v7394_v10, %v6830_v1  ;;  %v4656_v35 = vpop.f32.mrb[31].mxu0 }
0x1957   : > { %v4657_v7 = vadd.f32 %v6830_v1, %v4656_v35  ;;  %v5098_v1 = vld [vmem:[#allocation12 + $0x18] sm:$0xff] }
0x1958   : > { %v4666_v26 = vmax.f32 %v4662_v60, 0.0  ;;  %v9089_v10 = vpack.c.bf16 %v5098_v1, %v5097_v2  ;;  %v6765_v60 = vld [vmem:[#allocation11 + $0x1] ss:$0 sm:$0xff] }
0x1959   : > { %v4665_v37 = vmax.f32 %v4657_v7, 0.0  ;;  %v2096_v35 = vmul.f32 %v6765_v60, %v8807_v23  ;;  %v9101_v7 = vld [vmem:[#allocation11 + $0x2] ss:$0 sm:$0xff] }
0x195a   : > { %v9069_v20 = vadd.f32 %v4666_v26, %v9035_v19 }
0x195b   : > { %v9072_v38 = vadd.f32 %v4665_v37, %v9037_v25  ;;  %v2100_v26 = vsel %vm632_vm2, %v2096_v35, 0.0  ;;  %v3561_v37 = vmul.f32 %v9101_v7, %v8927_v34 }
0x195d   : > { %v4842_v21 = vpop.f32.mrb[32].mxu0 }
0x195e   : > { %v4849_v8 = vrot.slane %v4842_v21, %v8677_v30  ;;  %v7412_v24 = vpop.f32.mrb[33].mxu0  ;;  %v3563_v21 = vsel %vm632_vm2, %v3561_v37, 0.0 }
0x195f   : > { %v678_v24 = vpop.permute.xlu0 %677 }
0x1960   : > { %v4850_v42 = vadd.f32 %v4849_v8, %v4763_v41  ;;  %v4851_v43 = vadd.f32 %v4849_v8, %v4766_v27  ;;  %v683_v8 = vpop.permute.xlu1 %682  ;;  %v685_v41 = vmul.f32 %v8991_v36, %v678_v24 }
0x1961   : > { %v686_v27 = vmul.f32 %v8995_v40, %v683_v8 }
0x1962   : > { %vm4852_vm4 = vcmp.gt.f32.partialorder %v4850_v42, 0.0  ;;  %vm4853_vm11 = vcmp.gt.f32.partialorder %v4851_v43, 0.0  ;;  %v4854_v44 = vmul.f32 0.2, %v4850_v42  ;;  %v4855_v45 = vmul.f32 0.2, %v4851_v43 }
0x1964   : > { %v4856_v48 = vsel %vm4852_vm4, %v4850_v42, %v4854_v44  ;;  %v4857_v49 = vsel %vm4853_vm11, %v4851_v43, %v4855_v45  ;;  %v688_v42 = vsel %vm632_vm2, %v686_v27, 0.0  ;;  %v687_v43 = vsel %vm632_vm2, %v685_v41, 0.0 }
0x1965   : > { %v4858_v19 = vsel %vm616_vm5, %v4856_v48, -1e+09  ;;  %v4859_v25 = vsel %vm617_vm6, %v4857_v49, -1e+09  ;;  %v689_v44 = vadd.f32 %v688_v42, %v687_v43 }
0x1966   : > { %v4860_v50 = vsel %vm890_vm9, %v4858_v19, -inf  ;;  %v4861_v30 = vsel %vm890_vm9, %v4859_v25, -inf }
0x1967   : > { %v4862_v51 = vmax.f32 %v4860_v50, %v4861_v30  ;;  %v690_v45 = vrot.slane %v689_v44, 4  ;;  %v5093_v30 = vld [vmem:[%s9390_s9 + $0x10] sm:$0xff] }
0x1969   : > { %v4863_v52 = vrot.slane %v4862_v51, 4  ;;  %v691_v48 = vadd.f32 %v690_v45, %v689_v44 }
0x196b   : > { %v4864_v53 = vmax.f32 %v4862_v51, %v4863_v52  ;;  %v692_v49 = vrot.slane %v691_v48, 2  ;;  %v5094_v51 = vld [vmem:[%s9390_s9 + $0x18] sm:$0xff] }
0x196d   : > { %v4865_v54 = vrot.slane %v4864_v53, 2  ;;  %v693_v40 = vadd.f32 %v692_v49, %v691_v48 }
0x196f   : > { %v4866_v55 = vmax.f32 %v4864_v53, %v4865_v54  ;;  %v9128_v53 = vpack.c.bf16 %v5094_v51, %v5093_v30  ;;  %v694_v54 = vrot.slane %v693_v40, 1 }
0x1971   : > { %v4867_v57 = vrot.slane %v4866_v55, 1 }
0x1973   : > { %v4868_v62 = vmax.f32 %v4866_v55, %v4867_v57  ;;  %v695_v55 = vadd.f32 %v694_v54, %v693_v40 }
0x1975   : > { %v4869_v63 = vsub.f32 %v4858_v19, %v4868_v62  ;;  %v4870_v0 = vsub.f32 %v4859_v25, %v4868_v62  ;;  %v5091_v19 = vld [vmem:[%s9390_s9] sm:$0xff]  ;;  %v5092_v25 = vld [vmem:[%s9390_s9 + $0x8] sm:$0xff] }
0x1976   : > { %v9118_v36 = vpack.c.bf16 %v5092_v25, %v5091_v19 }
0x1977   : > { %v4871_v3 = vmul.f32 1.442695, %v4869_v63  ;;  %v4873_v5 = vmul.f32 1.442695, %v4870_v0  ;;  %v6839_v63 = vld [vmem:[#allocation9 + $0xb] ss:$0 sm:$0xff] }
0x1979   : > { %8055 = vpow2.f32 %v4871_v3 }
0x197a   : > { %8057 = vpow2.f32 %v4873_v5 }
0x1983   : > { %v8056_v32 = vpop.eup %8055 }
0x1984   : > { %v8058_v33 = vpop.eup %8057  ;;  %v4875_v14 = vmul.f32 %v8056_v32, %v8699_v58  ;;  %v5096_v58 = vld [vmem:[#allocation12 + $0x8] sm:$0xff] }
0x1985   : > { %v4876_v6 = vmul.f32 %v8058_v33, %v8704_v59  ;;  %v9085_v59 = vpack.c.bf16 %v5096_v58, %v5095_v56  ;;  %v6766_v58 = vld [vmem:[%s9389_s8 + $0x1] ss:$0 sm:$0xff] }
0x1986   : > { %v4877_v9 = vsel %vm890_vm9, %v4875_v14, 0.0 }
0x1987   : > { %v4878_v46 = vsel %vm890_vm9, %v4876_v6, 0.0  ;;  %7801 = vmatpush3.bf16.msra.mxu0 %v9085_v59 }
0x1988   : > { %v4879_v12 = vadd.f32 %v4878_v46, %v4877_v9  ;;  %7802 = vmatprep.subr.bf16.mxu0 %v8352_v15  ;;  %v9151_v46 = vld [vmem:[%s9392_s11] sm:$0x1] }
0x198a   : > { %v4880_v47 = vrot.slane %v4879_v12, 4 }
0x198b   : > { %7804 = vmatpush3.bf16.msra.mxu0 %v9089_v10 }
0x198c   : > { %v4881_v17 = vadd.f32 %v4880_v47, %v4879_v12  ;;  %7811 = vmatprep.subr.bf16.mxu0 %v8352_v15 }
0x198e   : > { %v4882_v18 = vrot.slane %v4881_v17, 2  ;;  %7429 = vmatmul.mubr.f32.vlgmr.msra.gmra.mrb[34].mxu0 %v8354_v16 }
0x198f   : > { %7813 = vmatpush3.bf16.msra.mxu0 %v9085_v59  ;;  %7450 = vmatprep.mubr.msk.f32.mxu0 %vm8353_vm3, %v8354_v16 }
0x1990   : > { %v4883_v28 = vadd.f32 %v4882_v18, %v4881_v17  ;;  %7814 = vmatprep.subr.bf16.mxu0 %v8352_v15 }
0x1992   : > { %v4884_v4 = vrot.slane %v4883_v28, 1 }
0x1993   : > { %7816 = vmatpush3.bf16.msra.mxu0 %v9089_v10 }
0x1994   : > { %v4885_v39 = vadd.f32 %v4884_v4, %v4883_v28  ;;  %7823 = vmatprep.subr.bf16.mxu0 %v8352_v15 }
0x1996   : > { %v4886_v13 = vmax.f32 %v4885_v39, 1e-30 }
0x1998   : > { %8059 = vrcp.f32 %v4886_v13 }
0x19a2   : > { %v8060_v29 = vpop.eup %8059 }
0x19a3   : > { %v4888_v31 = vmul.f32 %v8060_v29, %v4875_v14  ;;  %v4889_v61 = vmul.f32 %v8060_v29, %v4876_v6 }
0x19a5   : > { %4898 = vxpose.xlu0.b32.start [1/2] (short) (narrow) %v4888_v31, 16 }
0x19a9   : > { %4899 = vxpose.xlu0.b32.end [2/2] (short) (narrow) %v4889_v61, 16 }
0x19d6   : > { %2101 = vadd.xlane.f32.xlu0 %v2100_v26 }
0x19da   : > { %3564 = vadd.xlane.f32.xlu0 %v3563_v21 }
0x1a25   : > { %v4914_v50 = vpop.trf.xlu0 }
0x1a26   : > { %7417 = vmatprep.mubr.msk.f32.mxu1 %vm890_vm9, %v4914_v50 }
0x1a29   : > { %v4915_v52 = vpop.trf.xlu0 }
0x1a2a   : > { %7418 = vmatmul.mubr.msk.f32.vlgmr.msra.gmra.mrb[36].mxu1 %vm890_vm9, %v4915_v52 }
0x1a2b   : > { %7807 = vmatpush3.bf16.msra.mxu1 %v9118_v36  ;;  %7439 = vmatprep.mubr.msk.f32.mxu1 %vm8353_vm3, %v8354_v16 }
0x1a2c   : > { %7808 = vmatprep.subr.bf16.mxu1 %v8352_v15 }
0x1a2f   : > { %7810 = vmatpush3.bf16.msra.mxu1 %v9128_v53 }
0x1a30   : > { %7817 = vmatprep.subr.bf16.mxu1 %v8352_v15 }
0x1a32   : > { %7440 = vmatmul.mubr.msk.f32.vlgmr.msra.gmra.mrb[38].mxu1 %vm632_vm2, %v695_v55 }
0x1a33   : > { %7819 = vmatpush3.bf16.msra.mxu1 %v9118_v36  ;;  %7461 = vmatprep.mubr.msk.f32.mxu1 %vm8353_vm3, %v8354_v16 }
0x1a34   : > { %7820 = vmatprep.subr.bf16.mxu1 %v8352_v15 }
0x1a37   : > { %7822 = vmatpush3.bf16.msra.mxu1 %v9128_v53 }
0x1a38   : > { %7829 = vmatprep.subr.bf16.mxu1 %v8352_v15 }
0x1a61   : > { %v5169_v57 = vpop.f32.mrb[34].mxu0 }
0x1a62   : > { %v7430_v62 = vpop.f32.mrb[35].mxu0 }
0x1a63   : > { %v2102_v61 = vpop.xlane.xlu0 %2101 }
0x1a64   : > { %v2110_v2 = vadd.f32 %v6766_v58, %v2102_v61 }
0x1a66   : > { %v2112_v35 = vsel %vm647_vm7, %v2110_v2, -inf }
0x1afd   : > { %v7419_v0 = vpop.f32.mrb[36].mxu1 }
0x1afe   : > { %v5008_v3 = vadd.f32 %v7419_v0, %v6839_v63  ;;  %v5002_v5 = vpop.f32.mrb[37].mxu1 }
0x1aff   : > { %v5003_v32 = vadd.f32 %v6839_v63, %v5002_v5 }
0x1b00   : > { %v5012_v33 = vmax.f32 %v5008_v3, 0.0 }
0x1b01   : > { %v5011_v14 = vmax.f32 %v5003_v32, 0.0 }
0x1b02   : > { %v9143_v6 = vadd.f32 %v5012_v33, %v9069_v20  ;;  %v2095_v20 = vmul.f32 %v6765_v60, %v8805_v22 }
0x1b03   : > { %v9146_v9 = vadd.f32 %v5011_v14, %v9072_v38 }
0x1b04   : > { %v2097_v38 = vsel %vm632_vm2, %v2095_v20, 0.0 }
0x1b05   : > { %v5242_v12 = vpop.f32.mrb[38].mxu1 }
0x1b06   : > { %v5243_v47 = vadd.f32 %v5242_v12, %v5169_v57  ;;  %v7441_v17 = vpop.f32.mrb[39].mxu1 }
0x1b08   : > { %v5246_v18 = vadd.f32 %v5243_v47, %v9151_v46 }
0x1b0a   : > { %8061 = vtanh.f32 %v5246_v18  ;;  %v6846_v4 = vmul.f32 -1.442695, %v5246_v18 }
0x1b0c   : > { %8063 = vpow2.f32 %v6846_v4 }
0x1b14   : > { %v8062_v28 = vpop.eup %8061 }
0x1b15   : > { %5256 = vrot.lane.b32.xlu1 %v8062_v28, %s8356_s19 }
0x1b16   : > { %v8064_v39 = vpop.eup %8063 }
0x1b17   : > { %v5250_v13 = vadd.f32 1.0, %v8064_v39 }
0x1b19   : > { %8065 = vrcp.f32 %v5250_v13 }
0x1b23   : > { %v8066_v29 = vpop.eup %8065 }
0x1b24   : > { %v5254_v62 = vmul.f32 0.0, %v8066_v29 }
0x1b39   : > { %2098 = vadd.xlane.f32.xlu1 %v2097_v38 }
0x1b87   : > { %v5257_v31 = vpop.permute.xlu1 %5256 }
0x1b88   : > { %v5259_v56 = vmul.f32 %v8066_v29, %v5257_v31 }
0x1b8a   : > { %5261 = vrot.lane.b32.xlu1 %v5259_v56, %s8357_s20 }
0x1bc6   : > { %v2099_v1 = vpop.xlane.xlu1 %2098 }
0x1bc7   : > { %v2109_v60 = vadd.f32 %v6766_v58, %v2099_v1 }
0x1bc9   : > { %v2111_v26 = vsel %vm647_vm7, %v2109_v60, -inf }
0x1bca   : > { %v2113_v37 = vmax.f32 %v2111_v26, %v2112_v35 }
0x1bcc   : > { %v2114_v21 = vrot.slane %v2113_v37, 4 }
0x1bce   : > { %v2115_v8 = vmax.f32 %v2113_v37, %v2114_v21  ;;  %v3562_v37 = vmul.f32 %v9101_v7, %v8929_v11 }
0x1bd0   : > { %v2116_v24 = vrot.slane %v2115_v8, 2  ;;  %v3566_v21 = vsel %vm632_vm2, %v3562_v37, 0.0  ;;  %v9215_v37 = vmul.f32 0.25, %v9146_v9 }
0x1bd2   : > { %v2117_v27 = vmax.f32 %v2115_v8, %v2116_v24 }
0x1bd4   : > { %v2118_v41 = vrot.slane %v2117_v27, 1 }
0x1bd6   : > { %v2119_v42 = vmax.f32 %v2117_v27, %v2118_v41 }
0x1bd8   : > { %v2120_v43 = vsub.f32 %v2109_v60, %v2119_v42  ;;  %v2121_v44 = vsub.f32 %v2110_v2, %v2119_v42 }
0x1bda   : > { %v2122_v45 = vmul.f32 1.442695, %v2120_v43  ;;  %v2124_v48 = vmul.f32 1.442695, %v2121_v44  ;;  %v6805_v44 = vld [vmem:[%s9389_s8 + $0x2] ss:$0 sm:$0xff] }
0x1bdc   : > { %8067 = vpow2.f32 %v2122_v45  ;;  %v3565_v45 = vpop.xlane.xlu0 %3564 }
0x1bdd   : > { %8069 = vpow2.f32 %v2124_v48  ;;  %v3575_v48 = vadd.f32 %v6805_v44, %v3565_v45 }
0x1be6   : > { %v8068_v49 = vpop.eup %8067 }
0x1be7   : > { %v8070_v19 = vpop.eup %8069  ;;  %v2126_v25 = vsel %vm647_vm7, %v8068_v49, 0.0 }
0x1be8   : > { %v2127_v50 = vsel %vm647_vm7, %v8070_v19, 0.0 }
0x1be9   : > { %v2128_v40 = vadd.f32 %v2127_v50, %v2126_v25 }
0x1beb   : > { %v2129_v30 = vrot.slane %v2128_v40, 4 }
0x1bed   : > { %v2130_v51 = vadd.f32 %v2129_v30, %v2128_v40 }
0x1bef   : > { %v2131_v52 = vrot.slane %v2130_v51, 2 }
0x1bf1   : > { %v2132_v54 = vadd.f32 %v2131_v52, %v2130_v51 }
0x1bf3   : > { %v2133_v55 = vrot.slane %v2132_v54, 1 }
0x1bf5   : > { %v2134_v57 = vadd.f32 %v2133_v55, %v2132_v54 }
0x1bf7   : > { %8071 = vrcp.f32 %v2134_v57 }
0x1bfc   : > { %v5262_v63 = vpop.permute.xlu1 %5261 }
0x1bfd   : > { %v9165_v0 = vadd.f32 %v5262_v63, %v5254_v62 }
0x1bff   : > { %8073 = vtanh.f32 %v9165_v0 }
0x1c01   : > { %v8072_v3 = vpop.eup %8071 }
0x1c02   : > { %v2136_v32 = vmul.f32 %v8072_v3, %v8068_v49  ;;  %v2137_v33 = vmul.f32 %v8072_v3, %v8070_v19  ;;  %v3577_v19 = vsel %vm647_vm7, %v3575_v48, -inf }
0x1c09   : > { %v8074_v5 = vpop.eup %8073 }
0x1c0a   : > { %5267 = vrot.lane.b32.xlu1 %v8074_v5, %s8356_s19 }
0x1c0e   : > { %2140 = vperm.xlu1 %7982, %v2136_v32  }
0x1c12   : > { %2145 = vperm.xlu1 %7982, %v2137_v33  }
0x1c7c   : > { %v5268_v14 = vpop.permute.xlu1 %5267 }
0x1c7d   : > { %v5270_v12 = vmul.f32 %v8066_v29, %v5268_v14 }
0x1c7f   : > { %5272 = vrot.lane.b32.xlu1 %v5270_v12, %s8357_s20 }
0x1c8d   : > { %v2141_v47 = vpop.permute.xlu1 %2140 }
0x1c8e   : > { %v2148_v17 = vmul.f32 %v2141_v47, %v8805_v22 }
0x1c90   : > { %v2150_v20 = vsel %vm632_vm2, %v2148_v17, 0.0 }
0x1c91   : > { %v2146_v18 = vpop.permute.xlu1 %2145 }
0x1c92   : > { %v2149_v28 = vmul.f32 %v2146_v18, %v8807_v23 }
0x1c94   : > { %v2151_v38 = vsel %vm632_vm2, %v2149_v28, 0.0 }
0x1c95   : > { %v2152_v4 = vadd.f32 %v2151_v38, %v2150_v20 }
0x1c97   : > { %v2153_v39 = vrot.slane %v2152_v4, 4 }
0x1c99   : > { %v2154_v13 = vadd.f32 %v2153_v39, %v2152_v4 }
0x1c9b   : > { %v2155_v31 = vrot.slane %v2154_v13, 2 }
0x1c9d   : > { %v2156_v56 = vadd.f32 %v2155_v31, %v2154_v13 }
0x1c9f   : > { %v2157_v58 = vrot.slane %v2156_v56, 1 }
0x1ca1   : > { %v2158_v61 = vadd.f32 %v2157_v58, %v2156_v56 }
0x1ca3   : > { %7462 = vmatmul.mubr.msk.f32.vlgmr.msra.gmra.mrb[40].mxu1 %vm632_vm2, %v2158_v61 }
0x1ca4   : > { %7831 = vmatpush3.bf16.msra.mxu1 %v9118_v36  ;;  %7483 = vmatprep.mubr.msk.f32.mxu1 %vm8353_vm3, %v8354_v16 }
0x1ca5   : > { %7832 = vmatprep.subr.bf16.mxu1 %v8352_v15 }
0x1ca8   : > { %7834 = vmatpush3.bf16.msra.mxu1 %v9128_v53 }
0x1ca9   : > { %7841 = vmatprep.subr.bf16.mxu1 %v8352_v15 }
0x1cf1   : > { %v9181_v22 = vpop.permute.xlu1 %5272 }
0x1cf2   : > { %7451 = vmatmul.mubr.msk.f32.vlgmr.msra.gmra.mrb[36].mxu0 %vm632_vm2, %v9181_v22 }
0x1cf3   : > { %7825 = vmatpush3.bf16.msra.mxu0 %v9085_v59  ;;  %7472 = vmatprep.mubr.msk.f32.mxu0 %vm8353_vm3, %v8354_v16 }
0x1cf4   : > { %7826 = vmatprep.subr.bf16.mxu0 %v8352_v15 }
0x1cf7   : > { %7828 = vmatpush3.bf16.msra.mxu0 %v9089_v10 }
0x1cf8   : > { %7835 = vmatprep.subr.bf16.mxu0 %v8352_v15 }
0x1d76   : > { %v5415_v23 = vpop.f32.mrb[40].mxu1 }
0x1d77   : > { %v7463_v29 = vpop.f32.mrb[41].mxu1 }
0x1dc5   : > { %v5342_v2 = vpop.f32.mrb[36].mxu0 }
0x1dc6   : > { %v5416_v1 = vadd.f32 %v5415_v23, %v5342_v2  ;;  %v7452_v60 = vpop.f32.mrb[37].mxu0 }
0x1dc8   : > { %v5419_v35 = vadd.f32 %v5416_v1, %v9151_v46 }
0x1dca   : > { %8075 = vtanh.f32 %v5419_v35  ;;  %v6849_v8 = vmul.f32 -1.442695, %v5419_v35 }
0x1dcc   : > { %8077 = vpow2.f32 %v6849_v8  ;;  %v6843_v8 = vld [vmem:[#allocation11 + $0x3] ss:$0 sm:$0xff] }
0x1dd4   : > { %v8076_v26 = vpop.eup %8075 }
0x1dd5   : > { %5429 = vrot.lane.b32.xlu1 %v8076_v26, %s8356_s19 }
0x1dd6   : > { %v8078_v24 = vpop.eup %8077 }
0x1dd7   : > { %v5423_v27 = vadd.f32 1.0, %v8078_v24 }
0x1dd9   : > { %8079 = vrcp.f32 %v5423_v27 }
0x1de3   : > { %v8080_v41 = vpop.eup %8079 }
0x1de4   : > { %v5427_v4 = vmul.f32 %v8080_v41, %v9165_v0 }
0x1df9   : > { %3567 = vadd.xlane.f32.xlu1 %v3566_v21 }
0x1e47   : > { %v5430_v42 = vpop.permute.xlu1 %5429 }
0x1e48   : > { %v5432_v43 = vmul.f32 %v8080_v41, %v5430_v42 }
0x1e4a   : > { %5434 = vrot.lane.b32.xlu0 %v5432_v43, %s8357_s20 }
0x1e86   : > { %v3568_v7 = vpop.xlane.xlu1 %3567 }
0x1e87   : > { %v3576_v49 = vadd.f32 %v6805_v44, %v3568_v7 }
0x1e89   : > { %v3578_v25 = vsel %vm647_vm7, %v3576_v49, -inf }
0x1e8a   : > { %v3579_v50 = vmax.f32 %v3577_v19, %v3578_v25 }
0x1e8c   : > { %v3580_v40 = vrot.slane %v3579_v50, 4 }
0x1e8e   : > { %v3581_v30 = vmax.f32 %v3579_v50, %v3580_v40 }
0x1e90   : > { %v3582_v51 = vrot.slane %v3581_v30, 2 }
0x1e92   : > { %v3583_v52 = vmax.f32 %v3581_v30, %v3582_v51 }
0x1e94   : > { %v3584_v54 = vrot.slane %v3583_v52, 1 }
0x1e96   : > { %v3585_v55 = vmax.f32 %v3583_v52, %v3584_v54 }
0x1e98   : > { %v3586_v57 = vsub.f32 %v3575_v48, %v3585_v55  ;;  %v3587_v62 = vsub.f32 %v3576_v49, %v3585_v55  ;;  %v6844_v55 = vld [vmem:[%s9389_s8 + $0x3] ss:$0 sm:$0xff] }
0x1e9a   : > { %v3588_v63 = vmul.f32 1.442695, %v3586_v57  ;;  %v3590_v3 = vmul.f32 1.442695, %v3587_v62 }
0x1e9c   : > { %8081 = vpow2.f32 %v3588_v63 }
0x1e9d   : > { %8083 = vpow2.f32 %v3590_v3 }
0x1ea6   : > { %v8082_v5 = vpop.eup %8081 }
0x1ea7   : > { %v8084_v32 = vpop.eup %8083  ;;  %v3592_v33 = vsel %vm647_vm7, %v8082_v5, 0.0 }
0x1ea8   : > { %v3593_v14 = vsel %vm647_vm7, %v8084_v32, 0.0 }
0x1ea9   : > { %v3594_v12 = vadd.f32 %v3593_v14, %v3592_v33 }
0x1eab   : > { %v3595_v47 = vrot.slane %v3594_v12, 4 }
0x1ead   : > { %v3596_v17 = vadd.f32 %v3595_v47, %v3594_v12 }
0x1eaf   : > { %v3597_v18 = vrot.slane %v3596_v17, 2 }
0x1eb1   : > { %v3598_v28 = vadd.f32 %v3597_v18, %v3596_v17 }
0x1eb3   : > { %v3599_v20 = vrot.slane %v3598_v28, 1 }
0x1eb5   : > { %v3600_v38 = vadd.f32 %v3599_v20, %v3598_v28 }
0x1eb7   : > { %8085 = vrcp.f32 %v3600_v38 }
0x1ebc   : > { %v5435_v39 = vpop.permute.xlu0 %5434 }
0x1ebd   : > { %v9205_v13 = vadd.f32 %v5435_v39, %v5427_v4 }
0x1ebf   : > { %8087 = vtanh.f32 %v9205_v13 }
0x1ec1   : > { %v8086_v31 = vpop.eup %8085 }
0x1ec2   : > { %v3602_v58 = vmul.f32 %v8086_v31, %v8082_v5  ;;  %v3603_v61 = vmul.f32 %v8086_v31, %v8084_v32 }
0x1ec9   : > { %v8088_v56 = vpop.eup %8087 }
0x1eca   : > { %5440 = vrot.lane.b32.xlu0 %v8088_v56, %s8356_s19 }
0x1ece   : > { %3606 = vperm.xlu0 %7981, %v3602_v58  }
0x1ed2   : > { %3611 = vperm.xlu0 %7981, %v3603_v61  }
0x1f3c   : > { %v5441_v23 = vpop.permute.xlu0 %5440 }
0x1f3d   : > { %v5443_v29 = vmul.f32 %v8080_v41, %v5441_v23  ;;  %v5027_v41 = vmul.f32 %v6843_v8, %v9215_v37 }
0x1f3f   : > { %5445 = vrot.lane.b32.xlu0 %v5443_v29, %s8357_s20 }
0x1f4d   : > { %v3607_v2 = vpop.permute.xlu0 %3606 }
0x1f4e   : > { %v3614_v0 = vmul.f32 %v3607_v2, %v8927_v34  ;;  %v5029_v34 = vsel %vm632_vm2, %v5027_v41, 0.0 }
0x1f50   : > { %v3616_v35 = vsel %vm632_vm2, %v3614_v0, 0.0 }
0x1f51   : > { %v3612_v1 = vpop.permute.xlu0 %3611 }
0x1f52   : > { %v3615_v60 = vmul.f32 %v3612_v1, %v8929_v11 }
0x1f54   : > { %v3617_v26 = vsel %vm632_vm2, %v3615_v60, 0.0 }
0x1f55   : > { %v3618_v21 = vadd.f32 %v3617_v26, %v3616_v35 }
0x1f57   : > { %v3619_v24 = vrot.slane %v3618_v21, 4 }
0x1f59   : > { %v3620_v27 = vadd.f32 %v3619_v24, %v3618_v21 }
0x1f5b   : > { %v3621_v42 = vrot.slane %v3620_v27, 2 }
0x1f5d   : > { %v3622_v43 = vadd.f32 %v3621_v42, %v3620_v27 }
0x1f5e   : > { %5030 = vadd.xlane.f32.xlu0 %v5029_v34 }
0x1f5f   : > { %v3623_v44 = vrot.slane %v3622_v43, 1 }
0x1f61   : > { %v3624_v11 = vadd.f32 %v3623_v44, %v3622_v43 }
0x1f63   : > { %7484 = vmatmul.mubr.msk.f32.vlgmr.msra.gmra.mrb[42].mxu1 %vm632_vm2, %v3624_v11 }
0x1f64   : > { %7843 = vmatpush3.bf16.msra.mxu1 %v9118_v36  ;;  %7505 = vmatprep.mubr.msk.f32.mxu1 %vm8353_vm3, %v8354_v16 }
0x1f65   : > { %7844 = vmatprep.subr.bf16.mxu1 %v8352_v15 }
0x1f68   : > { %7846 = vmatpush3.bf16.msra.mxu1 %v9128_v53 }
0x1f69   : > { %7853 = vmatprep.subr.bf16.mxu1 %v8352_v15 }
0x1fb1   : > { %v9226_v9 = vpop.permute.xlu0 %5445 }
0x1fb2   : > { %7473 = vmatmul.mubr.msk.f32.vlgmr.msra.gmra.mrb[38].mxu0 %vm632_vm2, %v9226_v9 }
0x1fb3   : > { %7837 = vmatpush3.bf16.msra.mxu0 %v9085_v59  ;;  %7494 = vmatprep.mubr.msk.f32.mxu0 %vm8353_vm3, %v8354_v16  ;;  %v5016_v59 = vmul.f32 0.25, %v9143_v6 }
0x1fb4   : > { %7838 = vmatprep.subr.bf16.mxu0 %v8352_v15 }
0x1fb5   : > { %v5028_v25 = vmul.f32 %v6843_v8, %v5016_v59 }
0x1fb7   : > { %7840 = vmatpush3.bf16.msra.mxu0 %v9089_v10  ;;  %v5032_v50 = vsel %vm632_vm2, %v5028_v25, 0.0  ;;  %v6856_v25 = vld [vmem:[%s9390_s9 + $0x20] sm:$0xff] }
0x1fb8   : > { %7847 = vmatprep.subr.bf16.mxu0 %v8352_v15 }
0x1feb   : > { %v5031_v57 = vpop.xlane.xlu0 %5030 }
0x1fec   : > { %v5041_v6 = vadd.f32 %v6844_v55, %v5031_v57  ;;  %v5799_v57 = vld [vmem:[#allocation12 + $0x38] sm:$0xff] }
0x1fee   : > { %v5043_v3 = vsel %vm647_vm7, %v5041_v6, -inf }
0x2036   : > { %v5588_v36 = vpop.f32.mrb[42].mxu1 }
0x2037   : > { %v7485_v53 = vpop.f32.mrb[43].mxu1 }
0x2085   : > { %v5515_v45 = vpop.f32.mrb[38].mxu0 }
0x2086   : > { %v5589_v48 = vadd.f32 %v5588_v36, %v5515_v45  ;;  %v7474_v7 = vpop.f32.mrb[39].mxu0 }
0x2088   : > { %v5592_v49 = vadd.f32 %v5589_v48, %v9151_v46 }
0x208a   : > { %8089 = vtanh.f32 %v5592_v49  ;;  %v6852_v10 = vmul.f32 -1.442695, %v5592_v49 }
0x208c   : > { %8091 = vpow2.f32 %v6852_v10 }
0x2094   : > { %v8090_v19 = vpop.eup %8089 }
0x2095   : > { %5602 = vrot.lane.b32.xlu1 %v8090_v19, %s8356_s19 }
0x2096   : > { %v8092_v40 = vpop.eup %8091 }
0x2097   : > { %v5596_v30 = vadd.f32 1.0, %v8092_v40  ;;  %v6858_v40 = vld [vmem:[%s9390_s9 + $0x30] sm:$0xff] }
0x2099   : > { %8093 = vrcp.f32 %v5596_v30  ;;  %v6859_v30 = vld [vmem:[%s9390_s9 + $0x38] sm:$0xff] }
0x20a3   : > { %v8094_v51 = vpop.eup %8093 }
0x20a4   : > { %v5600_v35 = vmul.f32 %v8094_v51, %v9205_v13 }
0x20b9   : > { %5033 = vadd.xlane.f32.xlu1 %v5032_v50  ;;  %v6857_v50 = vld [vmem:[%s9390_s9 + $0x28] sm:$0xff] }
0x20ba   : > { %v7854_v10 = vpack.c.bf16 %v6857_v50, %v6856_v25 }
0x2107   : > { %v5603_v52 = vpop.permute.xlu1 %5602 }
0x2108   : > { %v5605_v54 = vmul.f32 %v8094_v51, %v5603_v52  ;;  %v5797_v52 = vld [vmem:[#allocation12 + $0x28] sm:$0xff] }
0x210a   : > { %5607 = vrot.lane.b32.xlu0 %v5605_v54, %s8357_s20 }
0x2146   : > { %v5034_v62 = vpop.xlane.xlu1 %5033 }
0x2147   : > { %v5042_v63 = vadd.f32 %v6844_v55, %v5034_v62  ;;  %v5798_v55 = vld [vmem:[#allocation12 + $0x30] sm:$0xff] }
0x2149   : > { %v5044_v5 = vsel %vm647_vm7, %v5042_v63, -inf }
0x214a   : > { %v5045_v32 = vmax.f32 %v5043_v3, %v5044_v5 }
0x214c   : > { %v5046_v33 = vrot.slane %v5045_v32, 4 }
0x214e   : > { %v5047_v14 = vmax.f32 %v5045_v32, %v5046_v33 }
0x2150   : > { %v5048_v12 = vrot.slane %v5047_v14, 2 }
0x2152   : > { %v5049_v47 = vmax.f32 %v5047_v14, %v5048_v12 }
0x2154   : > { %v5050_v17 = vrot.slane %v5049_v47, 1 }
0x2156   : > { %v5051_v18 = vmax.f32 %v5049_v47, %v5050_v17 }
0x2158   : > { %v5052_v28 = vsub.f32 %v5041_v6, %v5051_v18  ;;  %v5053_v20 = vsub.f32 %v5042_v63, %v5051_v18 }
0x215a   : > { %v5054_v38 = vmul.f32 1.442695, %v5052_v28  ;;  %v5056_v4 = vmul.f32 1.442695, %v5053_v20  ;;  %v9313_v28 = vld [vmem:[%s9392_s11 + $0x1] sm:$0x1] }
0x215c   : > { %8095 = vpow2.f32 %v5054_v38 }
0x215d   : > { %8097 = vpow2.f32 %v5056_v4 }
0x2166   : > { %v8096_v39 = vpop.eup %8095 }
0x2167   : > { %v8098_v31 = vpop.eup %8097  ;;  %v5058_v56 = vsel %vm647_vm7, %v8096_v39, 0.0 }
0x2168   : > { %v5059_v58 = vsel %vm647_vm7, %v8098_v31, 0.0 }
0x2169   : > { %v5060_v61 = vadd.f32 %v5059_v58, %v5058_v56 }
0x216b   : > { %v5061_v23 = vrot.slane %v5060_v61, 4 }
0x216d   : > { %v5062_v29 = vadd.f32 %v5061_v23, %v5060_v61 }
0x216f   : > { %v5063_v2 = vrot.slane %v5062_v29, 2 }
0x2171   : > { %v5064_v0 = vadd.f32 %v5063_v2, %v5062_v29 }
0x2173   : > { %v5065_v1 = vrot.slane %v5064_v0, 1 }
0x2175   : > { %v5066_v60 = vadd.f32 %v5065_v1, %v5064_v0 }
0x2177   : > { %8099 = vrcp.f32 %v5066_v60 }
0x217c   : > { %v5608_v26 = vpop.permute.xlu0 %5607 }
0x217d   : > { %v9249_v21 = vadd.f32 %v5608_v26, %v5600_v35 }
0x217f   : > { %8101 = vtanh.f32 %v9249_v21 }
0x2181   : > { %v8100_v8 = vpop.eup %8099 }
0x2182   : > { %v5068_v24 = vmul.f32 %v8100_v8, %v8096_v39  ;;  %v5069_v27 = vmul.f32 %v8100_v8, %v8098_v31 }
0x2184   : > { %5072 = vperm.xlu0 %7981, %v5068_v24  }
0x2188   : > { %5077 = vperm.xlu0 %7981, %v5069_v27  }
0x2189   : > { %v8102_v41 = vpop.eup %8101 }
0x218a   : > { %5613 = vrot.lane.b32.xlu1 %v8102_v41, %s8356_s19 }
0x21fc   : > { %v5614_v42 = vpop.permute.xlu1 %5613 }
0x21fd   : > { %v5616_v43 = vmul.f32 %v8094_v51, %v5614_v42  ;;  %v7857_v51 = vpack.c.bf16 %v6859_v30, %v6858_v40 }
0x21ff   : > { %5618 = vrot.lane.b32.xlu0 %v5616_v43, %s8357_s20 }
0x2203   : > { %v5073_v34 = vpop.permute.xlu0 %5072 }
0x2204   : > { %v5080_v13 = vmul.f32 %v5073_v34, %v9215_v37 }
0x2206   : > { %v5082_v36 = vsel %vm632_vm2, %v5080_v13, 0.0 }
0x2207   : > { %v5078_v44 = vpop.permute.xlu0 %5077 }
0x2208   : > { %v5081_v11 = vmul.f32 %v5078_v44, %v5016_v59 }
0x220a   : > { %v5083_v53 = vsel %vm632_vm2, %v5081_v11, 0.0 }
0x220b   : > { %v5084_v45 = vadd.f32 %v5083_v53, %v5082_v36 }
0x220d   : > { %v5085_v48 = vrot.slane %v5084_v45, 4 }
0x220f   : > { %v5086_v7 = vadd.f32 %v5085_v48, %v5084_v45 }
0x2211   : > { %v5087_v49 = vrot.slane %v5086_v7, 2 }
0x2213   : > { %v5088_v19 = vadd.f32 %v5087_v49, %v5086_v7 }
0x2215   : > { %v5089_v37 = vrot.slane %v5088_v19, 1 }
0x2217   : > { %v5090_v59 = vadd.f32 %v5089_v37, %v5088_v19 }
0x2219   : > { %7506 = vmatmul.mubr.msk.f32.vlgmr.msra.gmra.mrb[44].mxu1 %vm632_vm2, %v5090_v59 }
0x221a   : > { %7855 = vmatpush3.bf16.msra.mxu1 %v7854_v10  ;;  %7527 = vmatprep.mubr.msk.f32.mxu1 %vm8353_vm3, %v8354_v16 }
0x221b   : > { %7856 = vmatprep.subr.bf16.mxu1 %v8352_v15 }
0x221e   : > { %7858 = vmatpush3.bf16.msra.mxu1 %v7857_v51 }
0x221f   : > { %7865 = vmatprep.subr.bf16.mxu1 %v8352_v15 }
0x2221   : > { %7528 = vmatmul.mubr.msk.f32.vlgmr.msra.gmra.mrb[46].mxu1 %vm632_vm2, %v9181_v22  ;;  %v5796_v22 = vld [vmem:[#allocation12 + $0x20] sm:$0xff] }
0x2222   : > { %7867 = vmatpush3.bf16.msra.mxu1 %v7854_v10  ;;  %7549 = vmatprep.mubr.msk.f32.mxu1 %vm8353_vm3, %v8354_v16  ;;  %v9286_v54 = vpack.c.bf16 %v5797_v52, %v5796_v22 }
0x2223   : > { %7868 = vmatprep.subr.bf16.mxu1 %v8352_v15 }
0x2226   : > { %7870 = vmatpush3.bf16.msra.mxu1 %v7857_v51 }
0x2227   : > { %7877 = vmatprep.subr.bf16.mxu1 %v8352_v15 }
0x2229   : > { %7550 = vmatmul.mubr.msk.f32.vlgmr.msra.gmra.mrb[48].mxu1 %vm632_vm2, %v9226_v9  ;;  %v9291_v9 = vpack.c.bf16 %v5799_v57, %v5798_v55 }
0x222a   : > { %7879 = vmatpush3.bf16.msra.mxu1 %v7854_v10  ;;  %7571 = vmatprep.mubr.msk.f32.mxu1 %vm8353_vm3, %v8354_v16 }
0x222b   : > { %7880 = vmatprep.subr.bf16.mxu1 %v8352_v15 }
0x222e   : > { %7882 = vmatpush3.bf16.msra.mxu1 %v7857_v51 }
0x222f   : > { %7889 = vmatprep.subr.bf16.mxu1 %v8352_v15 }
0x2271   : > { %v5619_v6 = vpop.permute.xlu0 %5618 }
0x2272   : > { %7495 = vmatmul.mubr.msk.f32.vlgmr.msra.gmra.mrb[40].mxu0 %vm632_vm2, %v5619_v6  ;;  %7572 = vmatmul.mubr.msk.f32.vlgmr.msra.gmra.mrb[50].mxu1 %vm632_vm2, %v5619_v6 }
0x2273   : > { %7849 = vmatpush3.bf16.msra.mxu0 %v9286_v54  ;;  %7516 = vmatprep.mubr.msk.f32.mxu0 %vm8353_vm3, %v8354_v16 }
0x2274   : > { %7850 = vmatprep.subr.bf16.mxu0 %v8352_v15  ;;  %7891 = vmatpush3.bf16.msra.mxu1 %v7854_v10 }
0x2275   : > { %7892 = vmatprep.subr.bf16.mxu1 %v8352_v15  ;;  %7593 = vmatprep.mubr.msk.f32.mxu1 %vm8353_vm3, %v8354_v16 }
0x2277   : > { %7852 = vmatpush3.bf16.msra.mxu0 %v9291_v9 }
0x2278   : > { %7859 = vmatprep.subr.bf16.mxu0 %v8352_v15  ;;  %7894 = vmatpush3.bf16.msra.mxu1 %v7857_v51 }
0x227a   : > { %7517 = vmatmul.mubr.f32.vlgmr.msra.gmra.mrb[42].mxu0 %v8354_v16 }
0x227b   : > { %7861 = vmatpush3.bf16.msra.mxu0 %v9286_v54  ;;  %7538 = vmatprep.mubr.msk.f32.mxu0 %vm8353_vm3, %v8354_v16 }
0x227c   : > { %7862 = vmatprep.subr.bf16.mxu0 %v8352_v15 }
0x227f   : > { %7864 = vmatpush3.bf16.msra.mxu0 %v9291_v9 }
0x2280   : > { %7871 = vmatprep.subr.bf16.mxu0 %v8352_v15 }
0x22ec   : > { %v5761_v62 = vpop.f32.mrb[44].mxu1 }
0x22ed   : > { %v7507_v63 = vpop.f32.mrb[45].mxu1 }
0x22f4   : > { %v5938_v3 = vpop.f32.mrb[46].mxu1 }
0x22f5   : > { %v7529_v5 = vpop.f32.mrb[47].mxu1 }
0x22fc   : > { %v6108_v32 = vpop.f32.mrb[48].mxu1 }
0x22fd   : > { %v7551_v33 = vpop.f32.mrb[49].mxu1 }
0x2345   : > { %v5688_v14 = vpop.f32.mrb[40].mxu0  ;;  %v9308_v12 = vpop.f32.mrb[50].mxu1 }
0x2346   : > { %v5762_v47 = vadd.f32 %v5761_v62, %v5688_v14  ;;  %v7496_v17 = vpop.f32.mrb[41].mxu0  ;;  %v7573_v18 = vpop.f32.mrb[51].mxu1 }
0x2348   : > { %v5765_v19 = vadd.f32 %v5762_v47, %v9151_v46 }
0x234a   : > { %v6855_v37 = vmul.f32 -1.442695, %v5765_v19 }
0x234d   : > { %v5868_v20 = vpop.f32.mrb[42].mxu0 }
0x234e   : > { %v5939_v38 = vadd.f32 %v5938_v3, %v5868_v20  ;;  %v7518_v4 = vpop.f32.mrb[43].mxu0 }
0x2350   : > { %v5942_v39 = vadd.f32 %v9313_v28, %v5939_v38 }
0x2352   : > { %8103 = vtanh.f32 %v5942_v39  ;;  %v6862_v56 = vmul.f32 -1.442695, %v5942_v39 }
0x2354   : > { %8105 = vpow2.f32 %v6862_v56 }
0x235c   : > { %v8104_v31 = vpop.eup %8103 }
0x235d   : > { %5952 = vrot.lane.b32.xlu0 %v8104_v31, %s8356_s19 }
0x235e   : > { %v8106_v58 = vpop.eup %8105 }
0x235f   : > { %v5946_v61 = vadd.f32 1.0, %v8106_v58 }
0x2361   : > { %8107 = vrcp.f32 %v5946_v61 }
0x236b   : > { %v8108_v23 = vpop.eup %8107 }
0x236c   : > { %v5950_v0 = vmul.f32 0.0, %v8108_v23 }
0x23cf   : > { %v5953_v29 = vpop.permute.xlu0 %5952 }
0x23d0   : > { %v5955_v2 = vmul.f32 %v8108_v23, %v5953_v29 }
0x23d2   : > { %5957 = vrot.lane.b32.xlu1 %v5955_v2, %s8357_s20 }
0x2444   : > { %v5958_v1 = vpop.permute.xlu1 %5957 }
0x2445   : > { %v5960_v60 = vadd.f32 %v5958_v1, %v5950_v0 }
0x2447   : > { %8109 = vtanh.f32 %v5960_v60 }
0x2451   : > { %v8110_v35 = vpop.eup %8109 }
0x2452   : > { %5963 = vrot.lane.b32.xlu0 %v8110_v35, %s8356_s19 }
0x24c4   : > { %v5964_v26 = vpop.permute.xlu0 %5963 }
0x24c5   : > { %v5966_v8 = vmul.f32 %v8108_v23, %v5964_v26 }
0x24c7   : > { %5968 = vrot.lane.b32.xlu1 %v5966_v8, %s8357_s20 }
0x2539   : > { %v5969_v24 = vpop.permute.xlu1 %5968 }
0x253a   : > { %7539 = vmatmul.mubr.msk.f32.vlgmr.msra.gmra.mrb[44].mxu0 %vm632_vm2, %v5969_v24 }
0x253b   : > { %7873 = vmatpush3.bf16.msra.mxu0 %v9286_v54  ;;  %7560 = vmatprep.mubr.msk.f32.mxu0 %vm8353_vm3, %v8354_v16 }
0x253c   : > { %7874 = vmatprep.subr.bf16.mxu0 %v8352_v15 }
0x253f   : > { %7876 = vmatpush3.bf16.msra.mxu0 %v9291_v9 }
0x2540   : > { %7883 = vmatprep.subr.bf16.mxu0 %v8352_v15 }
0x260d   : > { %v6038_v27 = vpop.f32.mrb[44].mxu0 }
0x260e   : > { %v6109_v41 = vadd.f32 %v6108_v32, %v6038_v27  ;;  %v7540_v42 = vpop.f32.mrb[45].mxu0 }
0x2610   : > { %v6112_v43 = vadd.f32 %v9313_v28, %v6109_v41 }
0x2612   : > { %8111 = vtanh.f32 %v6112_v43  ;;  %v6865_v13 = vmul.f32 -1.442695, %v6112_v43 }
0x2614   : > { %8113 = vpow2.f32 %v6865_v13  ;;  %v6483_v13 = vld [vmem:[%s9393_s12 + $0x8] sm:$0xff] }
0x261c   : > { %v8112_v34 = vpop.eup %8111 }
0x261d   : > { %6122 = vrot.lane.b32.xlu0 %v8112_v34, %s8356_s19 }
0x261e   : > { %v8114_v44 = vpop.eup %8113 }
0x261f   : > { %v6116_v11 = vadd.f32 1.0, %v8114_v44  ;;  %v6484_v44 = vld [vmem:[%s9393_s12 + $0x10] sm:$0xff] }
0x2621   : > { %8115 = vrcp.f32 %v6116_v11 }
0x262b   : > { %v8116_v36 = vpop.eup %8115 }
0x262c   : > { %v6120_v48 = vmul.f32 %v8116_v36, %v5960_v60 }
0x268f   : > { %v6123_v53 = vpop.permute.xlu0 %6122 }
0x2690   : > { %v6125_v45 = vmul.f32 %v8116_v36, %v6123_v53 }
0x2692   : > { %6127 = vrot.lane.b32.xlu1 %v6125_v45, %s8357_s20 }
0x2704   : > { %v6128_v7 = vpop.permute.xlu1 %6127 }
0x2705   : > { %v6130_v49 = vadd.f32 %v6128_v7, %v6120_v48 }
0x2707   : > { %8117 = vtanh.f32 %v6130_v49 }
0x2708   : > { %8119 = vtanh.f32 %v5765_v19  ;;  %v6486_v19 = vld [vmem:[#allocation3] sm:$0x1] }
0x2709   : > { %8121 = vpow2.f32 %v6855_v37 }
0x2711   : > { %v8118_v25 = vpop.eup %8117 }
0x2712   : > { %6133 = vrot.lane.b32.xlu0 %v8118_v25, %s8356_s19  ;;  %v8120_v50 = vpop.eup %8119 }
0x2713   : > { %v8122_v10 = vpop.eup %8121 }
0x2714   : > { %v5769_v59 = vadd.f32 1.0, %v8122_v10 }
0x2716   : > { %5775 = vrot.lane.b32.xlu0 %v8120_v50, %s8356_s19  ;;  %8123 = vrcp.f32 %v5769_v59 }
0x2720   : > { %v8124_v51 = vpop.eup %8123 }
0x2721   : > { %v5773_v55 = vmul.f32 %v8124_v51, %v9249_v21 }
0x2784   : > { %v6134_v40 = vpop.permute.xlu0 %6133 }
0x2785   : > { %v6136_v30 = vmul.f32 %v8116_v36, %v6134_v40  ;;  %v6485_v36 = vld [vmem:[%s9393_s12 + $0x18] sm:$0xff] }
0x2786   : > { %v7899_v53 = vpack.c.bf16 %v6485_v36, %v6484_v44 }
0x2787   : > { %6138 = vrot.lane.b32.xlu1 %v6136_v30, %s8357_s20 }
0x2788   : > { %v5776_v22 = vpop.permute.xlu0 %5775 }
0x2789   : > { %v5778_v46 = vmul.f32 %v8124_v51, %v5776_v22 }
0x278b   : > { %5780 = vrot.lane.b32.xlu0 %v5778_v46, %s8357_s20 }
0x27f9   : > { %v6139_v52 = vpop.permute.xlu1 %6138 }
0x27fa   : > { %7561 = vmatmul.mubr.msk.f32.vlgmr.msra.gmra.mrb[46].mxu0 %vm632_vm2, %v6139_v52 }
0x27fb   : > { %7885 = vmatpush3.bf16.msra.mxu0 %v9286_v54  ;;  %7582 = vmatprep.mubr.msk.f32.mxu0 %vm8353_vm3, %v8354_v16 }
0x27fc   : > { %7886 = vmatprep.subr.bf16.mxu0 %v8352_v15 }
0x27fd   : > { %v5781_v57 = vpop.permute.xlu0 %5780 }
0x27fe   : > { %v5783_v6 = vadd.f32 %v5781_v57, %v5773_v55 }
0x27ff   : > { %7888 = vmatpush3.bf16.msra.mxu0 %v9291_v9 }
0x2800   : > { %8125 = vtanh.f32 %v5783_v6  ;;  %7895 = vmatprep.subr.bf16.mxu0 %v8352_v15 }
0x280a   : > { %v8126_v62 = vpop.eup %8125 }
0x280b   : > { %5786 = vrot.lane.b32.xlu0 %v8126_v62, %s8356_s19 }
0x287d   : > { %v5787_v4 = vpop.permute.xlu0 %5786 }
0x287e   : > { %v5789_v39 = vmul.f32 %v8124_v51, %v5787_v4 }
0x28cd   : > { %v6208_v63 = vpop.f32.mrb[46].mxu0 }
0x28ce   : > { %v6279_v54 = vadd.f32 %v9308_v12, %v6208_v63  ;;  %v7562_v3 = vpop.f32.mrb[47].mxu0 }
0x28d0   : > { %v6282_v5 = vadd.f32 %v9313_v28, %v6279_v54 }
0x28d2   : > { %8127 = vtanh.f32 %v6282_v5  ;;  %v6868_v32 = vmul.f32 -1.442695, %v6282_v5 }
0x28d4   : > { %8129 = vpow2.f32 %v6868_v32 }
0x28dc   : > { %v8128_v21 = vpop.eup %8127 }
0x28dd   : > { %6292 = vrot.lane.b32.xlu1 %v8128_v21, %s8356_s19 }
0x28de   : > { %v8130_v33 = vpop.eup %8129 }
0x28df   : > { %v6286_v9 = vadd.f32 1.0, %v8130_v33 }
0x28e1   : > { %8131 = vrcp.f32 %v6286_v9 }
0x28eb   : > { %v8132_v14 = vpop.eup %8131 }
0x28ec   : > { %v6290_v18 = vmul.f32 %v8132_v14, %v6130_v49 }
0x294f   : > { %v6293_v47 = vpop.permute.xlu1 %6292 }
0x2950   : > { %v6295_v17 = vmul.f32 %v8132_v14, %v6293_v47 }
0x2952   : > { %6297 = vrot.lane.b32.xlu1 %v6295_v17, %s8357_s20 }
0x29c4   : > { %v6298_v20 = vpop.permute.xlu1 %6297 }
0x29c5   : > { %v6300_v12 = vadd.f32 %v6298_v20, %v6290_v18 }
0x29c7   : > { %8133 = vtanh.f32 %v6300_v12 }
0x29d1   : > { %v8134_v38 = vpop.eup %8133 }
0x29d2   : > { %6303 = vrot.lane.b32.xlu1 %v8134_v38, %s8356_s19 }
0x29d6   : > { %6383 = vrot.lane.b32.xlu1 %v5789_v39, %s8357_s20 }
0x2a44   : > { %v6304_v31 = vpop.permute.xlu1 %6303 }
0x2a45   : > { %v6306_v56 = vmul.f32 %v8132_v14, %v6304_v31 }
0x2a47   : > { %6308 = vrot.lane.b32.xlu0 %v6306_v56, %s8357_s20 }
0x2a48   : > { %v6384_v58 = vpop.permute.xlu1 %6383 }
0x2a49   : > { %7594 = vmatmul.mubr.msk.f32.vlgmr.msra.gmra.mrb[52].mxu1 %vm632_vm2, %v6384_v58 }
0x2ab9   : > { %v6309_v61 = vpop.permute.xlu0 %6308 }
0x2aba   : > { %7583 = vmatmul.mubr.msk.f32.vlgmr.msra.gmra.mrb[48].mxu0 %vm632_vm2, %v6309_v61 }
0x2abb   : > { %7604 = vmatprep.mubr.msk.f32.mxu0 %vm8353_vm3, %v8354_v16  ;;  %vm6568_vm3 = vcmask 0  }
0x2b1c   : > { %v6453_v23 = vpop.f32.mrb[52].mxu1 }
0x2b1d   : > { %v7595_v29 = vpop.f32.mrb[53].mxu1 }
0x2b8d   : > { %v6378_v2 = vpop.f32.mrb[48].mxu0 }
0x2b8e   : > { %v6454_v0 = vadd.f32 %v6453_v23, %v6378_v2  ;;  %v7584_v1 = vpop.f32.mrb[49].mxu0 }
0x2b90   : > { %v6457_v60 = vadd.f32 %v9313_v28, %v6454_v0  ;;  %v6482_v28 = vld [vmem:[%s9393_s12] sm:$0xff] }
0x2b91   : > { %v7896_v11 = vpack.c.bf16 %v6483_v13, %v6482_v28 }
0x2b92   : > { %8135 = vtanh.f32 %v6457_v60  ;;  %v6871_v26 = vmul.f32 -1.442695, %v6457_v60 }
0x2b93   : > { %7897 = vmatpush3.bf16.msra.mxu0 %v7896_v11 }
0x2b94   : > { %8137 = vpow2.f32 %v6871_v26  ;;  %7898 = vmatprep.subr.bf16.mxu0 %v8352_v15 }
0x2b97   : > { %7900 = vmatpush3.bf16.msra.mxu0 %v7899_v53 }
0x2b9c   : > { %v8136_v35 = vpop.eup %8135 }
0x2b9d   : > { %6467 = vrot.lane.b32.xlu0 %v8136_v35, %s8356_s19 }
0x2b9e   : > { %v8138_v8 = vpop.eup %8137 }
0x2b9f   : > { %v6461_v24 = vadd.f32 1.0, %v8138_v8 }
0x2ba1   : > { %8139 = vrcp.f32 %v6461_v24 }
0x2bab   : > { %v8140_v27 = vpop.eup %8139 }
0x2bac   : > { %v6465_v16 = vmul.f32 %v8140_v27, %v6300_v12 }
0x2c0f   : > { %v6468_v41 = vpop.permute.xlu0 %6467 }
0x2c10   : > { %v6470_v42 = vmul.f32 %v8140_v27, %v6468_v41 }
0x2c12   : > { %6472 = vrot.lane.b32.xlu1 %v6470_v42, %s8357_s20 }
0x2c84   : > { %v6473_v43 = vpop.permute.xlu1 %6472 }
0x2c85   : > { %v6475_v34 = vadd.f32 %v6473_v43, %v6465_v16 }
0x2c87   : > { %8141 = vtanh.f32 %v6475_v34 }
0x2c91   : > { %v8142_v45 = vpop.eup %8141 }
0x2c92   : > { %6478 = vrot.lane.b32.xlu0 %v8142_v45, %s8356_s19  ;;  %s593_s19 = scalar_lea.vmem %s9425_s29, %s9428_s18 }
0x2d04   : > { %v6479_v48 = vpop.permute.xlu0 %6478 }
0x2d05   : > { %v6481_v7 = vmul.f32 %v8140_v27, %v6479_v48 }
0x2d07   : > { %6488 = vrot.lane.b32.xlu1 %v6481_v7, %s8357_s20 }
0x2d79   : > { %v6489_v49 = vpop.permute.xlu1 %6488 }
0x2d7a   : > { %7605 = vmatmul.mubr.msk.f32.vlgmr.msra.gmra.mrb[50].mxu0 %vm632_vm2, %v6489_v49 }
0x2e4d   : > { %v6558_v25 = vpop.f32.mrb[50].mxu0 }
0x2e4e   : > { %v6559_v50 = vadd.f32 %v6558_v25, %v6486_v19  ;;  %v7606_v37 = vpop.f32.mrb[51].mxu0 }
0x2e50   : > { %v6873_v10 = vmul.f32 -1.442695, %v6559_v50 }
0x2e52   : > { %8143 = vpow2.f32 %v6873_v10 }
0x2e5c   : > { %v8144_v59 = vpop.eup %8143 }
0x2e5d   : > { %v6565_v15 = vadd.f32 1.0, %v8144_v59 }
0x2e5f   : > { %8145 = vrcp.f32 %v6565_v15 }
0x2e69   : > { %v8146_v40 = vpop.eup %8145 }
0x2e6a   : > { %6569 = vst.msk [vmem:[%s593_s19] sm:$0x1] %vm6568_vm3, %v8146_v40 }
0x2e6b PF: > { %s9426_s20 = sld [smem:[#allocation18_spill]] }
0x2e71   : > { %s30_s15 = sadd.s32 1, %s9426_s20  }
0x2e72   : > { %p27_p9 = scmp.ge.s32.totalorder %s30_s15, 4  }
0x2e74   :  { %29 = sbr.rel (!%p27_p9) target bundleno = 7 (0x7), region = 190 }
0x2e7b   :  { %6587 = vsyncpa [#allocation5], 1 }
0x2e7c   :  { %6589 = vsyncpa [#allocation5 + $0x1], 1 }
0x2e7d   :  { %6590 = vsyncpa [#allocation7], 1 }
0x2e7e   :  { %6591 = vsyncpa [#allocation10], 1 }
0x2e7f   :  { %6592 = vsyncpa [#allocation13], 1 }

</bundles_post_ra>
